<compile_context>
chip_gen: v7x
topology: tpu7x:2x2x1
jax: 0.10.0
libtpu: 0.0.40
codegen_flags: <defaults>
</compile_context>

<pallas_src>
import numpy as np
import jax
import jax.numpy as jnp
from jax import lax
from jax.experimental import pallas as pl
from jax.experimental.pallas import tpu as pltpu


def _round_up(x, m):
    return (x + m - 1) // m * m


# ----------------------------- Pallas kernel -------------------------------

def _hyper_layer(mv, mv_cols, x, hw_ref, hb_ref):
    """Fused hypernetwork layer for a (TB, d_in) activation tile.

    mv:      (TB, Maug)  augmented meta (trailing 1 folds static biases)
    mv_cols: tuple of (TB, 1) per-meta-slot columns (hoisted once per tile)
    x:       (TB, d_in)
    hw_ref:  (d_in, Maug*d_out)  m-major columns: hw[:, m*d_out:(m+1)*d_out]
    hb_ref:  (Maug, d_out)

    Computes  x @ w + b  with  w = sum_m mv[m]*HW[m],  b = mv @ HB,
    i.e. weight generation fused into one lane-dense MXU matmul.
    """
    d_out = hb_ref.shape[-1]
    t = jnp.dot(x, hw_ref[...], preferred_element_type=jnp.float32)      # (TB, Maug*d_out)
    acc = jnp.dot(mv, hb_ref[...], preferred_element_type=jnp.float32)   # bias (TB, d_out)
    for m, c in enumerate(mv_cols):                                      # Maug small & static
        acc = acc + c * t[:, m * d_out:(m + 1) * d_out]
    return acc


def hyper_ac_kernel(meta_ref, state_ref, action_ref,
                    a_hw1, a_hb1, a_hw2, a_hb2, a_hw3, a_hb3,   # actor params
                    c_hw1, c_hb1, c_hw2, c_hb2, c_hw3, c_hb3,   # critic params
                    out_ref):
    mv = meta_ref[...]                         # (TB, Maug)
    st = state_ref[...]                        # (TB, S)
    maug = mv.shape[1]
    a_dim = a_hb3.shape[-1]
    mv_cols = tuple(mv[:, m:m + 1] for m in range(maug))   # hoisted once per tile

    def net(hw1, hb1, hw2, hb2, hw3, hb3):
        h = jnp.maximum(_hyper_layer(mv, mv_cols, st, hw1, hb1), 0.0)
        h = jnp.maximum(_hyper_layer(mv, mv_cols, h, hw2, hb2), 0.0)
        return _hyper_layer(mv, mv_cols, h, hw3, hb3)

    logits = net(a_hw1, a_hb1, a_hw2, a_hb2, a_hw3, a_hb3)      # (TB, A)
    value = net(c_hw1, c_hb1, c_hw2, c_hb2, c_hw3, c_hb3)       # (TB, 1)

    # Categorical(logits=...).log_prob(action) and entropy (HyperAC.evaluate()).
    m = jnp.max(logits, axis=-1, keepdims=True)
    z = logits - m
    lse = jnp.log(jnp.sum(jnp.exp(z), axis=-1, keepdims=True))
    logp = z - lse                                              # log_softmax
    probs = jnp.exp(logp)

    act = action_ref[...]                                       # (TB, 1) int32
    idx = lax.broadcasted_iota(jnp.int32, logp.shape, 1)
    lp_a = jnp.sum(jnp.where(idx == act, logp, 0.0), axis=-1, keepdims=True)
    ent = -jnp.sum(probs * logp, axis=-1, keepdims=True)

    # Single lane-dense (TB, 128k) output block: zero-fill once, place the
    # narrow results at static column offsets -> one dense HBM writeback.
    out_ref[...] = jnp.zeros(out_ref.shape, out_ref.dtype)
    out_ref[:, 0:a_dim] = logits
    out_ref[:, a_dim:a_dim + 1] = value
    out_ref[:, a_dim + 1:a_dim + 2] = lp_a
    out_ref[:, a_dim + 2:a_dim + 3] = ent


# ------------------------------- wrappers -----------------------------------

def hyper_ac_evaluate(kparams, meta_aug, state, action, *, tb=128):
    """Runs the fused actor+critic hypernetwork kernel.

    Returns (actor_logits (B,A), state_values (B,1), log_probs (B,1), entropy (B,1)).
    """
    B, Maug = meta_aug.shape
    S = state.shape[1]
    (a_hw1, a_hb1, a_hw2, a_hb2, a_hw3, a_hb3,
     c_hw1, c_hb1, c_hw2, c_hb2, c_hw3, c_hb3) = kparams
    A = a_hb3.shape[-1]
    out_w = _round_up(A + 3, 128)          # packed: [logits | value | logp | ent | 0-pad]

    # Batch tiling (pad B so every tile is full; outputs are sliced back).
    tb = min(tb, _round_up(B, 8))
    Bp = _round_up(B, tb)
    n_tiles = Bp // tb

    def pad_rows(x):
        if x.shape[0] == Bp:
            return x
        return jnp.concatenate(
            [x, jnp.zeros((Bp - x.shape[0],) + x.shape[1:], x.dtype)], axis=0)

    meta_p = pad_rows(meta_aug)
    state_p = pad_rows(state)
    act_p = pad_rows(action.reshape(B, 1).astype(jnp.int32))

    def full(x):  # whole weight tensor resident each step
        return pl.BlockSpec(x.shape, lambda i: (0, 0))

    grid_spec = pltpu.PrefetchScalarGridSpec(
        num_scalar_prefetch=0,
        grid=(n_tiles,),
        in_specs=[
            pl.BlockSpec((tb, Maug), lambda i: (i, 0)),   # meta_aug
            pl.BlockSpec((tb, S), lambda i: (i, 0)),      # state
            pl.BlockSpec((tb, 1), lambda i: (i, 0)),      # action (VMEM, not prefetch)
            full(a_hw1), full(a_hb1), full(a_hw2), full(a_hb2),
            full(a_hw3), full(a_hb3),
            full(c_hw1), full(c_hb1), full(c_hw2), full(c_hb2),
            full(c_hw3), full(c_hb3),
        ],
        out_specs=pl.BlockSpec((tb, out_w), lambda i: (i, 0)),
    )

    weight_bytes = sum(int(np.prod(w.shape)) * w.dtype.itemsize for w in kparams)
    tile_bytes = 4 * tb * (Maug + S + 1 + out_w)
    # Re-derived VMEM budget (double-buffered blocks + headroom), clamped so it
    # also fits v7x's 64 MiB physical VMEM.  At larger H the weights should be
    # tiled over an extra grid axis instead of raising this further.
    vmem_limit = int(min(64 << 20,
                         max(32 << 20, 2 * (weight_bytes + tile_bytes) + (8 << 20))))

    flops = int(sum(2 * Bp * int(w.shape[0]) * int(w.shape[1]) for w in kparams))
    cost = pl.CostEstimate(
        flops=flops,
        transcendentals=int(Bp * (2 * A + 1)),
        bytes_accessed=int(weight_bytes + 4 * Bp * (Maug + S + 1 + out_w)))

    packed = pl.pallas_call(
        hyper_ac_kernel,
        out_shape=jax.ShapeDtypeStruct((Bp, out_w), jnp.float32),
        grid_spec=grid_spec,
        compiler_params=pltpu.CompilerParams(
            dimension_semantics=("parallel",),       # v7x: shard tiles over 2 TCs
            vmem_limit_bytes=vmem_limit),
        cost_estimate=cost,
    )(meta_p, state_p, act_p,
      a_hw1, a_hb1, a_hw2, a_hb2, a_hw3, a_hb3,
      c_hw1, c_hb1, c_hw2, c_hb2, c_hw3, c_hb3)

    packed = packed[:B]
    logits = packed[:, :A]
    values = packed[:, A:A + 1]
    logprobs = packed[:, A + 1:A + 2]
    entropy = packed[:, A + 2:A + 3]
    return logits, values, logprobs, entropy


def hyper_ac_act(kparams, meta_aug, state, key):
    """HyperAC.act(): kernel produces logits; sampling stays in JAX glue."""
    B = meta_aug.shape[0]
    dummy_action = jnp.zeros((B,), jnp.int32)
    logits, _, _, _ = hyper_ac_evaluate(kparams, meta_aug, state, dummy_action)
    # TODO(synk): Categorical.sample() is stochastic; done with jax.random here.
    action = jax.random.categorical(key, logits, axis=-1)
    logp = jax.nn.log_softmax(logits, axis=-1)
    action_logprob = jnp.take_along_axis(logp, action[:, None], axis=-1)[:, 0]
    probs = jax.nn.softmax(logits, axis=-1)
    return action, action_logprob, probs


# -------------------- parameter construction & pure-JAX ref -----------------

def make_hypernet_params(key, meta_dim, in_dim, out_dim, hidden_dim):
    """Params in the nn.Linear-style parameterization (generators of flattened weights)."""
    ks = jax.random.split(key, 12)
    dims = [(in_dim, hidden_dim), (hidden_dim, hidden_dim), (hidden_dim, out_dim)]
    p = {}
    for i, (di, do) in enumerate(dims, start=1):
        s_w = 1.0 / np.sqrt(meta_dim * di)
        p[f"HW{i}"] = jax.random.normal(ks[4 * i - 4], (meta_dim, di * do), jnp.float32) * s_w
        p[f"c{i}"] = jax.random.normal(ks[4 * i - 3], (di * do,), jnp.float32) * (1.0 / np.sqrt(di))
        p[f"HB{i}"] = jax.random.normal(ks[4 * i - 2], (meta_dim, do), jnp.float32) * (1.0 / np.sqrt(meta_dim))
        p[f"d{i}"] = jax.random.normal(ks[4 * i - 1], (do,), jnp.float32) * 0.1
    return p


def to_kernel_layout(p, in_dim, out_dim, hidden_dim, dtype=jnp.float32):
    """Kernel weight layout per layer:
       hw_flat : (d_in, Maug*d_out)  m-major columns (hw_flat[:, m*do:(m+1)*do] = HW_aug[m])
       hb_aug  : (Maug, d_out)
    where the trailing augmented-meta slot (constant 1) carries the static c/d biases.
    NOTE: on v6e/v7x pass dtype=jnp.bfloat16 to halve weight VMEM/HBM traffic
    (in-kernel accumulation stays f32)."""
    dims = [(in_dim, hidden_dim), (hidden_dim, hidden_dim), (hidden_dim, out_dim)]
    out = []
    for i, (di, do) in enumerate(dims, start=1):
        M = p[f"HW{i}"].shape[0]
        hw_aug = jnp.concatenate(
            [p[f"HW{i}"].reshape(M, di, do), p[f"c{i}"].reshape(1, di, do)], axis=0)   # (Maug, di, do)
        hw_flat = jnp.transpose(hw_aug, (1, 0, 2)).reshape(di, (M + 1) * do)            # (di, Maug*do)
        hb_aug = jnp.concatenate([p[f"HB{i}"], p[f"d{i}"][None, :]], axis=0)            # (Maug, do)
        out += [hw_flat.astype(dtype), hb_aug.astype(dtype)]
    return out  # [hw1, hb1, hw2, hb2, hw3, hb3]


def hypernet_forward_ref(p, meta_v, state, in_dim, out_dim, hidden_dim):
    """Pure-JAX reference matching the assumed PyTorch HyperNetwork.forward."""
    B = meta_v.shape[0]
    w1 = (meta_v @ p["HW1"] + p["c1"]).reshape(B, in_dim, hidden_dim)
    b1 = (meta_v @ p["HB1"] + p["d1"]).reshape(B, 1, hidden_dim)
    w2 = (meta_v @ p["HW2"] + p["c2"]).reshape(B, hidden_dim, hidden_dim)
    b2 = (meta_v @ p["HB2"] + p["d2"]).reshape(B, 1, hidden_dim)
    w3 = (meta_v @ p["HW3"] + p["c3"]).reshape(B, hidden_dim, out_dim)
    b3 = (meta_v @ p["HB3"] + p["d3"]).reshape(B, 1, out_dim)
    x = state[:, None, :]
    x = jax.nn.relu(jnp.einsum("bis,bso->bio", x, w1) + b1)
    x = jax.nn.relu(jnp.einsum("bih,bho->bio", x, w2) + b2)
    out = jnp.einsum("bih,bho->bio", x, w3) + b3
    return out[:, 0, :]


# ----------------------------------- main -----------------------------------

if __name__ == "__main__":
    # Small shapes consistent with HyperAC(meta_v_dim, state_dim, action_dim, hidden_dim).
    # B=200 deliberately not a multiple of the 128-row batch tile to exercise padding.
    B, META, S, A, H = 200, 3, 8, 4, 32

    root = jax.random.PRNGKey(0)
    k_actor, k_critic, k_meta, k_state, k_action, k_sample = jax.random.split(root, 6)

    actor_p = make_hypernet_params(k_actor, META, S, A, H)
    critic_p = make_hypernet_params(k_critic, META, S, 1, H)

    meta_v = jax.random.normal(k_meta, (B, META), jnp.float32)
    state = jax.random.normal(k_state, (B, S), jnp.float32)
    action = jax.random.randint(k_action, (B,), 0, A).astype(jnp.int32)

    # kernel-layout params + meta augmented with trailing 1 (folds static biases)
    kparams = tuple(to_kernel_layout(actor_p, S, A, H)
                    + to_kernel_layout(critic_p, S, 1, H))
    meta_aug = jnp.concatenate([meta_v, jnp.ones((B, 1), jnp.float32)], axis=1)

    # --- HyperAC.evaluate(meta_v, state, action) via the Pallas kernel ---
    logits, values, logprobs, entropy = jax.block_until_ready(
        hyper_ac_evaluate(kparams, meta_aug, state, action, tb=128))

    # --- pure-JAX reference for correctness ---
    ref_logits = hypernet_forward_ref(actor_p, meta_v, state, S, A, H)
    ref_values = hypernet_forward_ref(critic_p, meta_v, state, S, 1, H)
    ref_logp = jax.nn.log_softmax(ref_logits, axis=-1)
    ref_logprobs = jnp.take_along_axis(ref_logp, action[:, None], axis=-1)
    ref_entropy = -jnp.sum(jax.nn.softmax(ref_logits, -1) * ref_logp,
                           axis=-1, keepdims=True)

    np.testing.assert_allclose(np.asarray(logits), np.asarray(ref_logits),
                               rtol=1e-4, atol=1e-4)
    np.testing.assert_allclose(np.asarray(values), np.asarray(ref_values),
                               rtol=1e-4, atol=1e-4)
    np.testing.assert_allclose(np.asarray(logprobs), np.asarray(ref_logprobs),
                               rtol=1e-4, atol=1e-4)
    np.testing.assert_allclose(np.asarray(entropy), np.asarray(ref_entropy),
                               rtol=1e-4, atol=1e-4)

    # --- HyperAC.act(meta_v, state) (sampling is JAX glue around the kernel) ---
    act_out = jax.block_until_ready(hyper_ac_act(kparams, meta_aug, state, k_sample))

    print("KERNEL_OK")
</pallas_src>

<mosaic_0001>
module attributes {stable_mosaic.version = 11 : i64} {
  func.func @hyper_ac_kernel(%arg0: i32, %arg1: memref<128x4xf32, #tpu.memory_space<vmem>>, %arg2: memref<128x8xf32, #tpu.memory_space<vmem>>, %arg3: memref<128x1xi32, #tpu.memory_space<vmem>>, %arg4: memref<8x128xf32, #tpu.memory_space<vmem>>, %arg5: memref<4x32xf32, #tpu.memory_space<vmem>>, %arg6: memref<32x128xf32, #tpu.memory_space<vmem>>, %arg7: memref<4x32xf32, #tpu.memory_space<vmem>>, %arg8: memref<32x16xf32, #tpu.memory_space<vmem>>, %arg9: memref<4x4xf32, #tpu.memory_space<vmem>>, %arg10: memref<8x128xf32, #tpu.memory_space<vmem>>, %arg11: memref<4x32xf32, #tpu.memory_space<vmem>>, %arg12: memref<32x128xf32, #tpu.memory_space<vmem>>, %arg13: memref<4x32xf32, #tpu.memory_space<vmem>>, %arg14: memref<32x4xf32, #tpu.memory_space<vmem>>, %arg15: memref<4x1xf32, #tpu.memory_space<vmem>>, %arg16: memref<128x128xf32, #tpu.memory_space<vmem>>) attributes {dimension_semantics = [#tpu.dimension_semantics<parallel>], iteration_bounds = array<i64: 2>, scalar_prefetch = 0 : i64, scratch_operands = 0 : i64, tpu.core_type = #tpu.core_type<tc>, window_params = [{transform_indices = @transform_0, window_bounds = array<i64: 128, 4>}, {transform_indices = @transform_1, window_bounds = array<i64: 128, 8>}, {transform_indices = @transform_2, window_bounds = array<i64: 128, 1>}, {pipeline_mode = #tpu.pipeline_mode<synchronous>, transform_indices = @transform_3, window_bounds = array<i64: 8, 128>}, {pipeline_mode = #tpu.pipeline_mode<synchronous>, transform_indices = @transform_4, window_bounds = array<i64: 4, 32>}, {pipeline_mode = #tpu.pipeline_mode<synchronous>, transform_indices = @transform_5, window_bounds = array<i64: 32, 128>}, {pipeline_mode = #tpu.pipeline_mode<synchronous>, transform_indices = @transform_6, window_bounds = array<i64: 4, 32>}, {pipeline_mode = #tpu.pipeline_mode<synchronous>, transform_indices = @transform_7, window_bounds = array<i64: 32, 16>}, {pipeline_mode = #tpu.pipeline_mode<synchronous>, transform_indices = @transform_8, window_bounds = array<i64: 4, 4>}, {pipeline_mode = #tpu.pipeline_mode<synchronous>, transform_indices = @transform_9, window_bounds = array<i64: 8, 128>}, {pipeline_mode = #tpu.pipeline_mode<synchronous>, transform_indices = @transform_10, window_bounds = array<i64: 4, 32>}, {pipeline_mode = #tpu.pipeline_mode<synchronous>, transform_indices = @transform_11, window_bounds = array<i64: 32, 128>}, {pipeline_mode = #tpu.pipeline_mode<synchronous>, transform_indices = @transform_12, window_bounds = array<i64: 4, 32>}, {pipeline_mode = #tpu.pipeline_mode<synchronous>, transform_indices = @transform_13, window_bounds = array<i64: 32, 4>}, {pipeline_mode = #tpu.pipeline_mode<synchronous>, transform_indices = @transform_14, window_bounds = array<i64: 4, 1>}, {transform_indices = @transform_15, window_bounds = array<i64: 128, 128>}]} {
    %c0 = arith.constant 0 : index
    %c0_0 = arith.constant 0 : index
    %0 = vector.load %arg1[%c0, %c0_0] : memref<128x4xf32, #tpu.memory_space<vmem>>, vector<128x4xf32>
    %c0_1 = arith.constant 0 : index
    %c0_2 = arith.constant 0 : index
    %1 = vector.load %arg2[%c0_1, %c0_2] : memref<128x8xf32, #tpu.memory_space<vmem>>, vector<128x8xf32>
    %2 = vector.extract_strided_slice %0 {offsets = [0, 0], sizes = [128, 1], strides = [1, 1]} : vector<128x4xf32> to vector<128x1xf32>
    %3 = vector.extract_strided_slice %0 {offsets = [0, 1], sizes = [128, 1], strides = [1, 1]} : vector<128x4xf32> to vector<128x1xf32>
    %4 = vector.extract_strided_slice %0 {offsets = [0, 2], sizes = [128, 1], strides = [1, 1]} : vector<128x4xf32> to vector<128x1xf32>
    %5 = vector.extract_strided_slice %0 {offsets = [0, 3], sizes = [128, 1], strides = [1, 1]} : vector<128x4xf32> to vector<128x1xf32>
    %c0_3 = arith.constant 0 : index
    %c0_4 = arith.constant 0 : index
    %6 = vector.load %arg4[%c0_3, %c0_4] : memref<8x128xf32, #tpu.memory_space<vmem>>, vector<8x128xf32>
    %cst = arith.constant dense<0.000000e+00> : vector<128x128xf32>
    %7 = tpu.matmul %1, %6, %cst {dimension_numbers = #tpu.dot_dimension_numbers<[1], [0], [0], [1], [0, 0, 1, 1], [], []>} : vector<128x8xf32>, vector<8x128xf32>, vector<128x128xf32> -> vector<128x128xf32>
    %c0_5 = arith.constant 0 : index
    %c0_6 = arith.constant 0 : index
    %8 = vector.load %arg5[%c0_5, %c0_6] : memref<4x32xf32, #tpu.memory_space<vmem>>, vector<4x32xf32>
    %cst_7 = arith.constant dense<0.000000e+00> : vector<128x32xf32>
    %9 = tpu.matmul %0, %8, %cst_7 {dimension_numbers = #tpu.dot_dimension_numbers<[1], [0], [0], [1], [0, 0, 1, 1], [], []>} : vector<128x4xf32>, vector<4x32xf32>, vector<128x32xf32> -> vector<128x32xf32>
    %10 = vector.extract_strided_slice %7 {offsets = [0, 0], sizes = [128, 32], strides = [1, 1]} : vector<128x128xf32> to vector<128x32xf32>
    %11 = vector.broadcast %2 : vector<128x1xf32> to vector<128x32xf32>
    %12 = arith.mulf %11, %10 : vector<128x32xf32>
    %13 = arith.addf %9, %12 : vector<128x32xf32>
    %14 = vector.extract_strided_slice %7 {offsets = [0, 32], sizes = [128, 32], strides = [1, 1]} : vector<128x128xf32> to vector<128x32xf32>
    %15 = vector.broadcast %3 : vector<128x1xf32> to vector<128x32xf32>
    %16 = arith.mulf %15, %14 : vector<128x32xf32>
    %17 = arith.addf %13, %16 : vector<128x32xf32>
    %18 = vector.extract_strided_slice %7 {offsets = [0, 64], sizes = [128, 32], strides = [1, 1]} : vector<128x128xf32> to vector<128x32xf32>
    %19 = vector.broadcast %4 : vector<128x1xf32> to vector<128x32xf32>
    %20 = arith.mulf %19, %18 : vector<128x32xf32>
    %21 = arith.addf %17, %20 : vector<128x32xf32>
    %22 = vector.extract_strided_slice %7 {offsets = [0, 96], sizes = [128, 32], strides = [1, 1]} : vector<128x128xf32> to vector<128x32xf32>
    %23 = vector.broadcast %5 : vector<128x1xf32> to vector<128x32xf32>
    %24 = arith.mulf %23, %22 : vector<128x32xf32>
    %25 = arith.addf %21, %24 : vector<128x32xf32>
    %cst_8 = arith.constant 0.000000e+00 : f32
    %26 = vector.broadcast %cst_8 : f32 to vector<128x32xf32>
    %27 = arith.maximumf %25, %26 : vector<128x32xf32>
    %c0_9 = arith.constant 0 : index
    %c0_10 = arith.constant 0 : index
    %28 = vector.load %arg6[%c0_9, %c0_10] : memref<32x128xf32, #tpu.memory_space<vmem>>, vector<32x128xf32>
    %cst_11 = arith.constant dense<0.000000e+00> : vector<128x128xf32>
    %29 = tpu.matmul %27, %28, %cst_11 {dimension_numbers = #tpu.dot_dimension_numbers<[1], [0], [0], [1], [0, 0, 1, 1], [], []>} : vector<128x32xf32>, vector<32x128xf32>, vector<128x128xf32> -> vector<128x128xf32>
    %c0_12 = arith.constant 0 : index
    %c0_13 = arith.constant 0 : index
    %30 = vector.load %arg7[%c0_12, %c0_13] : memref<4x32xf32, #tpu.memory_space<vmem>>, vector<4x32xf32>
    %cst_14 = arith.constant dense<0.000000e+00> : vector<128x32xf32>
    %31 = tpu.matmul %0, %30, %cst_14 {dimension_numbers = #tpu.dot_dimension_numbers<[1], [0], [0], [1], [0, 0, 1, 1], [], []>} : vector<128x4xf32>, vector<4x32xf32>, vector<128x32xf32> -> vector<128x32xf32>
    %32 = vector.extract_strided_slice %29 {offsets = [0, 0], sizes = [128, 32], strides = [1, 1]} : vector<128x128xf32> to vector<128x32xf32>
    %33 = vector.broadcast %2 : vector<128x1xf32> to vector<128x32xf32>
    %34 = arith.mulf %33, %32 : vector<128x32xf32>
    %35 = arith.addf %31, %34 : vector<128x32xf32>
    %36 = vector.extract_strided_slice %29 {offsets = [0, 32], sizes = [128, 32], strides = [1, 1]} : vector<128x128xf32> to vector<128x32xf32>
    %37 = vector.broadcast %3 : vector<128x1xf32> to vector<128x32xf32>
    %38 = arith.mulf %37, %36 : vector<128x32xf32>
    %39 = arith.addf %35, %38 : vector<128x32xf32>
    %40 = vector.extract_strided_slice %29 {offsets = [0, 64], sizes = [128, 32], strides = [1, 1]} : vector<128x128xf32> to vector<128x32xf32>
    %41 = vector.broadcast %4 : vector<128x1xf32> to vector<128x32xf32>
    %42 = arith.mulf %41, %40 : vector<128x32xf32>
    %43 = arith.addf %39, %42 : vector<128x32xf32>
    %44 = vector.extract_strided_slice %29 {offsets = [0, 96], sizes = [128, 32], strides = [1, 1]} : vector<128x128xf32> to vector<128x32xf32>
    %45 = vector.broadcast %5 : vector<128x1xf32> to vector<128x32xf32>
    %46 = arith.mulf %45, %44 : vector<128x32xf32>
    %47 = arith.addf %43, %46 : vector<128x32xf32>
    %cst_15 = arith.constant 0.000000e+00 : f32
    %48 = vector.broadcast %cst_15 : f32 to vector<128x32xf32>
    %49 = arith.maximumf %47, %48 : vector<128x32xf32>
    %c0_16 = arith.constant 0 : index
    %c0_17 = arith.constant 0 : index
    %50 = vector.load %arg8[%c0_16, %c0_17] : memref<32x16xf32, #tpu.memory_space<vmem>>, vector<32x16xf32>
    %cst_18 = arith.constant dense<0.000000e+00> : vector<128x16xf32>
    %51 = tpu.matmul %49, %50, %cst_18 {dimension_numbers = #tpu.dot_dimension_numbers<[1], [0], [0], [1], [0, 0, 1, 1], [], []>} : vector<128x32xf32>, vector<32x16xf32>, vector<128x16xf32> -> vector<128x16xf32>
    %c0_19 = arith.constant 0 : index
    %c0_20 = arith.constant 0 : index
    %52 = vector.load %arg9[%c0_19, %c0_20] : memref<4x4xf32, #tpu.memory_space<vmem>>, vector<4x4xf32>
    %cst_21 = arith.constant dense<0.000000e+00> : vector<128x4xf32>
    %53 = tpu.matmul %0, %52, %cst_21 {dimension_numbers = #tpu.dot_dimension_numbers<[1], [0], [0], [1], [0, 0, 1, 1], [], []>} : vector<128x4xf32>, vector<4x4xf32>, vector<128x4xf32> -> vector<128x4xf32>
    %54 = vector.extract_strided_slice %51 {offsets = [0, 0], sizes = [128, 4], strides = [1, 1]} : vector<128x16xf32> to vector<128x4xf32>
    %55 = vector.broadcast %2 : vector<128x1xf32> to vector<128x4xf32>
    %56 = arith.mulf %55, %54 : vector<128x4xf32>
    %57 = arith.addf %53, %56 : vector<128x4xf32>
    %58 = vector.extract_strided_slice %51 {offsets = [0, 4], sizes = [128, 4], strides = [1, 1]} : vector<128x16xf32> to vector<128x4xf32>
    %59 = vector.broadcast %3 : vector<128x1xf32> to vector<128x4xf32>
    %60 = arith.mulf %59, %58 : vector<128x4xf32>
    %61 = arith.addf %57, %60 : vector<128x4xf32>
    %62 = vector.extract_strided_slice %51 {offsets = [0, 8], sizes = [128, 4], strides = [1, 1]} : vector<128x16xf32> to vector<128x4xf32>
    %63 = vector.broadcast %4 : vector<128x1xf32> to vector<128x4xf32>
    %64 = arith.mulf %63, %62 : vector<128x4xf32>
    %65 = arith.addf %61, %64 : vector<128x4xf32>
    %66 = vector.extract_strided_slice %51 {offsets = [0, 12], sizes = [128, 4], strides = [1, 1]} : vector<128x16xf32> to vector<128x4xf32>
    %67 = vector.broadcast %5 : vector<128x1xf32> to vector<128x4xf32>
    %68 = arith.mulf %67, %66 : vector<128x4xf32>
    %69 = arith.addf %65, %68 : vector<128x4xf32>
    %c0_22 = arith.constant 0 : index
    %c0_23 = arith.constant 0 : index
    %70 = vector.load %arg10[%c0_22, %c0_23] : memref<8x128xf32, #tpu.memory_space<vmem>>, vector<8x128xf32>
    %cst_24 = arith.constant dense<0.000000e+00> : vector<128x128xf32>
    %71 = tpu.matmul %1, %70, %cst_24 {dimension_numbers = #tpu.dot_dimension_numbers<[1], [0], [0], [1], [0, 0, 1, 1], [], []>} : vector<128x8xf32>, vector<8x128xf32>, vector<128x128xf32> -> vector<128x128xf32>
    %c0_25 = arith.constant 0 : index
    %c0_26 = arith.constant 0 : index
    %72 = vector.load %arg11[%c0_25, %c0_26] : memref<4x32xf32, #tpu.memory_space<vmem>>, vector<4x32xf32>
    %cst_27 = arith.constant dense<0.000000e+00> : vector<128x32xf32>
    %73 = tpu.matmul %0, %72, %cst_27 {dimension_numbers = #tpu.dot_dimension_numbers<[1], [0], [0], [1], [0, 0, 1, 1], [], []>} : vector<128x4xf32>, vector<4x32xf32>, vector<128x32xf32> -> vector<128x32xf32>
    %74 = vector.extract_strided_slice %71 {offsets = [0, 0], sizes = [128, 32], strides = [1, 1]} : vector<128x128xf32> to vector<128x32xf32>
    %75 = vector.broadcast %2 : vector<128x1xf32> to vector<128x32xf32>
    %76 = arith.mulf %75, %74 : vector<128x32xf32>
    %77 = arith.addf %73, %76 : vector<128x32xf32>
    %78 = vector.extract_strided_slice %71 {offsets = [0, 32], sizes = [128, 32], strides = [1, 1]} : vector<128x128xf32> to vector<128x32xf32>
    %79 = vector.broadcast %3 : vector<128x1xf32> to vector<128x32xf32>
    %80 = arith.mulf %79, %78 : vector<128x32xf32>
    %81 = arith.addf %77, %80 : vector<128x32xf32>
    %82 = vector.extract_strided_slice %71 {offsets = [0, 64], sizes = [128, 32], strides = [1, 1]} : vector<128x128xf32> to vector<128x32xf32>
    %83 = vector.broadcast %4 : vector<128x1xf32> to vector<128x32xf32>
    %84 = arith.mulf %83, %82 : vector<128x32xf32>
    %85 = arith.addf %81, %84 : vector<128x32xf32>
    %86 = vector.extract_strided_slice %71 {offsets = [0, 96], sizes = [128, 32], strides = [1, 1]} : vector<128x128xf32> to vector<128x32xf32>
    %87 = vector.broadcast %5 : vector<128x1xf32> to vector<128x32xf32>
    %88 = arith.mulf %87, %86 : vector<128x32xf32>
    %89 = arith.addf %85, %88 : vector<128x32xf32>
    %cst_28 = arith.constant 0.000000e+00 : f32
    %90 = vector.broadcast %cst_28 : f32 to vector<128x32xf32>
    %91 = arith.maximumf %89, %90 : vector<128x32xf32>
    %c0_29 = arith.constant 0 : index
    %c0_30 = arith.constant 0 : index
    %92 = vector.load %arg12[%c0_29, %c0_30] : memref<32x128xf32, #tpu.memory_space<vmem>>, vector<32x128xf32>
    %cst_31 = arith.constant dense<0.000000e+00> : vector<128x128xf32>
    %93 = tpu.matmul %91, %92, %cst_31 {dimension_numbers = #tpu.dot_dimension_numbers<[1], [0], [0], [1], [0, 0, 1, 1], [], []>} : vector<128x32xf32>, vector<32x128xf32>, vector<128x128xf32> -> vector<128x128xf32>
    %c0_32 = arith.constant 0 : index
    %c0_33 = arith.constant 0 : index
    %94 = vector.load %arg13[%c0_32, %c0_33] : memref<4x32xf32, #tpu.memory_space<vmem>>, vector<4x32xf32>
    %cst_34 = arith.constant dense<0.000000e+00> : vector<128x32xf32>
    %95 = tpu.matmul %0, %94, %cst_34 {dimension_numbers = #tpu.dot_dimension_numbers<[1], [0], [0], [1], [0, 0, 1, 1], [], []>} : vector<128x4xf32>, vector<4x32xf32>, vector<128x32xf32> -> vector<128x32xf32>
    %96 = vector.extract_strided_slice %93 {offsets = [0, 0], sizes = [128, 32], strides = [1, 1]} : vector<128x128xf32> to vector<128x32xf32>
    %97 = vector.broadcast %2 : vector<128x1xf32> to vector<128x32xf32>
    %98 = arith.mulf %97, %96 : vector<128x32xf32>
    %99 = arith.addf %95, %98 : vector<128x32xf32>
    %100 = vector.extract_strided_slice %93 {offsets = [0, 32], sizes = [128, 32], strides = [1, 1]} : vector<128x128xf32> to vector<128x32xf32>
    %101 = vector.broadcast %3 : vector<128x1xf32> to vector<128x32xf32>
    %102 = arith.mulf %101, %100 : vector<128x32xf32>
    %103 = arith.addf %99, %102 : vector<128x32xf32>
    %104 = vector.extract_strided_slice %93 {offsets = [0, 64], sizes = [128, 32], strides = [1, 1]} : vector<128x128xf32> to vector<128x32xf32>
    %105 = vector.broadcast %4 : vector<128x1xf32> to vector<128x32xf32>
    %106 = arith.mulf %105, %104 : vector<128x32xf32>
    %107 = arith.addf %103, %106 : vector<128x32xf32>
    %108 = vector.extract_strided_slice %93 {offsets = [0, 96], sizes = [128, 32], strides = [1, 1]} : vector<128x128xf32> to vector<128x32xf32>
    %109 = vector.broadcast %5 : vector<128x1xf32> to vector<128x32xf32>
    %110 = arith.mulf %109, %108 : vector<128x32xf32>
    %111 = arith.addf %107, %110 : vector<128x32xf32>
    %cst_35 = arith.constant 0.000000e+00 : f32
    %112 = vector.broadcast %cst_35 : f32 to vector<128x32xf32>
    %113 = arith.maximumf %111, %112 : vector<128x32xf32>
    %c0_36 = arith.constant 0 : index
    %c0_37 = arith.constant 0 : index
    %114 = vector.load %arg14[%c0_36, %c0_37] : memref<32x4xf32, #tpu.memory_space<vmem>>, vector<32x4xf32>
    %cst_38 = arith.constant dense<0.000000e+00> : vector<128x4xf32>
    %115 = tpu.matmul %113, %114, %cst_38 {dimension_numbers = #tpu.dot_dimension_numbers<[1], [0], [0], [1], [0, 0, 1, 1], [], []>} : vector<128x32xf32>, vector<32x4xf32>, vector<128x4xf32> -> vector<128x4xf32>
    %c0_39 = arith.constant 0 : index
    %c0_40 = arith.constant 0 : index
    %116 = vector.load %arg15[%c0_39, %c0_40] : memref<4x1xf32, #tpu.memory_space<vmem>>, vector<4x1xf32>
    %cst_41 = arith.constant dense<0.000000e+00> : vector<128x1xf32>
    %117 = tpu.matmul %0, %116, %cst_41 {dimension_numbers = #tpu.dot_dimension_numbers<[1], [0], [0], [1], [0, 0, 1, 1], [], []>} : vector<128x4xf32>, vector<4x1xf32>, vector<128x1xf32> -> vector<128x1xf32>
    %118 = vector.extract_strided_slice %115 {offsets = [0, 0], sizes = [128, 1], strides = [1, 1]} : vector<128x4xf32> to vector<128x1xf32>
    %119 = arith.mulf %2, %118 : vector<128x1xf32>
    %120 = arith.addf %117, %119 : vector<128x1xf32>
    %121 = vector.extract_strided_slice %115 {offsets = [0, 1], sizes = [128, 1], strides = [1, 1]} : vector<128x4xf32> to vector<128x1xf32>
    %122 = arith.mulf %3, %121 : vector<128x1xf32>
    %123 = arith.addf %120, %122 : vector<128x1xf32>
    %124 = vector.extract_strided_slice %115 {offsets = [0, 2], sizes = [128, 1], strides = [1, 1]} : vector<128x4xf32> to vector<128x1xf32>
    %125 = arith.mulf %4, %124 : vector<128x1xf32>
    %126 = arith.addf %123, %125 : vector<128x1xf32>
    %127 = vector.extract_strided_slice %115 {offsets = [0, 3], sizes = [128, 1], strides = [1, 1]} : vector<128x4xf32> to vector<128x1xf32>
    %128 = arith.mulf %5, %127 : vector<128x1xf32>
    %129 = arith.addf %126, %128 : vector<128x1xf32>
    %cst_42 = arith.constant dense<0xFF800000> : vector<128xf32>
    %130 = vector.multi_reduction <maximumf>, %69, %cst_42 [1] : vector<128x4xf32> to vector<128xf32>
    %131 = vector.shape_cast %130 : vector<128xf32> to vector<128x1xf32>
    %132 = vector.broadcast %131 : vector<128x1xf32> to vector<128x4xf32>
    %133 = arith.subf %69, %132 : vector<128x4xf32>
    %134 = math.exp %133 : vector<128x4xf32>
    %cst_43 = arith.constant dense<0.000000e+00> : vector<128xf32>
    %135 = vector.multi_reduction <add>, %134, %cst_43 [1] : vector<128x4xf32> to vector<128xf32>
    %136 = vector.shape_cast %135 : vector<128xf32> to vector<128x1xf32>
    %137 = math.log %136 : vector<128x1xf32>
    %138 = vector.broadcast %137 : vector<128x1xf32> to vector<128x4xf32>
    %139 = arith.subf %133, %138 : vector<128x4xf32>
    %140 = math.exp %139 : vector<128x4xf32>
    %c0_44 = arith.constant 0 : index
    %c0_45 = arith.constant 0 : index
    %141 = vector.load %arg3[%c0_44, %c0_45] : memref<128x1xi32, #tpu.memory_space<vmem>>, vector<128x1xi32>
    %142 = tpu.iota {dimensions = array<i32: 1>} : vector<128x4xi32>
    %143 = vector.broadcast %141 : vector<128x1xi32> to vector<128x4xi32>
    %144 = arith.cmpi eq, %142, %143 : vector<128x4xi32>
    %cst_46 = arith.constant 0.000000e+00 : f32
    %145 = vector.broadcast %cst_46 : f32 to vector<128x4xf32>
    %146 = arith.select %144, %139, %145 : vector<128x4xi1>, vector<128x4xf32>
    %cst_47 = arith.constant dense<0.000000e+00> : vector<128xf32>
    %147 = vector.multi_reduction <add>, %146, %cst_47 [1] : vector<128x4xf32> to vector<128xf32>
    %148 = vector.shape_cast %147 : vector<128xf32> to vector<128x1xf32>
    %149 = arith.mulf %140, %139 : vector<128x4xf32>
    %cst_48 = arith.constant dense<0.000000e+00> : vector<128xf32>
    %150 = vector.multi_reduction <add>, %149, %cst_48 [1] : vector<128x4xf32> to vector<128xf32>
    %151 = vector.shape_cast %150 : vector<128xf32> to vector<128x1xf32>
    %cst_49 = arith.constant 0.000000e+00 : f32
    %152 = vector.broadcast %cst_49 : f32 to vector<128x1xf32>
    %153 = arith.subf %152, %151 : vector<128x1xf32>
    %cst_50 = arith.constant 0.000000e+00 : f32
    %154 = vector.broadcast %cst_50 : f32 to vector<128x128xf32>
    %c0_51 = arith.constant 0 : index
    %c0_52 = arith.constant 0 : index
    %155 = vector.load %arg16[%c0_51, %c0_52] : memref<128x128xf32, #tpu.memory_space<vmem>>, vector<128x128xf32>
    tpu.vector_store %arg16[%c0_51, %c0_52], %154 {strides = array<i32>} : memref<128x128xf32, #tpu.memory_space<vmem>>, vector<128x128xf32>,
    %c0_53 = arith.constant 0 : index
    %c0_54 = arith.constant 0 : index
    %156 = vector.load %arg16[%c0_53, %c0_54] : memref<128x128xf32, #tpu.memory_space<vmem>>, vector<128x4xf32>
    tpu.vector_store %arg16[%c0_53, %c0_54], %69 {strides = array<i32>} : memref<128x128xf32, #tpu.memory_space<vmem>>, vector<128x4xf32>,
    %c0_55 = arith.constant 0 : index
    %c4 = arith.constant 4 : index
    %157 = vector.load %arg16[%c0_55, %c4] : memref<128x128xf32, #tpu.memory_space<vmem>>, vector<128x1xf32>
    tpu.vector_store %arg16[%c0_55, %c4], %129 {strides = array<i32>} : memref<128x128xf32, #tpu.memory_space<vmem>>, vector<128x1xf32>,
    %c0_56 = arith.constant 0 : index
    %c5 = arith.constant 5 : index
    %158 = vector.load %arg16[%c0_56, %c5] : memref<128x128xf32, #tpu.memory_space<vmem>>, vector<128x1xf32>
    tpu.vector_store %arg16[%c0_56, %c5], %148 {strides = array<i32>} : memref<128x128xf32, #tpu.memory_space<vmem>>, vector<128x1xf32>,
    %c0_57 = arith.constant 0 : index
    %c6 = arith.constant 6 : index
    %159 = vector.load %arg16[%c0_57, %c6] : memref<128x128xf32, #tpu.memory_space<vmem>>, vector<128x1xf32>
    tpu.vector_store %arg16[%c0_57, %c6], %153 {strides = array<i32>} : memref<128x128xf32, #tpu.memory_space<vmem>>, vector<128x1xf32>,
    return
  }
  func.func @transform_0(%arg0: i32) -> (i32, i32) {
    %c0_i32 = arith.constant 0 : i32
    %c0_i32_0 = arith.constant 0 : i32
    return %arg0, %c0_i32 : i32, i32
  }
  func.func @transform_1(%arg0: i32) -> (i32, i32) {
    %c0_i32 = arith.constant 0 : i32
    %c0_i32_0 = arith.constant 0 : i32
    return %arg0, %c0_i32 : i32, i32
  }
  func.func @transform_2(%arg0: i32) -> (i32, i32) {
    %c0_i32 = arith.constant 0 : i32
    %c0_i32_0 = arith.constant 0 : i32
    return %arg0, %c0_i32 : i32, i32
  }
  func.func @transform_3(%arg0: i32) -> (i32, i32) {
    %c0_i32 = arith.constant 0 : i32
    %c0_i32_0 = arith.constant 0 : i32
    %c0_i32_1 = arith.constant 0 : i32
    return %c0_i32, %c0_i32_0 : i32, i32
  }
  func.func @transform_4(%arg0: i32) -> (i32, i32) {
    %c0_i32 = arith.constant 0 : i32
    %c0_i32_0 = arith.constant 0 : i32
    %c0_i32_1 = arith.constant 0 : i32
    return %c0_i32, %c0_i32_0 : i32, i32
  }
  func.func @transform_5(%arg0: i32) -> (i32, i32) {
    %c0_i32 = arith.constant 0 : i32
    %c0_i32_0 = arith.constant 0 : i32
    %c0_i32_1 = arith.constant 0 : i32
    return %c0_i32, %c0_i32_0 : i32, i32
  }
  func.func @transform_6(%arg0: i32) -> (i32, i32) {
    %c0_i32 = arith.constant 0 : i32
    %c0_i32_0 = arith.constant 0 : i32
    %c0_i32_1 = arith.constant 0 : i32
    return %c0_i32, %c0_i32_0 : i32, i32
  }
  func.func @transform_7(%arg0: i32) -> (i32, i32) {
    %c0_i32 = arith.constant 0 : i32
    %c0_i32_0 = arith.constant 0 : i32
    %c0_i32_1 = arith.constant 0 : i32
    return %c0_i32, %c0_i32_0 : i32, i32
  }
  func.func @transform_8(%arg0: i32) -> (i32, i32) {
    %c0_i32 = arith.constant 0 : i32
    %c0_i32_0 = arith.constant 0 : i32
    %c0_i32_1 = arith.constant 0 : i32
    return %c0_i32, %c0_i32_0 : i32, i32
  }
  func.func @transform_9(%arg0: i32) -> (i32, i32) {
    %c0_i32 = arith.constant 0 : i32
    %c0_i32_0 = arith.constant 0 : i32
    %c0_i32_1 = arith.constant 0 : i32
    return %c0_i32, %c0_i32_0 : i32, i32
  }
  func.func @transform_10(%arg0: i32) -> (i32, i32) {
    %c0_i32 = arith.constant 0 : i32
    %c0_i32_0 = arith.constant 0 : i32
    %c0_i32_1 = arith.constant 0 : i32
    return %c0_i32, %c0_i32_0 : i32, i32
  }
  func.func @transform_11(%arg0: i32) -> (i32, i32) {
    %c0_i32 = arith.constant 0 : i32
    %c0_i32_0 = arith.constant 0 : i32
    %c0_i32_1 = arith.constant 0 : i32
    return %c0_i32, %c0_i32_0 : i32, i32
  }
  func.func @transform_12(%arg0: i32) -> (i32, i32) {
    %c0_i32 = arith.constant 0 : i32
    %c0_i32_0 = arith.constant 0 : i32
    %c0_i32_1 = arith.constant 0 : i32
    return %c0_i32, %c0_i32_0 : i32, i32
  }
  func.func @transform_13(%arg0: i32) -> (i32, i32) {
    %c0_i32 = arith.constant 0 : i32
    %c0_i32_0 = arith.constant 0 : i32
    %c0_i32_1 = arith.constant 0 : i32
    return %c0_i32, %c0_i32_0 : i32, i32
  }
  func.func @transform_14(%arg0: i32) -> (i32, i32) {
    %c0_i32 = arith.constant 0 : i32
    %c0_i32_0 = arith.constant 0 : i32
    %c0_i32_1 = arith.constant 0 : i32
    return %c0_i32, %c0_i32_0 : i32, i32
  }
  func.func @transform_15(%arg0: i32) -> (i32, i32) {
    %c0_i32 = arith.constant 0 : i32
    %c0_i32_0 = arith.constant 0 : i32
    return %arg0, %c0_i32 : i32, i32
  }
}

</mosaic_0001>

<bundles_post_ra>
// kernel: tpu_custom_call.1
= control target key start
LH: loop header
LB: loop body
LE: loop exit
PB: predicated region body
PF: predicated region fallthrough
CT: control target
= control target key end

     0   :  { %s9667_s0 = inlined_call_operand.vmem [shape: f32[256,4], index: 0, kind: input, shape index: {}]   ;;  %s9668_s1 = inlined_call_operand.vmem [shape: f32[256,8], index: 1, kind: input, shape index: {}]   ;;  %s9669_s2 = inlined_call_operand.vmem [shape: s32[256,1], index: 2, kind: input, shape index: {}]   ;;  %s9670_s3 = inlined_call_operand.vmem [shape: f32[8,128], index: 3, kind: input, shape index: {}]   ;;  %s9671_s4 = inlined_call_operand.vmem [shape: f32[4,32], index: 4, kind: input, shape index: {}]   ;;  %s9672_s5 = inlined_call_operand.vmem [shape: f32[32,128], index: 5, kind: input, shape index: {}]   ;;  %s9673_s6 = inlined_call_operand.vmem [shape: f32[4,32], index: 6, kind: input, shape index: {}]   ;;  %s9674_s7 = inlined_call_operand.vmem [shape: f32[32,16], index: 7, kind: input, shape index: {}]   ;;  %s9675_s8 = inlined_call_operand.vmem [shape: f32[4,4], index: 8, kind: input, shape index: {}]   ;;  %s9676_s9 = inlined_call_operand.vmem [shape: f32[8,128], index: 9, kind: input, shape index: {}]   ;;  %s9677_s10 = inlined_call_operand.vmem [shape: f32[4,32], index: 10, kind: input, shape index: {}]   ;;  %s9678_s11 = inlined_call_operand.vmem [shape: f32[32,128], index: 11, kind: input, shape index: {}]   ;;  %s9679_s12 = inlined_call_operand.vmem [shape: f32[4,32], index: 12, kind: input, shape index: {}]   ;;  %s9680_s13 = inlined_call_operand.vmem [shape: f32[32,4], index: 13, kind: input, shape index: {}]   ;;  %s9681_s14 = inlined_call_operand.vmem [shape: f32[4,1], index: 14, kind: input, shape index: {}]   ;;  %s9682_s15 = inlined_call_operand.hbm [shape: f32[256,128], index: 15, kind: output, shape index: {}]  }
   0x1   :  { %9885 = sst [smem:[#allocation117_spill]] %s9667_s0 }
   0x2   :  { %9886 = sst [smem:[#allocation118_spill]] %s9668_s1 }
   0x3   :  { %9887 = sst [smem:[#allocation119_spill]] %s9670_s3 }
   0x4   :  { %9888 = sst [smem:[#allocation120_spill]] %s9671_s4 }
   0x5   :  { %9889 = sst [smem:[#allocation121_spill]] %s9672_s5 }
   0x6   :  { %20 = vsyncpa [#allocation3], 0 }
   0x7   :  { %22 = vsyncpa [#allocation3 + $0x1], 0  ;;  %s6610_s18 = smov 0   ;;  %s6612_s19 = smov 0  }
   0x8   :  { %s6614_s20 = smov 0   ;;  %s6616_s21 = smov 0  }
   0x9 LB: > { %s6631_s22 = sadd.s32 4294967295, %s6510_s21   ;;  %s5407_s23 = sadd.s32 4294967294, %s6510_s21   ;;  %s6510_s21 = sphi %s6616_s21, %s10275_s21   ;;  %s6506_s20 = sphi %s6614_s20, %s10274_s20   ;;  %s6502_s19 = sphi %s6612_s19, %s10273_s19   ;;  %s6498_s18 = sphi %s6610_s18, %s10272_s18  }
   0xa   : > { %s6635_s24 = sadd.s32 1, %s6510_s21   ;;  %s365_s25 = sadd.s32 1, %s6506_s20 }
   0xb   : > { %s362_s26 = ssub.s32 %s6510_s21, %s6635_s24  ;;  %p375_p0 = scmp.ne.s32.totalorder %s6506_s20, %s6502_s19 }
   0xc   : > { %p363_p1 = scmp.eq.s32.totalorder %s362_s26, 0  ;;  %p376_p2 = scmp.eq.s32.totalorder %s6631_s22, 1 }
   0xd   : > { %p381_p3 = scmp.ne.s32.totalorder %s6502_s19, %s6498_s18  ;;  %p382_p4 = scmp.eq.s32.totalorder %s5407_s23, 1 }
   0xe   : > { %s6646_s27 = scalar_select %p363_p1, %s6506_s20, %s365_s25  }
   0xf   : > { %p6648_p5 = por %p376_p2, %p375_p0  ;;  %p6652_p6 = por %p382_p4, %p381_p3 }
  0x10   : > { %p5410_p7 = scmp.ge.s32.totalorder %s6510_s21, 1  ;;  %p463_p8 = scmp.lt.s32.totalorder %s6510_s21, 3 }
  0x12   : > { %p464_p9 = pnand %p5410_p7, %p463_p8 }
  0x14   : > { %467 = sbr.rel (%p464_p9) target bundleno = 2187 (0x88b), region = 80 }
  0x1b   : > { %s9892_s3 = sld [smem:[#allocation119_spill]]  ;;  %s5412_s17 = sshll.u32 %s6631_s22, 4  ;;  %vm897_vm0 = vcmask 1043456   ;;  %v6512_v1 = vmov 2   ;;  %v6513_v3 = vmov 1   ;;  %vm573_vm1 = vcmask 64512  }
  0x1c   : > { %6263 = vset.pattern.permute.xlu1 %v6512_v1  ;;  %p522_p10 = scmp.lt.s32.totalorder %s5412_s17, 31  ;;  %s9893_s4 = sld [smem:[#allocation120_spill]]  ;;  %6262 = vset.pattern.permute.xlu0 %v6513_v3  ;;  %vm864_vm2 = vcmask 31744   ;;  %v6514_v16 = vmov 3   ;;  %v6515_v37 = vmov 0   ;;  %vm1546_vm3 = vcmask 261120  }
  0x1d   : > { %s9894_s0 = sld [smem:[#allocation117_spill]]  ;;  %s9895_s1 = sld [smem:[#allocation118_spill]] }
  0x1e   : > { %s10277_s17 = smov (!%p522_p10, %s5412_s17), 31  ;;  %s9922_s5 = sld [smem:[#allocation121_spill]] }
  0x1f   : > { %s6669_s26 = sshll.u32 %s10277_s17, 3  ;;  %s9751_s23 = smov 64  }
  0x20   : > { %s9753_s25 = smov 96   ;;  %s9749_s17 = smov 32  }
  0x21   : > { %v572_v0 = vld [vmem:[%s9892_s3] sm:$0xff]  ;;  %s9820_s16 = smov 120   ;;  %s10140_s30 = smov 120  }
  0x22   : > { %5838 = vmatprep.subr.mxu0 %v572_v0  ;;  %v767_v2 = vld [vmem:[%s9893_s4] sm:$0xf] }
  0x23   : > { %5839 = vmatpush3.msra.mxu0 %v572_v0  ;;  %5864 = vmatprep.subr.msk.mxu1 %vm897_vm0, %v767_v2  ;;  %s6675_s3 = scalar_lea.vmem %s9894_s0, %s6669_s26  ;;  %s6681_s4 = scalar_lea.vmem %s9895_s1, %s6669_s26 }
  0x24   : > { %5865 = vmatpush3.msk.msra.mxu1 %vm897_vm0, %v767_v2  ;;  %v556_v4 = vld [vmem:[%s6681_s4] sm:$0xff]  ;;  %v557_v6 = vld [vmem:[%s6681_s4 + $0x8] sm:$0xff]  ;;  %v558_v7 = vld [vmem:[%s6681_s4 + $0x10] sm:$0xff]  ;;  %s9978_s0 = smov 64   ;;  %s9884_s1 = sand.u32 1, %s6502_s19  }
  0x25   : > { %v6685_v5 = vld [vmem:[%s6675_s3] sm:$0xff]  ;;  %5840 = vmatprep.mubr.msk.f32.mxu0 %vm573_vm1, %v556_v4  ;;  %v6693_v8 = vld [vmem:[%s6675_s3 + $0x8] sm:$0xff]  ;;  %v559_v9 = vld [vmem:[%s6681_s4 + $0x18] sm:$0xff] }
  0x26   : > { %1207 = vperm.xlu1 %6263, %v6685_v5   ;;  %5841 = vmatmul.mubr.msk.f32.vlgmr.msra.gmra.mrb[0].mxu0 %vm573_vm1, %v557_v6  ;;  %v6702_v10 = vld [vmem:[%s6675_s3 + $0x10] sm:$0xff]  ;;  %v560_v11 = vld [vmem:[%s6681_s4 + $0x20] sm:$0xff]  ;;  %v6708_v12 = vld [vmem:[%s6675_s3 + $0x18] sm:$0xff] }
  0x27   : > { %5866 = vmatprep.mubr.msk.f32.mxu1 %vm864_vm2, %v6685_v5  ;;  %5843 = vmatprep.mubr.msk.f32.mxu0 %vm573_vm1, %v558_v7  ;;  %v561_v13 = vld [vmem:[%s6681_s4 + $0x28] sm:$0xff]  ;;  %v6718_v14 = vld [vmem:[%s6675_s3 + $0x20] sm:$0xff]  ;;  %v562_v15 = vld [vmem:[%s6681_s4 + $0x30] sm:$0xff] }
  0x28   : > { %5867 = vmatmul.mubr.msk.f32.vlgmr.msra.gmra.mrb[0].mxu1 %vm864_vm2, %v6693_v8  ;;  %1047 = vperm.xlu0 %6262, %v6685_v5   ;;  %v6726_v17 = vld [vmem:[%s6675_s3 + $0x30] sm:$0xff]  ;;  %v6731_v18 = vld [vmem:[%s6675_s3 + $0x28] sm:$0xff]  ;;  %v563_v19 = vld [vmem:[%s6681_s4 + $0x38] sm:$0xff] }
  0x29   : > { %5869 = vmatprep.mubr.msk.f32.mxu1 %vm864_vm2, %v6702_v10  ;;  %v564_v20 = vld [vmem:[%s6681_s4 + $0x40] sm:$0xff]  ;;  %v6742_v21 = vld [vmem:[%s6675_s3 + $0x38] sm:$0xff]  ;;  %v565_v23 = vld [vmem:[%s6681_s4 + $0x48] sm:$0xff] }
  0x2a   : > { %1211 = vperm.xlu1 %6263, %v6693_v8   ;;  %5844 = vmatmul.mubr.msk.f32.gmra.mrb[2].mxu0 %vm573_vm1, %v559_v9  ;;  %v6745_v22 = vld [vmem:[%s6675_s3 + $0x40] sm:$0xff]  ;;  %v566_v24 = vld [vmem:[%s6681_s4 + $0x50] sm:$0xff]  ;;  %v6758_v25 = vld [vmem:[%s6675_s3 + $0x48] sm:$0xff] }
  0x2b   : > { %5846 = vmatprep.mubr.msk.f32.mxu0 %vm573_vm1, %v560_v11  ;;  %v567_v26 = vld [vmem:[%s6681_s4 + $0x58] sm:$0xff]  ;;  %v568_v27 = vld [vmem:[%s6681_s4 + $0x60] sm:$0xff]  ;;  %v6770_v28 = vld [vmem:[%s6675_s3 + $0x50] sm:$0xff] }
  0x2c   : > { %5870 = vmatmul.mubr.msk.f32.gmra.mrb[2].mxu1 %vm864_vm2, %v6708_v12  ;;  %1051 = vperm.xlu0 %6262, %v6693_v8   ;;  %v6776_v29 = vld [vmem:[%s6675_s3 + $0x58] sm:$0xff]  ;;  %v569_v30 = vld [vmem:[%s6681_s4 + $0x68] sm:$0xff]  ;;  %v570_v31 = vld [vmem:[%s6681_s4 + $0x70] sm:$0xff] }
  0x2d   : > { %5872 = vmatprep.mubr.msk.f32.mxu1 %vm864_vm2, %v6718_v14  ;;  %v6785_v32 = vld [vmem:[%s6675_s3 + $0x60] sm:$0xff]  ;;  %v6793_v33 = vld [vmem:[%s6675_s3 + $0x68] sm:$0xff]  ;;  %v571_v34 = vld [vmem:[%s6681_s4 + $0x78] sm:$0xff] }
  0x2e   : > { %6264 = vset.pattern.permute.xlu1 %v6514_v16  ;;  %5847 = vmatmul.mubr.msk.f32.gmra.mrb[4].mxu0 %vm573_vm1, %v561_v13  ;;  %v6800_v35 = vld [vmem:[%s6675_s3 + $0x70] sm:$0xff]  ;;  %v6808_v36 = vld [vmem:[%s6675_s3 + $0x78] sm:$0xff]  ;;  %v1542_v0 = vld [vmem:[%s9922_s5] sm:$0xff] }
  0x2f   : > { %1367 = vperm.xlu1 %6264, %v6685_v5   ;;  %5849 = vmatprep.mubr.msk.f32.mxu0 %vm573_vm1, %v562_v15 }
  0x30   : > { %5873 = vmatmul.mubr.msk.f32.gmra.mrb[4].mxu1 %vm864_vm2, %v6731_v18  ;;  %1055 = vperm.xlu0 %6262, %v6702_v10  }
  0x31   : > { %5875 = vmatprep.mubr.msk.f32.mxu1 %vm864_vm2, %v6726_v17 }
  0x32   : > { %5850 = vmatmul.mubr.msk.f32.gmra.mrb[6].mxu0 %vm573_vm1, %v563_v19 }
  0x33   : > { %1371 = vperm.xlu1 %6264, %v6693_v8   ;;  %5852 = vmatprep.mubr.msk.f32.mxu0 %vm573_vm1, %v564_v20 }
  0x34   : > { %5876 = vmatmul.mubr.msk.f32.gmra.mrb[6].mxu1 %vm864_vm2, %v6742_v21  ;;  %1059 = vperm.xlu0 %6262, %v6708_v12  }
  0x35   : > { %5878 = vmatprep.mubr.msk.f32.mxu1 %vm864_vm2, %v6745_v22 }
  0x36   : > { %5853 = vmatmul.mubr.msk.f32.gmra.mrb[8].mxu0 %vm573_vm1, %v565_v23  ;;  %v1544_v23 = vld [vmem:[%s9922_s5 + $0x10] sm:$0xff] }
  0x37   : > { %6266 = vset.pattern.permute.xlu1 %v6512_v1  ;;  %5855 = vmatprep.mubr.msk.f32.mxu0 %vm573_vm1, %v566_v24  ;;  %v1545_v24 = vld [vmem:[%s9922_s5 + $0x18] sm:$0xff] }
  0x38   : > { %1219 = vperm.xlu1 %6266, %v6708_v12   ;;  %6265 = vset.pattern.permute.xlu0 %v6512_v1 }
  0x39   : > { %5879 = vmatmul.mubr.msk.f32.gmra.mrb[8].mxu1 %vm864_vm2, %v6758_v25  ;;  %1215 = vperm.xlu0 %6265, %v6702_v10  }
  0x3a   : > { %5881 = vmatprep.mubr.msk.f32.mxu1 %vm864_vm2, %v6770_v28  ;;  %5856 = vmatmul.mubr.msk.f32.gmra.mrb[10].mxu0 %vm573_vm1, %v567_v26  ;;  %v6178_v26 = vpack.c.bf16 %v1545_v24, %v1544_v23 }
  0x3b   : > { %5858 = vmatprep.mubr.msk.f32.mxu0 %vm573_vm1, %v568_v27 }
  0x3c   : > { %6267 = vset.pattern.permute.xlu1 %v6513_v3 }
  0x3d   : > { %1063 = vperm.xlu1 %6267, %v6718_v14   ;;  %5882 = vmatmul.mubr.msk.f32.gmra.mrb[10].mxu1 %vm864_vm2, %v6776_v29 }
  0x3e   : > { %1223 = vperm.xlu0 %6265, %v6718_v14   ;;  %5884 = vmatprep.mubr.msk.f32.mxu1 %vm864_vm2, %v6785_v32 }
  0x3f   : > { %5859 = vmatmul.mubr.msk.f32.gmra.mrb[12].mxu0 %vm573_vm1, %v569_v30 }
  0x40   : > { %5861 = vmatprep.mubr.msk.f32.mxu0 %vm573_vm1, %v570_v31 }
  0x41   : > { %1067 = vperm.xlu1 %6267, %v6731_v18   ;;  %5885 = vmatmul.mubr.msk.f32.gmra.mrb[12].mxu1 %vm864_vm2, %v6793_v33 }
  0x42   : > { %1231 = vperm.xlu0 %6265, %v6726_v17   ;;  %5887 = vmatprep.mubr.msk.f32.mxu1 %vm864_vm2, %v6800_v35 }
  0x43   : > { %5862 = vmatmul.mubr.msk.f32.gmra.mrb[14].mxu0 %vm573_vm1, %v571_v34 }
  0x45   : > { %6268 = vset.pattern.permute.xlu1 %v6514_v16  ;;  %5888 = vmatmul.mubr.msk.f32.gmra.mrb[14].mxu1 %vm864_vm2, %v6808_v36 }
  0x46   : > { %1379 = vperm.xlu1 %6268, %v6708_v12   ;;  %1239 = vperm.xlu0 %6265, %v6745_v22  }
  0x47   : > { %5924 = vmatprep.mubr.msk.f32.mxu1 %vm864_vm2, %v6685_v5 }
  0x4a   : > { %6269 = vset.pattern.permute.xlu1 %v6512_v1  ;;  %1247 = vperm.xlu0 %6265, %v6770_v28  }
  0x4b   : > { %1227 = vperm.xlu1 %6269, %v6731_v18  }
  0x4e   : > { %1255 = vperm.xlu0 %6265, %v6785_v32  }
  0x4f   : > { %6270 = vset.pattern.permute.xlu1 %v6513_v3 }
  0x50   : > { %1071 = vperm.xlu1 %6270, %v6726_v17  }
  0x52   : > { %1263 = vperm.xlu0 %6265, %v6800_v35  }
  0x54   : > { %1075 = vperm.xlu1 %6270, %v6742_v21  }
  0x56   : > { %6284 = vset.pattern.permute.xlu0 %v6514_v16 }
  0x57   : > { %1375 = vperm.xlu0 %6284, %v6702_v10  }
  0x58   : > { %6271 = vset.pattern.permute.xlu1 %v6514_v16 }
  0x59   : > { %1387 = vperm.xlu1 %6271, %v6731_v18  }
  0x5b   : > { %1383 = vperm.xlu0 %6284, %v6718_v14  }
  0x5d   : > { %6272 = vset.pattern.permute.xlu1 %v6512_v1 }
  0x5e   : > { %1235 = vperm.xlu1 %6272, %v6742_v21  }
  0x5f   : > { %1391 = vperm.xlu0 %6284, %v6726_v17  }
  0x62   : > { %6273 = vset.pattern.permute.xlu1 %v6513_v3 }
  0x63   : > { %1079 = vperm.xlu1 %6273, %v6745_v22   ;;  %1399 = vperm.xlu0 %6284, %v6745_v22  }
  0x67   : > { %1083 = vperm.xlu1 %6273, %v6758_v25   ;;  %1407 = vperm.xlu0 %6284, %v6770_v28  }
  0x6b   : > { %6274 = vset.pattern.permute.xlu1 %v6514_v16  ;;  %1415 = vperm.xlu0 %6284, %v6785_v32  }
  0x6c   : > { %1395 = vperm.xlu1 %6274, %v6742_v21  }
  0x6f   : > { %1427 = vperm.xlu0 %6284, %v6808_v36  }
  0x70   : > { %6275 = vset.pattern.permute.xlu1 %v6512_v1 }
  0x71   : > { %1243 = vperm.xlu1 %6275, %v6758_v25  }
  0x73   : > { %6288 = vset.pattern.permute.xlu0 %v6515_v37 }
  0x74   : > { %780 = vperm.xlu0 %6288, %v6702_v10  }
  0x75   : > { %6276 = vset.pattern.permute.xlu1 %v6513_v3 }
  0x76   : > { %1087 = vperm.xlu1 %6276, %v6770_v28  }
  0x78   : > { %795 = vperm.xlu0 %6288, %v6731_v18  }
  0x7a   : > { %1091 = vperm.xlu1 %6276, %v6776_v29  }
  0x7c   : > { %800 = vperm.xlu0 %6288, %v6726_v17  }
  0x7e   : > { %6277 = vset.pattern.permute.xlu1 %v6514_v16 }
  0x7f   : > { %1403 = vperm.xlu1 %6277, %v6758_v25  }
  0x80   : > { %805 = vperm.xlu0 %6288, %v6742_v21  }
  0x83   : > { %6278 = vset.pattern.permute.xlu1 %v6512_v1 }
  0x84   : > { %1251 = vperm.xlu1 %6278, %v6776_v29   ;;  %815 = vperm.xlu0 %6288, %v6758_v25  }
  0x88   : > { %6279 = vset.pattern.permute.xlu1 %v6513_v3  ;;  %825 = vperm.xlu0 %6288, %v6776_v29  }
  0x89   : > { %1095 = vperm.xlu1 %6279, %v6785_v32  }
  0x8c   : > { %835 = vperm.xlu0 %6288, %v6793_v33  }
  0x8d   : > { %1099 = vperm.xlu1 %6279, %v6793_v33  }
  0x90   : > { %845 = vperm.xlu0 %6288, %v6808_v36  }
  0x91   : > { %6280 = vset.pattern.permute.xlu1 %v6514_v16 }
  0x92   : > { %1411 = vperm.xlu1 %6280, %v6776_v29  }
  0x96   : > { %6281 = vset.pattern.permute.xlu1 %v6512_v1 }
  0x97   : > { %1259 = vperm.xlu1 %6281, %v6793_v33  }
  0x9b   : > { %6282 = vset.pattern.permute.xlu1 %v6513_v3 }
  0x9c   : > { %1103 = vperm.xlu1 %6282, %v6800_v35  }
  0xa0   : > { %1107 = vperm.xlu1 %6282, %v6808_v36  }
  0xa4   : > { %6283 = vset.pattern.permute.xlu1 %v6514_v16 }
  0xa5   : > { %1419 = vperm.xlu1 %6283, %v6793_v33   ;;  %v6872_v38 = vpop.permute.xlu1 %1207 }
  0xa6   : > { %9896 = vst [vmem:[#allocation5_spill] sm:$0xff] %v6872_v38 }
  0xa7   : > { %v6874_v39 = vpop.permute.xlu0 %1047 }
  0xa8   : > { %9897 = vst [vmem:[#allocation6_spill] sm:$0xff] %v6874_v39 }
  0xa9   : > { %6285 = vset.pattern.permute.xlu1 %v6512_v1  ;;  %v6877_v40 = vpop.permute.xlu1 %1211  ;;  %v1543_v1 = vld [vmem:[%s9922_s5 + $0x8] sm:$0xff] }
  0xaa   : > { %9898 = vst [vmem:[#allocation7_spill] sm:$0xff] %v6877_v40  ;;  %1267 = vperm.xlu1 %6285, %v6808_v36   ;;  %v6174_v3 = vpack.c.bf16 %v1543_v1, %v1542_v0 }
  0xab   : > { %v6880_v41 = vpop.permute.xlu0 %1051 }
  0xac   : > { %9899 = vst [vmem:[#allocation8_spill] sm:$0xff] %v6880_v41  ;;  %6175 = vmatprep.subr.bf16.mxu0 %v6174_v3 }
  0xad   : > { %6177 = vmatpush3.bf16.msra.mxu0 %v6174_v3 }
  0xae   : > { %6286 = vset.pattern.permute.xlu1 %v6514_v16  ;;  %v6883_v42 = vpop.permute.xlu1 %1367  ;;  %6179 = vmatprep.subr.bf16.mxu0 %v6178_v26 }
  0xaf   : > { %9900 = vst [vmem:[#allocation9_spill] sm:$0xff] %v6883_v42  ;;  %1423 = vperm.xlu1 %6286, %v6800_v35   ;;  %v6886_v43 = vpop.permute.xlu0 %1055 }
  0xb0   : > { %9901 = vst [vmem:[#allocation10_spill] sm:$0xff] %v6886_v43 }
  0xb1   : > { %6181 = vmatpush3.bf16.msra.mxu0 %v6178_v26 }
  0xb2   : > { %v6888_v44 = vpop.permute.xlu1 %1371 }
  0xb3   : > { %9902 = vst [vmem:[#allocation11_spill] sm:$0xff] %v6888_v44  ;;  %6287 = vset.pattern.permute.xlu1 %v6515_v37  ;;  %v6891_v45 = vpop.permute.xlu0 %1059 }
  0xb4   : > { %770 = vperm.xlu1 %6287, %v6685_v5   ;;  %9903 = vst [vmem:[#allocation12_spill] sm:$0xff] %v6891_v45 }
  0xb7   : > { %v6893_v46 = vpop.permute.xlu1 %1219 }
  0xb8   : > { %9904 = vst [vmem:[#allocation13_spill] sm:$0xff] %v6893_v46  ;;  %775 = vperm.xlu1 %6287, %v6693_v8   ;;  %v6896_v47 = vpop.permute.xlu0 %1215 }
  0xb9   : > { %9905 = vst [vmem:[#allocation14_spill] sm:$0xff] %v6896_v47 }
  0xbc   : > { %785 = vperm.xlu1 %6287, %v6708_v12   ;;  %v6899_v48 = vpop.permute.xlu1 %1063 }
  0xbd   : > { %9906 = vst [vmem:[#allocation15_spill] sm:$0xff] %v6899_v48  ;;  %v6901_v49 = vpop.permute.xlu0 %1223 }
  0xbe   : > { %9907 = vst [vmem:[#allocation16_spill] sm:$0xff] %v6901_v49 }
  0xc0   : > { %790 = vperm.xlu1 %6287, %v6718_v14   ;;  %v6904_v50 = vpop.permute.xlu1 %1067 }
  0xc1   : > { %9908 = vst [vmem:[#allocation17_spill] sm:$0xff] %v6904_v50  ;;  %v6906_v51 = vpop.permute.xlu0 %1231 }
  0xc2   : > { %9909 = vst [vmem:[#allocation18_spill] sm:$0xff] %v6906_v51 }
  0xc4   : > { %810 = vperm.xlu1 %6287, %v6745_v22  }
  0xc5   : > { %v6909_v52 = vpop.permute.xlu1 %1379  ;;  %v6911_v53 = vpop.permute.xlu0 %1239 }
  0xc6   : > { %9910 = vst [vmem:[#allocation19_spill] sm:$0xff] %v6909_v52  ;;  %9911 = vst [vmem:[#allocation20_spill] sm:$0xff] %v6911_v53 }
  0xc8   : > { %820 = vperm.xlu1 %6287, %v6770_v28  }
  0xc9   : > { %v6914_v54 = vpop.permute.xlu0 %1247 }
  0xca   : > { %9912 = vst [vmem:[#allocation21_spill] sm:$0xff] %v6914_v54  ;;  %v6916_v55 = vpop.permute.xlu1 %1227 }
  0xcb   : > { %9913 = vst [vmem:[#allocation22_spill] sm:$0xff] %v6916_v55 }
  0xcc   : > { %830 = vperm.xlu1 %6287, %v6785_v32  }
  0xcd   : > { %v6919_v56 = vpop.permute.xlu0 %1255 }
  0xce   : > { %9914 = vst [vmem:[#allocation23_spill] sm:$0xff] %v6919_v56 }
  0xcf   : > { %v6921_v57 = vpop.permute.xlu1 %1071 }
  0xd0   : > { %9915 = vst [vmem:[#allocation24_spill] sm:$0xff] %v6921_v57  ;;  %840 = vperm.xlu1 %6287, %v6800_v35  }
  0xd1   : > { %v6924_v58 = vpop.permute.xlu0 %1263 }
  0xd2   : > { %9916 = vst [vmem:[#allocation25_spill] sm:$0xff] %v6924_v58 }
  0xd3   : > { %v6926_v59 = vpop.permute.xlu1 %1075 }
  0xd4   : > { %9917 = vst [vmem:[#allocation26_spill] sm:$0xff] %v6926_v59 }
  0xd6   : > { %v6928_v60 = vpop.permute.xlu0 %1375 }
  0xd7   : > { %9918 = vst [vmem:[#allocation27_spill] sm:$0xff] %v6928_v60 }
  0xd8   : > { %v6930_v61 = vpop.permute.xlu1 %1387 }
  0xd9   : > { %9919 = vst [vmem:[#allocation28_spill] sm:$0xff] %v6930_v61 }
  0xda   : > { %v6932_v62 = vpop.permute.xlu0 %1383 }
  0xdb   : > { %9920 = vst [vmem:[#allocation29_spill] sm:$0xff] %v6932_v62 }
  0xdd   : > { %v6934_v63 = vpop.permute.xlu1 %1235 }
  0xde   : > { %9921 = vst [vmem:[#allocation30_spill] sm:$0xff] %v6934_v63  ;;  %v6942_v2 = vpop.permute.xlu0 %1391 }
  0xdf   : > { %9923 = vst [vmem:[#allocation31_spill] sm:$0xff] %v6942_v2 }
  0xe2   : > { %v6944_v4 = vpop.permute.xlu1 %1079  ;;  %v6946_v6 = vpop.permute.xlu0 %1399 }
  0xe3   : > { %9924 = vst [vmem:[#allocation32_spill] sm:$0xff] %v6944_v4  ;;  %9925 = vst [vmem:[#allocation33_spill] sm:$0xff] %v6946_v6 }
  0xe6   : > { %v6948_v7 = vpop.permute.xlu1 %1083  ;;  %v6950_v9 = vpop.permute.xlu0 %1407 }
  0xe7   : > { %9926 = vst [vmem:[#allocation34_spill] sm:$0xff] %v6948_v7  ;;  %9927 = vst [vmem:[#allocation35_spill] sm:$0xff] %v6950_v9 }
  0xea   : > { %v6952_v11 = vpop.permute.xlu0 %1415 }
  0xeb   : > { %9928 = vst [vmem:[#allocation36_spill] sm:$0xff] %v6952_v11  ;;  %v6954_v13 = vpop.permute.xlu1 %1395 }
  0xec   : > { %9929 = vst [vmem:[#allocation37_spill] sm:$0xff] %v6954_v13 }
  0xee   : > { %v6956_v15 = vpop.permute.xlu0 %1427 }
  0xef   : > { %9930 = vst [vmem:[#allocation38_spill] sm:$0xff] %v6956_v15 }
  0xf0   : > { %v6958_v16 = vpop.permute.xlu1 %1243 }
  0xf1   : > { %9931 = vst [vmem:[#allocation39_spill] sm:$0xff] %v6958_v16 }
  0xf3   : > { %v6960_v19 = vpop.permute.xlu0 %780 }
  0xf4   : > { %9932 = vst [vmem:[#allocation40_spill] sm:$0xff] %v6960_v19 }
  0xf5   : > { %v6962_v20 = vpop.permute.xlu1 %1087 }
  0xf6   : > { %9933 = vst [vmem:[#allocation41_spill] sm:$0xff] %v6962_v20 }
  0xf7   : > { %v6970_v27 = vpop.permute.xlu0 %795 }
  0xf8   : > { %9934 = vst [vmem:[#allocation42_spill] sm:$0xff] %v6970_v27 }
  0xf9   : > { %v6972_v30 = vpop.permute.xlu1 %1091  ;;  %v6974_v31 = vpop.f32.mrb[0].mxu0 }
  0xfa   : > { %9935 = vst [vmem:[#allocation43_spill] sm:$0xff] %v6972_v30  ;;  %v6976_v34 = vpop.f32.mrb[1].mxu0  ;;  %v1271_v37 = vmul.f32 %v6974_v31, %v6877_v40  ;;  %v1111_v0 = vmul.f32 %v6974_v31, %v6880_v41  ;;  %v1431_v58 = vmul.f32 %v6974_v31, %v6888_v44 }
  0xfb   : > { %v6982_v1 = vpop.f32.mrb[0].mxu1  ;;  %v6986_v23 = vpop.permute.xlu0 %800  ;;  %v1430_v41 = vmul.f32 %v6883_v42, %v6976_v34  ;;  %v1740_v42 = vld [vmem:[%s9673_s6] sm:$0xf] }
  0xfc   : > { %v6984_v3 = vpop.f32.mrb[1].mxu1  ;;  %9936 = vst [vmem:[#allocation44_spill] sm:$0xff] %v6986_v23  ;;  %1304 = vrot.lane.b32.xlu0 %v1271_v37, %s9751_s23  ;;  %1144 = vrot.lane.b32.xlu1 %v1111_v0, %s9753_s25 }
  0xfd   : > { %v6990_v24 = vpop.f32.mrb[2].mxu0  ;;  %5922 = vmatprep.subr.msk.mxu1 %vm897_vm0, %v1740_v42 }
  0xfe   : > { %v6992_v26 = vpop.permute.xlu1 %1403  ;;  %v6994_v40 = vpop.f32.mrb[3].mxu0  ;;  %5923 = vmatpush3.msk.msra.mxu1 %vm897_vm0, %v1740_v42  ;;  %v1270_v42 = vmul.f32 %v6872_v38, %v6976_v34 }
  0xff   : > { %9937 = vst [vmem:[#allocation45_spill] sm:$0xff] %v6992_v26  ;;  %v7000_v15 = vpop.f32.mrb[2].mxu1  ;;  %v850_v37 = vmul.f32 %v6960_v19, %v6994_v40  ;;  %v7010_v9 = vpop.permute.xlu0 %805  ;;  %v1110_v19 = vmul.f32 %v6874_v39, %v6976_v34  ;;  %5925 = vmatmul.mubr.msk.f32.vlgmr.msra.gmra.mrb[16].mxu1 %vm864_vm2, %v6693_v8 }
 0x100   : > { %v977_v11 = vpop.f32.mrb[3].mxu1  ;;  %1462 = vrot.lane.b32.xlu0 %v1430_v41, %s9749_s17  ;;  %1464 = vrot.lane.b32.xlu1 %v1431_v58, %s9749_s17  ;;  %9939 = vst [vmem:[#allocation47_spill] sm:$0xff] %v7010_v9  ;;  %v1113_v41 = vmul.f32 %v6990_v24, %v6891_v45 }
 0x101   : > { %v7006_v0 = vpop.f32.mrb[4].mxu0  ;;  %v7008_v56 = vadd.f32 %v977_v11, %v850_v37  ;;  %5927 = vmatprep.mubr.msk.f32.mxu1 %vm864_vm2, %v6702_v10 }
 0x102   : > { %v7015_v44 = vpop.f32.mrb[5].mxu0  ;;  %v853_v58 = vmul.f32 %v7006_v0, %v6970_v27 }
 0x103   : > { %9938 = vst [vmem:[#allocation46_spill] sm:$0xff] %v7008_v56  ;;  %v7021_v54 = vpop.permute.xlu1 %1251  ;;  %v5874_v11 = vpop.f32.mrb[4].mxu1  ;;  %5928 = vmatmul.mubr.msk.f32.gmra.mrb[18].mxu1 %vm864_vm2, %v6708_v12 }
 0x104   : > { %9940 = vst [vmem:[#allocation48_spill] sm:$0xff] %v7021_v54  ;;  %1142 = vrot.lane.b32.xlu1 %v1110_v19, %s9753_s25  ;;  %1148 = vrot.lane.b32.xlu0 %v1113_v41, %s9753_s25  ;;  %v7029_v37 = vadd.f32 %v5874_v11, %v853_v58  ;;  %v7031_v39 = vpop.f32.mrb[5].mxu1  ;;  %v7035_v45 = vpop.permute.xlu0 %815  ;;  %v1273_v19 = vmul.f32 %v6990_v24, %v6893_v46 }
 0x105   : > { %9942 = vst [vmem:[#allocation50_spill] sm:$0xff] %v7031_v39  ;;  %v7033_v56 = vpop.f32.mrb[6].mxu0  ;;  %9943 = vst [vmem:[#allocation51_spill] sm:$0xff] %v7035_v45  ;;  %5930 = vmatprep.mubr.msk.f32.mxu1 %vm864_vm2, %v6718_v14  ;;  %v1112_v14 = vmul.f32 %v6886_v43, %v6994_v40 }
 0x106   : > { %9941 = vst [vmem:[#allocation49_spill] sm:$0xff] %v7029_v37  ;;  %v7039_v27 = vpop.f32.mrb[7].mxu0  ;;  %v855_v41 = vmul.f32 %v7033_v56, %v7010_v9  ;;  %v1433_v9 = vmul.f32 %v6990_v24, %v6909_v52 }
 0x107   : > { %v5877_v58 = vpop.f32.mrb[6].mxu1  ;;  %v854_v8 = vmul.f32 %v6986_v23, %v7039_v27  ;;  %v1432_v23 = vmul.f32 %v6928_v60, %v6994_v40  ;;  %5931 = vmatmul.mubr.msk.f32.gmra.mrb[20].mxu1 %vm864_vm2, %v6731_v18  ;;  %v1115_v60 = vmul.f32 %v7006_v0, %v6904_v50 }
 0x108   : > { %v7049_v11 = vpop.permute.xlu1 %1095  ;;  %v997_v37 = vpop.f32.mrb[7].mxu1  ;;  %1302 = vrot.lane.b32.xlu1 %v1270_v42, %s9751_s23  ;;  %1308 = vrot.lane.b32.xlu0 %v1273_v19, %s9751_s23  ;;  %v7055_v38 = vadd.f32 %v5877_v58, %v855_v41 }
 0x109   : > { %9944 = vst [vmem:[#allocation52_spill] sm:$0xff] %v7049_v11  ;;  %v7057_v46 = vpop.f32.mrb[8].mxu0  ;;  %v7059_v39 = vadd.f32 %v997_v37, %v854_v8  ;;  %v7071_v19 = vpop.permute.xlu0 %825  ;;  %5933 = vmatprep.mubr.msk.f32.mxu1 %vm864_vm2, %v6726_v17  ;;  %v1272_v17 = vmul.f32 %v6896_v47, %v6994_v40 }
 0x10a   : > { %v7063_v10 = vpop.f32.mrb[9].mxu0  ;;  %v857_v42 = vmul.f32 %v7057_v46, %v7035_v45  ;;  %9945 = vst [vmem:[#allocation53_spill] sm:$0xff] %v7071_v19 }
 0x10b   : > { %5934 = vmatmul.mubr.msk.f32.gmra.mrb[22].mxu1 %vm864_vm2, %v6742_v21 }
 0x10c   : > { %v7075_v37 = vpop.permute.xlu1 %1099  ;;  %v5880_v41 = vpop.f32.mrb[8].mxu1  ;;  %1468 = vrot.lane.b32.xlu1 %v1433_v9, %s9749_s17  ;;  %1466 = vrot.lane.b32.xlu0 %v1432_v23, %s9749_s17 }
 0x10d   : > { %9946 = vst [vmem:[#allocation54_spill] sm:$0xff] %v7075_v37  ;;  %v7079_v12 = vadd.f32 %v5880_v41, %v857_v42  ;;  %v7081_v58 = vpop.f32.mrb[9].mxu1  ;;  %v7083_v8 = vpop.f32.mrb[10].mxu0  ;;  %5936 = vmatprep.mubr.msk.f32.mxu1 %vm864_vm2, %v6745_v22  ;;  %v1435_v22 = vmul.f32 %v7006_v0, %v6930_v61 }
 0x10e   : > { %v7087_v45 = vpop.f32.mrb[11].mxu0  ;;  %v859_v9 = vmul.f32 %v7083_v8, %v7071_v19  ;;  %v7097_v42 = vpop.permute.xlu0 %835 }
 0x10f   : > { %9947 = vst [vmem:[#allocation55_spill] sm:$0xff] %v7097_v42  ;;  %5937 = vmatmul.mubr.msk.f32.gmra.mrb[24].mxu1 %vm864_vm2, %v6758_v25 }
 0x110   : > { %v5883_v23 = vpop.f32.mrb[10].mxu1  ;;  %1146 = vrot.lane.b32.xlu1 %v1112_v14, %s9753_s25  ;;  %1152 = vrot.lane.b32.xlu0 %v1115_v60, %s9753_s25  ;;  %v1275_v14 = vmul.f32 %v7006_v0, %v6916_v55  ;;  %v1114_v0 = vmul.f32 %v6899_v48, %v7015_v44 }
 0x111   : > { %v7101_v18 = vpop.permute.xlu1 %1411  ;;  %v7103_v41 = vadd.f32 %v5883_v23, %v859_v9  ;;  %v7105_v52 = vpop.f32.mrb[11].mxu1  ;;  %5939 = vmatprep.mubr.msk.f32.mxu1 %vm864_vm2, %v6770_v28  ;;  %v1274_v28 = vmul.f32 %v6901_v49, %v7015_v44 }
 0x112   : > { %9948 = vst [vmem:[#allocation56_spill] sm:$0xff] %v7101_v18  ;;  %v7107_v50 = vpop.f32.mrb[12].mxu0  ;;  %v7121_v23 = vpop.permute.xlu0 %845 }
 0x113   : > { %v7111_v19 = vpop.f32.mrb[13].mxu0  ;;  %v861_v60 = vmul.f32 %v7107_v50, %v7097_v42  ;;  %9949 = vst [vmem:[#allocation57_spill] sm:$0xff] %v7121_v23  ;;  %5940 = vmatmul.mubr.msk.f32.gmra.mrb[26].mxu1 %vm864_vm2, %v6776_v29  ;;  %v1277_v29 = vmul.f32 %v7033_v56, %v6934_v63 }
 0x114   : > { %v5886_v9 = vpop.f32.mrb[12].mxu1  ;;  %1306 = vrot.lane.b32.xlu1 %v1272_v17, %s9751_s23  ;;  %1312 = vrot.lane.b32.xlu0 %v1275_v14, %s9751_s23  ;;  %v1434_v17 = vmul.f32 %v6932_v62, %v7015_v44 }
 0x115   : > { %v7125_v21 = vadd.f32 %v5886_v9, %v861_v60  ;;  %v7127_v43 = vpop.f32.mrb[13].mxu1  ;;  %5942 = vmatprep.mubr.msk.f32.mxu1 %vm864_vm2, %v6785_v32  ;;  %v1437_v32 = vmul.f32 %v7033_v56, %v6954_v13 }
 0x116   : > { %v7129_v40 = vpop.f32.mrb[14].mxu0  ;;  %v7131_v55 = vpop.permute.xlu1 %1259 }
 0x117   : > { %9950 = vst [vmem:[#allocation58_spill] sm:$0xff] %v7131_v55  ;;  %v7135_v42 = vpop.f32.mrb[15].mxu0  ;;  %v863_v14 = vmul.f32 %v7129_v40, %v7121_v23  ;;  %v1117_v23 = vmul.f32 %v7033_v56, %v6926_v59  ;;  %5943 = vmatmul.mubr.msk.f32.gmra.mrb[28].mxu1 %vm864_vm2, %v6793_v33  ;;  %v1436_v33 = vmul.f32 %v6942_v2, %v7039_v27 }
 0x118   : > { %v5889_v60 = vpop.f32.mrb[14].mxu1  ;;  %1472 = vrot.lane.b32.xlu1 %v1435_v22, %s9749_s17  ;;  %1470 = vrot.lane.b32.xlu0 %v1434_v17, %s9749_s17  ;;  %v1279_v17 = vmul.f32 %v7057_v46, %v6958_v16 }
 0x119   : > { %v7147_v25 = vadd.f32 %v5889_v60, %v863_v14  ;;  %v7149_v9 = vpop.f32.mrb[15].mxu1  ;;  %5945 = vmatprep.mubr.msk.f32.mxu1 %vm864_vm2, %v6800_v35  ;;  %v1116_v35 = vmul.f32 %v6921_v57, %v7039_v27  ;;  %v1118_v60 = vmul.f32 %v6944_v4, %v7063_v10 }
 0x11b   : > { %v7157_v62 = vpop.permute.xlu1 %1103  ;;  %5946 = vmatmul.mubr.msk.f32.gmra.mrb[30].mxu1 %vm864_vm2, %v6808_v36  ;;  %v1119_v36 = vmul.f32 %v7057_v46, %v6948_v7 }
 0x11c   : > { %9951 = vst [vmem:[#allocation59_spill] sm:$0xff] %v7157_v62  ;;  %1150 = vrot.lane.b32.xlu1 %v1114_v0, %s9753_s25  ;;  %1156 = vrot.lane.b32.xlu0 %v1117_v23, %s9753_s25  ;;  %v1439_v0 = vmul.f32 %v7057_v46, %v6992_v26 }
 0x11d   : > { %5982 = vmatprep.mubr.msk.f32.mxu1 %vm864_vm2, %v6685_v5  ;;  %v1276_v5 = vmul.f32 %v6906_v51, %v7039_v27  ;;  %v1278_v27 = vmul.f32 %v6911_v53, %v7063_v10 }
 0x11f   : > { %v7169_v22 = vpop.permute.xlu1 %1107 }
 0x120   : > { %9952 = vst [vmem:[#allocation60_spill] sm:$0xff] %v7169_v22  ;;  %1310 = vrot.lane.b32.xlu1 %v1274_v28, %s9751_s23  ;;  %1316 = vrot.lane.b32.xlu0 %v1277_v29, %s9751_s23  ;;  %v1438_v29 = vmul.f32 %v6946_v6, %v7063_v10 }
 0x124   : > { %v7183_v23 = vpop.permute.xlu1 %1419  ;;  %1476 = vrot.lane.b32.xlu1 %v1437_v32, %s9749_s17  ;;  %1474 = vrot.lane.b32.xlu0 %v1436_v33, %s9749_s17  ;;  %v1121_v33 = vmul.f32 %v7083_v8, %v6972_v30 }
 0x125   : > { %9953 = vst [vmem:[#allocation61_spill] sm:$0xff] %v7183_v23 }
 0x128   : > { %1154 = vrot.lane.b32.xlu1 %v1116_v35, %s9753_s25  ;;  %1160 = vrot.lane.b32.xlu0 %v1119_v36, %s9753_s25  ;;  %v1281_v36 = vmul.f32 %v7083_v8, %v7021_v54 }
 0x129   : > { %v7193_v56 = vpop.permute.xlu1 %1267 }
 0x12a   : > { %9954 = vst [vmem:[#allocation62_spill] sm:$0xff] %v7193_v56 }
 0x12c   : > { %1314 = vrot.lane.b32.xlu1 %v1276_v5, %s9751_s23  ;;  %1320 = vrot.lane.b32.xlu0 %v1279_v17, %s9751_s23 }
 0x12e   : > { %v7201_v14 = vpop.permute.xlu1 %1423 }
 0x12f   : > { %9955 = vst [vmem:[#allocation63_spill] sm:$0xff] %v7201_v14 }
 0x130   : > { %1158 = vrot.lane.b32.xlu1 %v1118_v60, %s9753_s25  ;;  %1480 = vrot.lane.b32.xlu0 %v1439_v0, %s9749_s17  ;;  %v1441_v60 = vmul.f32 %v7083_v8, %v7101_v18 }
 0x133   : > { %v7211_v28 = vpop.permute.xlu1 %770 }
 0x134   : > { %9956 = vst [vmem:[#allocation64_spill] sm:$0xff] %v7211_v28  ;;  %v848_v32 = vmul.f32 %v7211_v28, %v6976_v34  ;;  %1318 = vrot.lane.b32.xlu1 %v1278_v27, %s9751_s23  ;;  %1478 = vrot.lane.b32.xlu0 %v1438_v29, %s9749_s17 }
 0x136   : > { %v7220_v46 = vadd.f32 %v6984_v3, %v848_v32  ;;  %v1120_v3 = vmul.f32 %v6962_v20, %v7087_v45  ;;  %v9961_v32 = vld [vmem:[#allocation35_spill] sm:$0xff] }
 0x137   : > { %v7224_v35 = vpop.permute.xlu1 %775 }
 0x138   : > { %9957 = vst [vmem:[#allocation65_spill] sm:$0xff] %v7224_v35  ;;  %v849_v5 = vmul.f32 %v6974_v31, %v7224_v35  ;;  %1164 = vrot.lane.b32.xlu1 %v1121_v33, %s9753_s25  ;;  %1324 = vrot.lane.b32.xlu0 %v1281_v36, %s9751_s23  ;;  %v1440_v33 = vmul.f32 %v9961_v32, %v7087_v45 }
 0x13a   : > { %v973_v34 = vadd.f32 %v6982_v1, %v849_v5  ;;  %v9959_v1 = vld [vmem:[#allocation21_spill] sm:$0xff]  ;;  %v1123_v5 = vmul.f32 %v7107_v50, %v7075_v37 }
 0x13b   : > { %v7235_v17 = vpop.permute.xlu1 %785  ;;  %v1280_v27 = vmul.f32 %v9959_v1, %v7087_v45 }
 0x13c   : > { %9958 = vst [vmem:[#allocation66_spill] sm:$0xff] %v7235_v17  ;;  %v851_v0 = vmul.f32 %v6990_v24, %v7235_v17  ;;  %1162 = vrot.lane.b32.xlu1 %v1120_v3, %s9753_s25  ;;  %1484 = vrot.lane.b32.xlu0 %v1441_v60, %s9749_s17  ;;  %v9962_v24 = vld [vmem:[#allocation50_spill] sm:$0xff]  ;;  %v1283_v3 = vmul.f32 %v7107_v50, %v7131_v55 }
 0x13e   : > { %v7244_v31 = vadd.f32 %v7000_v15, %v851_v0  ;;  %v1122_v0 = vmul.f32 %v7049_v11, %v7111_v19 }
 0x13f   : > { %v7248_v29 = vpop.permute.xlu1 %790 }
 0x140   : > { %9960 = vst [vmem:[#allocation67_spill] sm:$0xff] %v7248_v29  ;;  %v852_v8 = vmul.f32 %v7248_v29, %v7015_v44  ;;  %1322 = vrot.lane.b32.xlu1 %v1280_v27, %s9751_s23  ;;  %1482 = vrot.lane.b32.xlu0 %v1440_v33, %s9749_s17  ;;  %v1443_v33 = vmul.f32 %v7107_v50, %v7183_v23 }
 0x142   : > { %v7257_v36 = vadd.f32 %v9962_v24, %v852_v8 }
 0x143   : > { %v7259_v15 = vpop.permute.xlu1 %810 }
 0x144   : > { %9963 = vst [vmem:[#allocation50_spill] sm:$0xff] %v7259_v15  ;;  %v856_v60 = vmul.f32 %v7259_v15, %v7063_v10  ;;  %1168 = vrot.lane.b32.xlu1 %v1123_v5, %s9753_s25  ;;  %1328 = vrot.lane.b32.xlu0 %v1283_v3, %s9751_s23  ;;  %v9967_v3 = vld [vmem:[#allocation36_spill] sm:$0xff] }
 0x146   : > { %v7270_v44 = vadd.f32 %v7081_v58, %v856_v60  ;;  %v9965_v58 = vld [vmem:[#allocation23_spill] sm:$0xff]  ;;  %v1442_v60 = vmul.f32 %v9967_v3, %v7111_v19 }
 0x147   : > { %v7274_v27 = vpop.permute.xlu1 %820  ;;  %v1282_v24 = vmul.f32 %v9965_v58, %v7111_v19 }
 0x148   : > { %9964 = vst [vmem:[#allocation68_spill] sm:$0xff] %v7274_v27  ;;  %v858_v8 = vmul.f32 %v7274_v27, %v7087_v45  ;;  %1166 = vrot.lane.b32.xlu1 %v1122_v0, %s9753_s25  ;;  %1488 = vrot.lane.b32.xlu0 %v1443_v33, %s9749_s17  ;;  %v1125_v0 = vmul.f32 %v7129_v40, %v7169_v22 }
 0x149   : > { %v1285_v33 = vmul.f32 %v7129_v40, %v7193_v56 }
 0x14a   : > { %v7283_v10 = vadd.f32 %v7105_v52, %v858_v8 }
 0x14b   : > { %v7287_v5 = vpop.permute.xlu1 %830 }
 0x14c   : > { %9966 = vst [vmem:[#allocation69_spill] sm:$0xff] %v7287_v5  ;;  %v860_v50 = vmul.f32 %v7287_v5, %v7111_v19  ;;  %1326 = vrot.lane.b32.xlu1 %v1282_v24, %s9751_s23  ;;  %1486 = vrot.lane.b32.xlu0 %v1442_v60, %s9749_s17  ;;  %v9969_v24 = vld [vmem:[#allocation38_spill] sm:$0xff] }
 0x14d   : > { %v1445_v60 = vmul.f32 %v7129_v40, %v9969_v24 }
 0x14e   : > { %v7296_v45 = vadd.f32 %v7127_v43, %v860_v50  ;;  %v1124_v43 = vmul.f32 %v7157_v62, %v7135_v42  ;;  %v9970_v50 = vld [vmem:[#allocation25_spill] sm:$0xff] }
 0x14f   : > { %v7298_v52 = vpop.permute.xlu1 %840  ;;  %v1284_v56 = vmul.f32 %v9970_v50, %v7135_v42 }
 0x150   : > { %9968 = vst [vmem:[#allocation70_spill] sm:$0xff] %v7298_v52  ;;  %v862_v8 = vmul.f32 %v7298_v52, %v7135_v42  ;;  %1172 = vrot.lane.b32.xlu1 %v1125_v0, %s9753_s25  ;;  %1332 = vrot.lane.b32.xlu0 %v1285_v33, %s9751_s23  ;;  %v1444_v0 = vmul.f32 %v7201_v14, %v7135_v42 }
 0x152   : > { %v7309_v19 = vadd.f32 %v7149_v9, %v862_v8 }
 0x154   : > { %1170 = vrot.lane.b32.xlu1 %v1124_v43, %s9753_s25  ;;  %1492 = vrot.lane.b32.xlu0 %v1445_v60, %s9749_s17  ;;  %s5411_s25 = sshll.u32 %s9884_s1, 7  ;;  %s5621_s1 = sshll.u32 %s6631_s22, 11 }
 0x155   : > { %s10271_s22 = sand.u32 1, %s6502_s19  }
 0x158   : > { %1330 = vrot.lane.b32.xlu1 %v1284_v56, %s9751_s23  ;;  %s9975_s23 = smov 96  }
 0x15c   : > { %1490 = vrot.lane.b32.xlu1 %v1444_v0, %s9749_s17  ;;  %s9980_s17 = smov 32  }
 0x16e   : > { %v1145_v9 = vpop.permute.xlu1 %1144  ;;  %v1305_v33 = vpop.permute.xlu0 %1304 }
 0x16f   : > { %v1191_v52 = vadd.f32 %v1145_v9, %v973_v34 }
 0x171   : > { %v1351_v43 = vadd.f32 %v1305_v33, %v1191_v52  ;;  %v9971_v52 = vld [vmem:[#allocation46_spill] sm:$0xff] }
 0x172   : > { %v1465_v8 = vpop.permute.xlu1 %1464  ;;  %v1463_v62 = vpop.permute.xlu0 %1462 }
 0x173   : > { %v1511_v58 = vadd.f32 %v1465_v8, %v1351_v43 }
 0x175   : > { %v1527_v0 = vmax.f32 %v1511_v58, 0.0 }
 0x176   : > { %v1143_v40 = vpop.permute.xlu1 %1142  ;;  %v1149_v24 = vpop.permute.xlu0 %1148 }
 0x177   : > { %v1190_v60 = vadd.f32 %v1143_v40, %v7220_v46  ;;  %v1193_v34 = vadd.f32 %v1149_v24, %v7244_v31 }
 0x17a   : > { %v1303_v22 = vpop.permute.xlu1 %1302  ;;  %v1309_v3 = vpop.permute.xlu0 %1308 }
 0x17b   : > { %v1350_v50 = vadd.f32 %v1303_v22, %v1190_v60  ;;  %v1353_v9 = vadd.f32 %v1309_v3, %v1193_v34 }
 0x17d   : > { %v1510_v56 = vadd.f32 %v1463_v62, %v1350_v50 }
 0x17e   : > { %v1469_v23 = vpop.permute.xlu1 %1468  ;;  %v1467_v11 = vpop.permute.xlu0 %1466 }
 0x17f   : > { %v1526_v42 = vmax.f32 %v1510_v56, 0.0  ;;  %v1513_v62 = vadd.f32 %v1469_v23, %v1353_v9 }
 0x181   : > { %5898 = vmatprep.mubr.msk.f32.mxu0 %vm1546_vm3, %v1526_v42  ;;  %v1529_v58 = vmax.f32 %v1513_v62, 0.0 }
 0x182   : > { %v1147_v14 = vpop.permute.xlu1 %1146  ;;  %v1153_v55 = vpop.permute.xlu0 %1152  ;;  %5899 = vmatmul.mubr.msk.f32.vlgmr.msra.gmra.mrb[16].mxu0 %vm1546_vm3, %v1527_v0  ;;  %v9972_v0 = vld [vmem:[#allocation49_spill] sm:$0xff] }
 0x183   : > { %v1192_v46 = vadd.f32 %v1147_v14, %v9971_v52  ;;  %v1195_v31 = vadd.f32 %v1153_v55, %v9972_v0 }
 0x186   : > { %v1307_v33 = vpop.permute.xlu1 %1306  ;;  %v1313_v22 = vpop.permute.xlu0 %1312 }
 0x187   : > { %v1352_v8 = vadd.f32 %v1307_v33, %v1192_v46  ;;  %v1355_v3 = vadd.f32 %v1313_v22, %v1195_v31 }
 0x189   : > { %v1512_v50 = vadd.f32 %v1467_v11, %v1352_v8 }
 0x18a   : > { %v1473_v40 = vpop.permute.xlu1 %1472  ;;  %v1471_v43 = vpop.permute.xlu0 %1470 }
 0x18b   : > { %v1528_v60 = vmax.f32 %v1512_v50, 0.0  ;;  %v1515_v23 = vadd.f32 %v1473_v40, %v1355_v3 }
 0x18d   : > { %5901 = vmatprep.mubr.msk.f32.mxu0 %vm1546_vm3, %v1528_v60  ;;  %v1531_v8 = vmax.f32 %v1515_v23, 0.0 }
 0x18e   : > { %v1151_v56 = vpop.permute.xlu1 %1150  ;;  %v1157_v42 = vpop.permute.xlu0 %1156  ;;  %5902 = vmatmul.mubr.msk.f32.gmra.mrb[18].mxu0 %vm1546_vm3, %v1529_v58 }
 0x18f   : > { %v1194_v14 = vadd.f32 %v1151_v56, %v7257_v36  ;;  %v1197_v55 = vadd.f32 %v1157_v42, %v7055_v38 }
 0x192   : > { %v1311_v24 = vpop.permute.xlu1 %1310  ;;  %v1317_v34 = vpop.permute.xlu0 %1316 }
 0x193   : > { %v1354_v52 = vadd.f32 %v1311_v24, %v1194_v14  ;;  %v1357_v22 = vadd.f32 %v1317_v34, %v1197_v55 }
 0x195   : > { %v1514_v11 = vadd.f32 %v1471_v43, %v1354_v52 }
 0x196   : > { %v1477_v46 = vpop.permute.xlu1 %1476  ;;  %v1475_v9 = vpop.permute.xlu0 %1474 }
 0x197   : > { %v1530_v33 = vmax.f32 %v1514_v11, 0.0  ;;  %v1517_v40 = vadd.f32 %v1477_v46, %v1357_v22 }
 0x199   : > { %5904 = vmatprep.mubr.msk.f32.mxu0 %vm1546_vm3, %v1530_v33  ;;  %v1533_v3 = vmax.f32 %v1517_v40, 0.0 }
 0x19a   : > { %v1155_v62 = vpop.permute.xlu1 %1154  ;;  %v1161_v50 = vpop.permute.xlu0 %1160  ;;  %5905 = vmatmul.mubr.msk.f32.gmra.mrb[20].mxu0 %vm1546_vm3, %v1531_v8 }
 0x19b   : > { %v1196_v36 = vadd.f32 %v1155_v62, %v7059_v39  ;;  %v1199_v24 = vadd.f32 %v1161_v50, %v7079_v12 }
 0x19e   : > { %v1315_v60 = vpop.permute.xlu1 %1314  ;;  %v1321_v58 = vpop.permute.xlu0 %1320 }
 0x19f   : > { %v1356_v56 = vadd.f32 %v1315_v60, %v1196_v36  ;;  %v1359_v23 = vadd.f32 %v1321_v58, %v1199_v24 }
 0x1a1   : > { %v1516_v43 = vadd.f32 %v1475_v9, %v1356_v56 }
 0x1a2   : > { %v1159_v0 = vpop.permute.xlu1 %1158  ;;  %v1481_v31 = vpop.permute.xlu0 %1480 }
 0x1a3   : > { %v1532_v14 = vmax.f32 %v1516_v43, 0.0  ;;  %v1198_v52 = vadd.f32 %v1159_v0, %v7270_v44  ;;  %v1519_v34 = vadd.f32 %v1481_v31, %v1359_v23 }
 0x1a5   : > { %5907 = vmatprep.mubr.msk.f32.mxu0 %vm1546_vm3, %v1532_v14  ;;  %v1535_v8 = vmax.f32 %v1519_v34, 0.0 }
 0x1a6   : > { %v1319_v38 = vpop.permute.xlu1 %1318  ;;  %v1479_v42 = vpop.permute.xlu0 %1478  ;;  %5908 = vmatmul.mubr.msk.f32.gmra.mrb[22].mxu0 %vm1546_vm3, %v1533_v3 }
 0x1a7   : > { %v1358_v39 = vadd.f32 %v1319_v38, %v1198_v52 }
 0x1a9   : > { %v1518_v11 = vadd.f32 %v1479_v42, %v1358_v39 }
 0x1aa   : > { %v1165_v46 = vpop.permute.xlu1 %1164  ;;  %v1325_v9 = vpop.permute.xlu0 %1324 }
 0x1ab   : > { %v1534_v33 = vmax.f32 %v1518_v11, 0.0  ;;  %v1201_v62 = vadd.f32 %v1165_v46, %v7103_v41 }
 0x1ad   : > { %5910 = vmatprep.mubr.msk.f32.mxu0 %vm1546_vm3, %v1534_v33  ;;  %v1361_v50 = vadd.f32 %v1325_v9, %v1201_v62 }
 0x1ae   : > { %v1163_v12 = vpop.permute.xlu1 %1162  ;;  %v1485_v44 = vpop.permute.xlu0 %1484  ;;  %5911 = vmatmul.mubr.msk.f32.gmra.mrb[24].mxu0 %vm1546_vm3, %v1535_v8 }
 0x1af   : > { %v1200_v55 = vadd.f32 %v1163_v12, %v7283_v10  ;;  %v1521_v58 = vadd.f32 %v1485_v44, %v1361_v50 }
 0x1b1   : > { %v1537_v31 = vmax.f32 %v1521_v58, 0.0 }
 0x1b2   : > { %v1323_v36 = vpop.permute.xlu1 %1322  ;;  %v1483_v22 = vpop.permute.xlu0 %1482 }
 0x1b3   : > { %v1360_v60 = vadd.f32 %v1323_v36, %v1200_v55 }
 0x1b5   : > { %v1520_v56 = vadd.f32 %v1483_v22, %v1360_v60 }
 0x1b6   : > { %v1169_v40 = vpop.permute.xlu1 %1168  ;;  %v1329_v43 = vpop.permute.xlu0 %1328 }
 0x1b7   : > { %v1536_v0 = vmax.f32 %v1520_v56, 0.0  ;;  %v1203_v41 = vadd.f32 %v1169_v40, %v7125_v21 }
 0x1b9   : > { %5913 = vmatprep.mubr.msk.f32.mxu0 %vm1546_vm3, %v1536_v0  ;;  %v1363_v24 = vadd.f32 %v1329_v43, %v1203_v41 }
 0x1ba   : > { %v1167_v14 = vpop.permute.xlu1 %1166  ;;  %v1489_v3 = vpop.permute.xlu0 %1488  ;;  %5914 = vmatmul.mubr.msk.f32.gmra.mrb[26].mxu0 %vm1546_vm3, %v1537_v31 }
 0x1bb   : > { %v1202_v10 = vadd.f32 %v1167_v14, %v7296_v45  ;;  %v1523_v42 = vadd.f32 %v1489_v3, %v1363_v24 }
 0x1bd   : > { %v1539_v46 = vmax.f32 %v1523_v42, 0.0  ;;  %v2209_v42 = vld [vmem:[%s9674_s7] sm:$0xff] }
 0x1be   : > { %v1327_v52 = vpop.permute.xlu1 %1326  ;;  %v1487_v38 = vpop.permute.xlu0 %1486 }
 0x1bf   : > { %v1362_v23 = vadd.f32 %v1327_v52, %v1202_v10 }
 0x1c1   : > { %v1522_v39 = vadd.f32 %v1487_v38, %v1362_v23 }
 0x1c2   : > { %v1173_v34 = vpop.permute.xlu1 %1172  ;;  %v1333_v9 = vpop.permute.xlu0 %1332 }
 0x1c3   : > { %v1538_v11 = vmax.f32 %v1522_v39, 0.0  ;;  %v1205_v21 = vadd.f32 %v1173_v34, %v7147_v25  ;;  %v2210_v39 = vld [vmem:[%s9674_s7 + $0x8] sm:$0xff] }
 0x1c4   : > { %v6182_v34 = vpack.c.bf16 %v2210_v39, %v2209_v42  ;;  %v9977_v42 = vld [vmem:[#allocation5_spill] sm:$0xff] }
 0x1c5   : > { %5916 = vmatprep.mubr.msk.f32.mxu0 %vm1546_vm3, %v1538_v11  ;;  %v1365_v8 = vadd.f32 %v1333_v9, %v1205_v21 }
 0x1c6   : > { %v1171_v33 = vpop.permute.xlu1 %1170  ;;  %5917 = vmatmul.mubr.msk.f32.gmra.mrb[28].mxu0 %vm1546_vm3, %v1539_v46  ;;  %v1493_v12 = vpop.permute.xlu0 %1492  ;;  %6183 = vmatprep.subr.bf16.mxu0 %v6182_v34  ;;  %v9973_v46 = vld [vmem:[#allocation8_spill] sm:$0xff] }
 0x1c7   : > { %v1204_v45 = vadd.f32 %v1171_v33, %v7309_v19  ;;  %v1525_v50 = vadd.f32 %v1493_v12, %v1365_v8  ;;  %6185 = vmatpush3.bf16.msra.mxu0 %v6182_v34  ;;  %v2211_v8 = vld [vmem:[%s9674_s7 + $0x10] sm:$0xff] }
 0x1c9   : > { %v1541_v60 = vmax.f32 %v1525_v50, 0.0 }
 0x1ca   : > { %v1331_v62 = vpop.permute.xlu1 %1330 }
 0x1cb   : > { %v1364_v44 = vadd.f32 %v1331_v62, %v1204_v45  ;;  %v2212_v62 = vld [vmem:[%s9674_s7 + $0x18] sm:$0xff]  ;;  %v9974_v45 = vld [vmem:[#allocation6_spill] sm:$0xff] }
 0x1ce   : > { %v1491_v55 = vpop.permute.xlu1 %1490 }
 0x1cf   : > { %v1524_v36 = vadd.f32 %v1491_v55, %v1364_v44  ;;  %v6186_v55 = vpack.c.bf16 %v2212_v62, %v2211_v8  ;;  %v9981_v62 = vld [vmem:[#allocation9_spill] sm:$0xff] }
 0x1d1   : > { %v1540_v22 = vmax.f32 %v1524_v36, 0.0  ;;  %6187 = vmatprep.subr.bf16.mxu0 %v6186_v55 }
 0x1d2   : > { %v5926_v58 = vpop.f32.mrb[16].mxu1  ;;  %6189 = vmatpush3.bf16.msra.mxu0 %v6186_v55 }
 0x1d3   : > { %5919 = vmatprep.mubr.msk.f32.mxu0 %vm1546_vm3, %v1540_v22  ;;  %v1826_v25 = vpop.f32.mrb[17].mxu1  ;;  %v9976_v22 = vld [vmem:[#allocation7_spill] sm:$0xff] }
 0x1d4   : > { %5920 = vmatmul.mubr.msk.f32.gmra.mrb[30].mxu0 %vm1546_vm3, %v1541_v60 }
 0x1d6   : > { %v5929_v56 = vpop.f32.mrb[18].mxu1 }
 0x1d7   : > { %v1836_v40 = vpop.f32.mrb[19].mxu1 }
 0x1da   : > { %v7354_v43 = vpop.f32.mrb[20].mxu1 }
 0x1db   : > { %v7356_v0 = vpop.f32.mrb[21].mxu1 }
 0x1de   : > { %v7358_v19 = vpop.f32.mrb[22].mxu1 }
 0x1df   : > { %v7360_v31 = vpop.f32.mrb[23].mxu1 }
 0x1e2   : > { %v7362_v41 = vpop.f32.mrb[24].mxu1 }
 0x1e3   : > { %v7364_v14 = vpop.f32.mrb[25].mxu1 }
 0x1e6   : > { %v7366_v3 = vpop.f32.mrb[26].mxu1 }
 0x1e7   : > { %v7368_v24 = vpop.f32.mrb[27].mxu1 }
 0x1ea   : > { %v7370_v10 = vpop.f32.mrb[28].mxu1 }
 0x1eb   : > { %v7372_v52 = vpop.f32.mrb[29].mxu1 }
 0x1ee   : > { %v7374_v23 = vpop.f32.mrb[30].mxu1 }
 0x1ef   : > { %v7376_v38 = vpop.f32.mrb[31].mxu1 }
 0x255   : > { %v5900_v11 = vpop.f32.mrb[16].mxu0 }
 0x256   : > { %v1906_v9 = vmul.f32 %v5900_v11, %v9973_v46  ;;  %v1661_v21 = vpop.f32.mrb[17].mxu0  ;;  %v1742_v33 = vmul.f32 %v5900_v11, %v7224_v35  ;;  %v2002_v60 = vmul.f32 %v5900_v11, %v9976_v22  ;;  %v7444_v22 = vld [vmem:[%s6675_s3 + $0x28] sm:$0xff]  ;;  %v10005_v35 = vld [vmem:[#allocation44_spill] sm:$0xff] }
 0x257   : > { %v1905_v12 = vmul.f32 %v1661_v21, %v9974_v45  ;;  %v1741_v44 = vmul.f32 %v1661_v21, %v7211_v28  ;;  %v2001_v39 = vmul.f32 %v1661_v21, %v9977_v42  ;;  %9987 = vst [vmem:[#allocation49_spill] sm:$0xff] %v7444_v22  ;;  %v7474_v45 = vld [vmem:[%s6675_s3 + $0x48] sm:$0xff] }
 0x258   : > { %v7394_v50 = vadd.f32 %v5926_v58, %v1742_v33  ;;  %1939 = vrot.lane.b32.xlu0 %v1906_v9, %s9975_s23  ;;  %v2406_v58 = vld [vmem:[%s9675_s8] sm:$0xf]  ;;  %v7411_v9 = vld [vmem:[%s6675_s3 + $0x8] sm:$0xff]  ;;  %v7417_v33 = vld [vmem:[%s6675_s3 + $0x10] sm:$0xff]  ;;  %9995 = vst [vmem:[#allocation74_spill] sm:$0xff] %v7474_v45 }
 0x259   : > { %v7397_v36 = vadd.f32 %v1826_v25, %v1741_v44  ;;  %1937 = vrot.lane.b32.xlu1 %v1905_v12, %s9975_s23  ;;  %5980 = vmatprep.subr.msk.mxu1 %vm897_vm0, %v2406_v58  ;;  %v9979_v25 = vld [vmem:[#allocation11_spill] sm:$0xff]  ;;  %v2097_v12 = vmul.f32 %v1661_v21, %v9981_v62  ;;  %v7437_v62 = vld [vmem:[%s6675_s3 + $0x20] sm:$0xff] }
 0x25a   : > { %v2098_v34 = vmul.f32 %v5900_v11, %v9979_v25  ;;  %5981 = vmatpush3.msk.msra.mxu1 %vm897_vm0, %v2406_v58  ;;  %v9982_v11 = vld [vmem:[#allocation12_spill] sm:$0xff]  ;;  %9984 = vst [vmem:[#allocation46_spill] sm:$0xff] %v7437_v62 }
 0x25b   : > { %5983 = vmatmul.mubr.msk.f32.vlgmr.msra.gmra.mrb[32].mxu1 %vm864_vm2, %v7411_v9  ;;  %v7426_v25 = vld [vmem:[%s6675_s3 + $0x18] sm:$0xff] }
 0x25c   : > { %2035 = vrot.lane.b32.xlu0 %v2002_v60, %s9978_s0  ;;  %5985 = vmatprep.mubr.msk.f32.mxu1 %vm864_vm2, %v7417_v33 }
 0x25d   : > { %2033 = vrot.lane.b32.xlu1 %v2001_v39, %s9978_s0  ;;  %v9983_v39 = vld [vmem:[#allocation40_spill] sm:$0xff] }
 0x25f   : > { %5986 = vmatmul.mubr.msk.f32.gmra.mrb[34].mxu1 %vm864_vm2, %v7426_v25 }
 0x260   : > { %2131 = vrot.lane.b32.xlu0 %v2098_v34, %s9980_s17  ;;  %5988 = vmatprep.mubr.msk.f32.mxu1 %vm864_vm2, %v7437_v62 }
 0x261   : > { %v5903_v8 = vpop.f32.mrb[18].mxu0 }
 0x262   : > { %v1908_v44 = vmul.f32 %v5903_v8, %v9982_v11  ;;  %v1671_v55 = vpop.f32.mrb[19].mxu0  ;;  %v1744_v60 = vmul.f32 %v5903_v8, %v7235_v17  ;;  %v9986_v11 = vld [vmem:[#allocation10_spill] sm:$0xff] }
 0x263   : > { %v1743_v58 = vmul.f32 %v1671_v55, %v9983_v39  ;;  %v9985_v39 = vld [vmem:[#allocation13_spill] sm:$0xff]  ;;  %v1907_v42 = vmul.f32 %v1671_v55, %v9986_v11  ;;  %5989 = vmatmul.mubr.msk.f32.gmra.mrb[36].mxu1 %vm864_vm2, %v7444_v22  ;;  %v9994_v11 = vld [vmem:[#allocation42_spill] sm:$0xff] }
 0x264   : > { %v7430_v34 = vadd.f32 %v5929_v56, %v1744_v60  ;;  %2129 = vrot.lane.b32.xlu0 %v2097_v12, %s9980_s17  ;;  %1943 = vrot.lane.b32.xlu1 %v1908_v44, %s9975_s23  ;;  %v2004_v17 = vmul.f32 %v5903_v8, %v9985_v39  ;;  %v7451_v56 = vld [vmem:[%s6675_s3 + $0x30] sm:$0xff]  ;;  %v2003_v44 = vmul.f32 %v1671_v55, %v6896_v47  ;;  %v7458_v60 = vld [vmem:[%s6675_s3 + $0x38] sm:$0xff] }
 0x265   : > { %v7434_v21 = vadd.f32 %v1836_v40, %v1743_v58  ;;  %9988 = vst [vmem:[#allocation71_spill] sm:$0xff] %v7451_v56  ;;  %5991 = vmatprep.mubr.msk.f32.mxu1 %vm864_vm2, %v7451_v56  ;;  %v9989_v40 = vld [vmem:[#allocation19_spill] sm:$0xff]  ;;  %9990 = vst [vmem:[#allocation72_spill] sm:$0xff] %v7458_v60 }
 0x266   : > { %v2100_v12 = vmul.f32 %v5903_v8, %v9989_v40  ;;  %v9992_v58 = vld [vmem:[#allocation27_spill] sm:$0xff]  ;;  %v9993_v40 = vld [vmem:[#allocation17_spill] sm:$0xff] }
 0x267   : > { %5992 = vmatmul.mubr.msk.f32.gmra.mrb[38].mxu1 %vm864_vm2, %v7458_v60  ;;  %v2099_v8 = vmul.f32 %v1671_v55, %v9992_v58  ;;  %v7487_v58 = vld [vmem:[%s6675_s3 + $0x50] sm:$0xff] }
 0x268   : > { %2039 = vrot.lane.b32.xlu0 %v2004_v17, %s9978_s0  ;;  %1941 = vrot.lane.b32.xlu1 %v1907_v42, %s9975_s23  ;;  %v7465_v42 = vld [vmem:[%s6675_s3 + $0x40] sm:$0xff]  ;;  %9997 = vst [vmem:[#allocation76_spill] sm:$0xff] %v7487_v58 }
 0x269   : > { %9991 = vst [vmem:[#allocation73_spill] sm:$0xff] %v7465_v42  ;;  %5994 = vmatprep.mubr.msk.f32.mxu1 %vm864_vm2, %v7465_v42 }
 0x26b   : > { %5995 = vmatmul.mubr.msk.f32.gmra.mrb[40].mxu1 %vm864_vm2, %v7474_v45 }
 0x26c   : > { %2135 = vrot.lane.b32.xlu0 %v2100_v12, %s9980_s17  ;;  %2037 = vrot.lane.b32.xlu1 %v2003_v44, %s9978_s0 }
 0x26d   : > { %v5906_v17 = vpop.f32.mrb[20].mxu0  ;;  %5997 = vmatprep.mubr.msk.f32.mxu1 %vm864_vm2, %v7487_v58 }
 0x26e   : > { %v1910_v47 = vmul.f32 %v5906_v17, %v9993_v40  ;;  %v1681_v39 = vpop.f32.mrb[21].mxu0  ;;  %v1746_v28 = vmul.f32 %v5906_v17, %v9994_v11 }
 0x26f   : > { %v1745_v12 = vmul.f32 %v1681_v39, %v7248_v29  ;;  %v9998_v29 = vld [vmem:[#allocation22_spill] sm:$0xff]  ;;  %v1909_v40 = vmul.f32 %v1681_v39, %v6899_v48 }
 0x270   : > { %v7479_v44 = vadd.f32 %v7354_v43, %v1746_v28  ;;  %2133 = vrot.lane.b32.xlu0 %v2099_v8, %s9980_s17  ;;  %1947 = vrot.lane.b32.xlu1 %v1910_v47, %s9975_s23  ;;  %v2006_v11 = vmul.f32 %v5906_v17, %v9998_v29  ;;  %v7494_v28 = vld [vmem:[%s6675_s3 + $0x58] sm:$0xff]  ;;  %v7501_v47 = vld [vmem:[%s6675_s3 + $0x60] sm:$0xff]  ;;  %v2102_v43 = vmul.f32 %v5906_v17, %v6930_v61  ;;  %v10004_v29 = vld [vmem:[#allocation47_spill] sm:$0xff] }
 0x271   : > { %v7484_v55 = vadd.f32 %v7356_v0, %v1745_v12  ;;  %9999 = vst [vmem:[#allocation77_spill] sm:$0xff] %v7494_v28  ;;  %5998 = vmatmul.mubr.msk.f32.gmra.mrb[42].mxu1 %vm864_vm2, %v7494_v28  ;;  %10000 = vst [vmem:[#allocation78_spill] sm:$0xff] %v7501_v47  ;;  %v2005_v0 = vmul.f32 %v1681_v39, %v6901_v49  ;;  %v7508_v8 = vld [vmem:[%s6675_s3 + $0x68] sm:$0xff]  ;;  %v10003_v12 = vld [vmem:[#allocation29_spill] sm:$0xff] }
 0x272   : > { %6000 = vmatprep.mubr.msk.f32.mxu1 %vm864_vm2, %v7501_v47  ;;  %10001 = vst [vmem:[#allocation79_spill] sm:$0xff] %v7508_v8  ;;  %v2101_v17 = vmul.f32 %v1681_v39, %v10003_v12 }
 0x273   : > { %9996 = vst [vmem:[#allocation75_spill] sm:$0xff] %v7484_v55  ;;  %v7524_v55 = vld [vmem:[%s6675_s3 + $0x78] sm:$0xff] }
 0x274   : > { %2043 = vrot.lane.b32.xlu0 %v2006_v11, %s9978_s0  ;;  %1945 = vrot.lane.b32.xlu1 %v1909_v40, %s9975_s23  ;;  %v7515_v40 = vld [vmem:[%s6675_s3 + $0x70] sm:$0xff]  ;;  %10006 = vst [vmem:[#allocation81_spill] sm:$0xff] %v7524_v55 }
 0x275   : > { %6001 = vmatmul.mubr.msk.f32.gmra.mrb[44].mxu1 %vm864_vm2, %v7508_v8  ;;  %10002 = vst [vmem:[#allocation80_spill] sm:$0xff] %v7515_v40 }
 0x276   : > { %6003 = vmatprep.mubr.msk.f32.mxu1 %vm864_vm2, %v7515_v40 }
 0x278   : > { %2139 = vrot.lane.b32.xlu0 %v2102_v43, %s9980_s17  ;;  %2041 = vrot.lane.b32.xlu1 %v2005_v0, %s9978_s0  ;;  %v7537_v0 = vld [vmem:[%s6675_s3] sm:$0xff] }
 0x279   : > { %v5909_v11 = vpop.f32.mrb[22].mxu0  ;;  %6004 = vmatmul.mubr.msk.f32.gmra.mrb[46].mxu1 %vm864_vm2, %v7524_v55  ;;  %10007 = vst [vmem:[#allocation82_spill] sm:$0xff] %v7537_v0 }
 0x27a   : > { %v1912_v61 = vmul.f32 %v5909_v11, %v6926_v59  ;;  %v1691_v49 = vpop.f32.mrb[23].mxu0  ;;  %v1748_v48 = vmul.f32 %v5909_v11, %v10004_v29  ;;  %6034 = vmatprep.mubr.msk.f32.mxu1 %vm864_vm2, %v7537_v0  ;;  %v2008_v12 = vmul.f32 %v5909_v11, %v6934_v63 }
 0x27b   : > { %v1747_v46 = vmul.f32 %v1691_v49, %v10005_v35  ;;  %v1911_v35 = vmul.f32 %v1691_v49, %v6921_v57 }
 0x27c   : > { %v7529_v43 = vadd.f32 %v7358_v19, %v1748_v48  ;;  %2137 = vrot.lane.b32.xlu0 %v2101_v17, %s9980_s17  ;;  %1951 = vrot.lane.b32.xlu1 %v1912_v61, %s9975_s23  ;;  %v2104_v19 = vmul.f32 %v5909_v11, %v6954_v13  ;;  %v2007_v61 = vmul.f32 %v1691_v49, %v6906_v51  ;;  %v10022_v51 = vld [vmem:[#allocation25_spill] sm:$0xff] }
 0x27d   : > { %v7534_v39 = vadd.f32 %v7360_v31, %v1747_v46  ;;  %v10008_v46 = vld [vmem:[#allocation51_spill] sm:$0xff] }
 0x280   : > { %2047 = vrot.lane.b32.xlu0 %v2008_v12, %s9978_s0  ;;  %1949 = vrot.lane.b32.xlu1 %v1911_v35, %s9975_s23  ;;  %v2103_v35 = vmul.f32 %v1691_v49, %v6942_v2  ;;  %v10018_v2 = vld [vmem:[#allocation70_spill] sm:$0xff] }
 0x281   : > { %v5912_v48 = vpop.f32.mrb[24].mxu0 }
 0x282   : > { %v1701_v31 = vpop.f32.mrb[25].mxu0  ;;  %v1750_v17 = vmul.f32 %v5912_v48, %v10008_v46  ;;  %v1914_v11 = vmul.f32 %v5912_v48, %v6948_v7  ;;  %v2010_v13 = vmul.f32 %v5912_v48, %v6958_v16 }
 0x283   : > { %v1749_v29 = vmul.f32 %v1701_v31, %v7259_v15 }
 0x284   : > { %v7550_v59 = vadd.f32 %v7362_v41, %v1750_v17  ;;  %2143 = vrot.lane.b32.xlu0 %v2104_v19, %s9980_s17  ;;  %2045 = vrot.lane.b32.xlu1 %v2007_v61, %s9978_s0  ;;  %v1913_v41 = vmul.f32 %v1701_v31, %v6944_v4  ;;  %v10009_v61 = vld [vmem:[#allocation53_spill] sm:$0xff] }
 0x285   : > { %v7555_v12 = vadd.f32 %v7364_v14, %v1749_v29  ;;  %v2106_v29 = vmul.f32 %v5912_v48, %v6992_v26  ;;  %v2009_v14 = vmul.f32 %v1701_v31, %v6911_v53  ;;  %v10012_v26 = vld [vmem:[#allocation52_spill] sm:$0xff] }
 0x286   : > { %v10017_v53 = vld [vmem:[#allocation60_spill] sm:$0xff] }
 0x288   : > { %2141 = vrot.lane.b32.xlu0 %v2103_v35, %s9980_s17  ;;  %1955 = vrot.lane.b32.xlu1 %v1914_v11, %s9975_s23 }
 0x28c   : > { %2051 = vrot.lane.b32.xlu0 %v2010_v13, %s9978_s0  ;;  %1953 = vrot.lane.b32.xlu1 %v1913_v41, %s9975_s23  ;;  %v2105_v41 = vmul.f32 %v1701_v31, %v6946_v6 }
 0x28d   : > { %v5915_v19 = vpop.f32.mrb[26].mxu0 }
 0x28e   : > { %v1711_v49 = vpop.f32.mrb[27].mxu0  ;;  %v1752_v17 = vmul.f32 %v5915_v19, %v10009_v61  ;;  %v1916_v48 = vmul.f32 %v5915_v19, %v6972_v30  ;;  %v2108_v31 = vmul.f32 %v5915_v19, %v7101_v18  ;;  %v10011_v18 = vld [vmem:[#allocation58_spill] sm:$0xff] }
 0x28f   : > { %v1751_v35 = vmul.f32 %v1711_v49, %v7274_v27 }
 0x290   : > { %v7570_v11 = vadd.f32 %v7366_v3, %v1752_v17  ;;  %2147 = vrot.lane.b32.xlu0 %v2106_v29, %s9980_s17  ;;  %2049 = vrot.lane.b32.xlu1 %v2009_v14, %s9978_s0  ;;  %v7584_v3 = vld [vmem:[%s9676_s9] sm:$0xff]  ;;  %v2012_v29 = vmul.f32 %v5915_v19, %v7021_v54  ;;  %v1915_v14 = vmul.f32 %v1711_v49, %v6962_v20 }
 0x291   : > { %v7575_v13 = vadd.f32 %v7368_v24, %v1751_v35  ;;  %6006 = vmatprep.subr.mxu0 %v7584_v3  ;;  %v2011_v17 = vmul.f32 %v1711_v49, %v9959_v1 }
 0x294   : > { %2145 = vrot.lane.b32.xlu0 %v2105_v41, %s9980_s17  ;;  %1959 = vrot.lane.b32.xlu1 %v1916_v48, %s9975_s23  ;;  %v10010_v41 = vld [vmem:[#allocation55_spill] sm:$0xff] }
 0x298   : > { %2055 = vrot.lane.b32.xlu0 %v2012_v29, %s9978_s0  ;;  %1957 = vrot.lane.b32.xlu1 %v1915_v14, %s9975_s23  ;;  %v2107_v14 = vmul.f32 %v1711_v49, %v9961_v32  ;;  %v10016_v32 = vld [vmem:[#allocation36_spill] sm:$0xff] }
 0x299   : > { %v5918_v24 = vpop.f32.mrb[28].mxu0 }
 0x29a   : > { %v1721_v35 = vpop.f32.mrb[29].mxu0  ;;  %v1754_v48 = vmul.f32 %v5918_v24, %v10010_v41  ;;  %v1918_v19 = vmul.f32 %v5918_v24, %v7075_v37  ;;  %v2014_v1 = vmul.f32 %v5918_v24, %v10011_v18 }
 0x29b   : > { %v1753_v6 = vmul.f32 %v1721_v35, %v7287_v5  ;;  %v2109_v18 = vmul.f32 %v1721_v35, %v10016_v32 }
 0x29c   : > { %v7596_v54 = vadd.f32 %v7370_v10, %v1754_v48  ;;  %2151 = vrot.lane.b32.xlu0 %v2108_v31, %s9980_s17  ;;  %2053 = vrot.lane.b32.xlu1 %v2011_v17, %s9978_s0  ;;  %v1917_v10 = vmul.f32 %v1721_v35, %v10012_v26  ;;  %v10013_v31 = vld [vmem:[#allocation61_spill] sm:$0xff] }
 0x29d   : > { %v7601_v29 = vadd.f32 %v7372_v52, %v1753_v6  ;;  %v2110_v17 = vmul.f32 %v5918_v24, %v10013_v31  ;;  %v10014_v6 = vld [vmem:[#allocation23_spill] sm:$0xff] }
 0x29e   : > { %v2013_v52 = vmul.f32 %v1721_v35, %v10014_v6  ;;  %v10020_v31 = vld [vmem:[#allocation59_spill] sm:$0xff]  ;;  %v10021_v35 = vld [vmem:[#allocation38_spill] sm:$0xff] }
 0x2a0   : > { %2149 = vrot.lane.b32.xlu0 %v2107_v14, %s9980_s17  ;;  %1963 = vrot.lane.b32.xlu1 %v1918_v19, %s9975_s23  ;;  %v10015_v14 = vld [vmem:[#allocation57_spill] sm:$0xff] }
 0x2a4   : > { %2059 = vrot.lane.b32.xlu0 %v2014_v1, %s9978_s0  ;;  %1961 = vrot.lane.b32.xlu1 %v1917_v10, %s9975_s23 }
 0x2a7   : > { %v5921_v48 = vpop.f32.mrb[30].mxu0 }
 0x2a8   : > { %2155 = vrot.lane.b32.xlu0 %v2110_v17, %s9980_s17  ;;  %2057 = vrot.lane.b32.xlu1 %v2013_v52, %s9978_s0  ;;  %v1731_v49 = vpop.f32.mrb[31].mxu0  ;;  %v1756_v19 = vmul.f32 %v5921_v48, %v10015_v14  ;;  %v1920_v16 = vmul.f32 %v5921_v48, %v10017_v53  ;;  %v10019_v17 = vld [vmem:[#allocation62_spill] sm:$0xff]  ;;  %v2112_v32 = vmul.f32 %v5921_v48, %v10021_v35 }
 0x2a9   : > { %v1755_v1 = vmul.f32 %v1731_v49, %v10018_v2  ;;  %v2016_v52 = vmul.f32 %v5921_v48, %v10019_v17  ;;  %v1919_v6 = vmul.f32 %v1731_v49, %v10020_v31 }
 0x2aa   : > { %v7620_v10 = vadd.f32 %v7374_v23, %v1756_v19  ;;  %v2015_v23 = vmul.f32 %v1731_v49, %v10022_v51 }
 0x2ab   : > { %v7623_v24 = vadd.f32 %v7376_v38, %v1755_v1 }
 0x2ac   : > { %2153 = vrot.lane.b32.xlu0 %v2109_v18, %s9980_s17  ;;  %1967 = vrot.lane.b32.xlu1 %v1920_v16, %s9975_s23  ;;  %v3005_v16 = vld [vmem:[%s9677_s10] sm:$0xf]  ;;  %v10023_v18 = vld [vmem:[#allocation63_spill] sm:$0xff] }
 0x2ad   : > { %6032 = vmatprep.subr.msk.mxu1 %vm897_vm0, %v3005_v16  ;;  %v2111_v38 = vmul.f32 %v1731_v49, %v10023_v18 }
 0x2ae   : > { %6033 = vmatpush3.msk.msra.mxu1 %vm897_vm0, %v3005_v16 }
 0x2af   : > { %6035 = vmatmul.mubr.msk.f32.vlgmr.msra.gmra.mrb[48].mxu1 %vm864_vm2, %v7411_v9 }
 0x2b0   : > { %2063 = vrot.lane.b32.xlu0 %v2016_v52, %s9978_s0  ;;  %1965 = vrot.lane.b32.xlu1 %v1919_v6, %s9975_s23 }
 0x2b1   : > { %6037 = vmatprep.mubr.msk.f32.mxu1 %vm864_vm2, %v7417_v33 }
 0x2b3   : > { %6038 = vmatmul.mubr.msk.f32.gmra.mrb[50].mxu1 %vm864_vm2, %v7426_v25 }
 0x2b4   : > { %2159 = vrot.lane.b32.xlu0 %v2112_v32, %s9980_s17  ;;  %2061 = vrot.lane.b32.xlu1 %v2015_v23, %s9978_s0 }
 0x2b5   : > { %6040 = vmatprep.mubr.msk.f32.mxu1 %vm864_vm2, %v7437_v62  ;;  %v10056_v62 = vld [vmem:[#allocation15_spill] sm:$0xff] }
 0x2b7   : > { %6041 = vmatmul.mubr.msk.f32.gmra.mrb[52].mxu1 %vm864_vm2, %v7444_v22 }
 0x2b8   : > { %2157 = vrot.lane.b32.xlu1 %v2111_v38, %s9980_s17  ;;  %6043 = vmatprep.mubr.msk.f32.mxu1 %vm864_vm2, %v7451_v56 }
 0x2bb   : > { %6044 = vmatmul.mubr.msk.f32.gmra.mrb[54].mxu1 %vm864_vm2, %v7458_v60  ;;  %v10043_v60 = vld [vmem:[#allocation5_spill] sm:$0xff] }
 0x2bc   : > { %6046 = vmatprep.mubr.msk.f32.mxu1 %vm864_vm2, %v7465_v42  ;;  %v10042_v42 = vld [vmem:[#allocation7_spill] sm:$0xff] }
 0x2bf   : > { %6047 = vmatmul.mubr.msk.f32.gmra.mrb[56].mxu1 %vm864_vm2, %v7474_v45  ;;  %v10038_v45 = vld [vmem:[#allocation6_spill] sm:$0xff] }
 0x2c0   : > { %6049 = vmatprep.mubr.msk.f32.mxu1 %vm864_vm2, %v7487_v58 }
 0x2c3   : > { %6050 = vmatmul.mubr.msk.f32.gmra.mrb[58].mxu1 %vm864_vm2, %v7494_v28  ;;  %v10037_v28 = vld [vmem:[#allocation65_spill] sm:$0xff] }
 0x2c4   : > { %6052 = vmatprep.mubr.msk.f32.mxu1 %vm864_vm2, %v7501_v47 }
 0x2c7   : > { %6053 = vmatmul.mubr.msk.f32.gmra.mrb[60].mxu1 %vm864_vm2, %v7508_v8 }
 0x2c8   : > { %6055 = vmatprep.mubr.msk.f32.mxu1 %vm864_vm2, %v7515_v40 }
 0x2ca   : > { %v1940_v32 = vpop.permute.xlu0 %1939 }
 0x2cb   : > { %v1938_v6 = vpop.permute.xlu1 %1937  ;;  %v1986_v49 = vadd.f32 %v1940_v32, %v7394_v50  ;;  %6056 = vmatmul.mubr.msk.f32.gmra.mrb[62].mxu1 %vm864_vm2, %v7524_v55  ;;  %v10035_v55 = vld [vmem:[#allocation8_spill] sm:$0xff] }
 0x2cc   : > { %v1985_v52 = vadd.f32 %v1938_v6, %v7397_v36  ;;  %6092 = vmatprep.mubr.msk.f32.mxu1 %vm864_vm2, %v7537_v0 }
 0x2ce   : > { %v2036_v48 = vpop.permute.xlu0 %2035 }
 0x2cf   : > { %v2034_v19 = vpop.permute.xlu1 %2033  ;;  %v2082_v23 = vadd.f32 %v2036_v48, %v1986_v49 }
 0x2d0   : > { %v2081_v16 = vadd.f32 %v2034_v19, %v1985_v52 }
 0x2d2   : > { %v2132_v1 = vpop.permute.xlu0 %2131 }
 0x2d3   : > { %v2178_v38 = vadd.f32 %v2132_v1, %v2082_v23 }
 0x2d5   : > { %v2194_v63 = vmax.f32 %v2178_v38, 0.0 }
 0x2d6   : > { %v2130_v18 = vpop.permute.xlu0 %2129  ;;  %v1944_v35 = vpop.permute.xlu1 %1943 }
 0x2d7   : > { %v2177_v51 = vadd.f32 %v2130_v18, %v2081_v16  ;;  %v1988_v36 = vadd.f32 %v1944_v35, %v7430_v34  ;;  %v10024_v35 = vld [vmem:[#allocation75_spill] sm:$0xff] }
 0x2d9   : > { %v2193_v17 = vmax.f32 %v2177_v51, 0.0 }
 0x2da   : > { %v2040_v40 = vpop.permute.xlu0 %2039  ;;  %v1942_v50 = vpop.permute.xlu1 %1941 }
 0x2db   : > { %5956 = vmatprep.mubr.msk.f32.mxu0 %vm1546_vm3, %v2193_v17  ;;  %v1987_v48 = vadd.f32 %v1942_v50, %v7434_v21  ;;  %v2084_v49 = vadd.f32 %v2040_v40, %v1988_v36 }
 0x2dc   : > { %5957 = vmatmul.mubr.msk.f32.vlgmr.msra.gmra.mrb[32].mxu0 %vm1546_vm3, %v2194_v63 }
 0x2dd   : > { %6007 = vmatpush3.msra.mxu0 %v7584_v3 }
 0x2de   : > { %v2136_v32 = vpop.permute.xlu0 %2135  ;;  %v2038_v6 = vpop.permute.xlu1 %2037 }
 0x2df   : > { %v2083_v19 = vadd.f32 %v2038_v6, %v1987_v48  ;;  %v2180_v1 = vadd.f32 %v2136_v32, %v2084_v49 }
 0x2e1   : > { %v2196_v16 = vmax.f32 %v2180_v1, 0.0 }
 0x2e2   : > { %v2134_v18 = vpop.permute.xlu0 %2133  ;;  %v1948_v51 = vpop.permute.xlu1 %1947 }
 0x2e3   : > { %v2179_v52 = vadd.f32 %v2134_v18, %v2083_v19  ;;  %v1990_v63 = vadd.f32 %v1948_v51, %v7479_v44 }
 0x2e5   : > { %v2195_v23 = vmax.f32 %v2179_v52, 0.0 }
 0x2e6   : > { %v2044_v38 = vpop.permute.xlu0 %2043  ;;  %v1946_v17 = vpop.permute.xlu1 %1945 }
 0x2e7   : > { %5959 = vmatprep.mubr.msk.f32.mxu0 %vm1546_vm3, %v2195_v23  ;;  %v1989_v21 = vadd.f32 %v1946_v17, %v10024_v35  ;;  %v2086_v40 = vadd.f32 %v2044_v38, %v1990_v63 }
 0x2e8   : > { %5960 = vmatmul.mubr.msk.f32.gmra.mrb[34].mxu0 %vm1546_vm3, %v2196_v16 }
 0x2ea   : > { %v2140_v34 = vpop.permute.xlu0 %2139  ;;  %v2042_v3 = vpop.permute.xlu1 %2041 }
 0x2eb   : > { %v2085_v50 = vadd.f32 %v2042_v3, %v1989_v21  ;;  %v2182_v36 = vadd.f32 %v2140_v34, %v2086_v40 }
 0x2ed   : > { %v2198_v19 = vmax.f32 %v2182_v36, 0.0 }
 0x2ee   : > { %v2138_v32 = vpop.permute.xlu0 %2137  ;;  %v1952_v6 = vpop.permute.xlu1 %1951 }
 0x2ef   : > { %v2181_v48 = vadd.f32 %v2138_v32, %v2085_v50  ;;  %v1992_v44 = vadd.f32 %v1952_v6, %v7529_v43 }
 0x2f1   : > { %v2197_v49 = vmax.f32 %v2181_v48, 0.0 }
 0x2f2   : > { %v2048_v1 = vpop.permute.xlu0 %2047  ;;  %v1950_v18 = vpop.permute.xlu1 %1949 }
 0x2f3   : > { %5962 = vmatprep.mubr.msk.f32.mxu0 %vm1546_vm3, %v2197_v49  ;;  %v1991_v23 = vadd.f32 %v1950_v18, %v7534_v39  ;;  %v2088_v16 = vadd.f32 %v2048_v1, %v1992_v44 }
 0x2f4   : > { %5963 = vmatmul.mubr.msk.f32.gmra.mrb[36].mxu0 %vm1546_vm3, %v2198_v19 }
 0x2f6   : > { %v2144_v51 = vpop.permute.xlu0 %2143  ;;  %v2046_v52 = vpop.permute.xlu1 %2045 }
 0x2f7   : > { %v2087_v38 = vadd.f32 %v2046_v52, %v1991_v23  ;;  %v2184_v17 = vadd.f32 %v2144_v51, %v2088_v16 }
 0x2f9   : > { %v2200_v21 = vmax.f32 %v2184_v17, 0.0 }
 0x2fa   : > { %v2142_v63 = vpop.permute.xlu0 %2141  ;;  %v1956_v34 = vpop.permute.xlu1 %1955 }
 0x2fb   : > { %v2183_v3 = vadd.f32 %v2142_v63, %v2087_v38  ;;  %v1994_v43 = vadd.f32 %v1956_v34, %v7550_v59 }
 0x2fd   : > { %v2199_v35 = vmax.f32 %v2183_v3, 0.0 }
 0x2fe   : > { %v2052_v40 = vpop.permute.xlu0 %2051  ;;  %v1954_v50 = vpop.permute.xlu1 %1953 }
 0x2ff   : > { %5965 = vmatprep.mubr.msk.f32.mxu0 %vm1546_vm3, %v2199_v35  ;;  %v1993_v39 = vadd.f32 %v1954_v50, %v7555_v12  ;;  %v2090_v6 = vadd.f32 %v2052_v40, %v1994_v43 }
 0x300   : > { %5966 = vmatmul.mubr.msk.f32.gmra.mrb[38].mxu0 %vm1546_vm3, %v2200_v21 }
 0x302   : > { %v2148_v36 = vpop.permute.xlu0 %2147  ;;  %v2050_v32 = vpop.permute.xlu1 %2049 }
 0x303   : > { %v2089_v48 = vadd.f32 %v2050_v32, %v1993_v39  ;;  %v2186_v49 = vadd.f32 %v2148_v36, %v2090_v6 }
 0x305   : > { %v2202_v51 = vmax.f32 %v2186_v49, 0.0 }
 0x306   : > { %v2146_v19 = vpop.permute.xlu0 %2145  ;;  %v1960_v1 = vpop.permute.xlu1 %1959 }
 0x307   : > { %v2185_v18 = vadd.f32 %v2146_v19, %v2089_v48  ;;  %v1996_v59 = vadd.f32 %v1960_v1, %v7570_v11 }
 0x309   : > { %v2201_v44 = vmax.f32 %v2185_v18, 0.0 }
 0x30a   : > { %v2056_v52 = vpop.permute.xlu0 %2055  ;;  %v1958_v23 = vpop.permute.xlu1 %1957 }
 0x30b   : > { %5968 = vmatprep.mubr.msk.f32.mxu0 %vm1546_vm3, %v2201_v44  ;;  %v1995_v12 = vadd.f32 %v1958_v23, %v7575_v13  ;;  %v2092_v17 = vadd.f32 %v2056_v52, %v1996_v59 }
 0x30c   : > { %5969 = vmatmul.mubr.msk.f32.gmra.mrb[40].mxu0 %vm1546_vm3, %v2202_v51 }
 0x30e   : > { %v2152_v16 = vpop.permute.xlu0 %2151  ;;  %v2054_v38 = vpop.permute.xlu1 %2053 }
 0x30f   : > { %v2091_v63 = vadd.f32 %v2054_v38, %v1995_v12  ;;  %v2188_v34 = vadd.f32 %v2152_v16, %v2092_v17 }
 0x311   : > { %v2204_v50 = vmax.f32 %v2188_v34, 0.0 }
 0x312   : > { %v2150_v3 = vpop.permute.xlu0 %2149  ;;  %v1964_v35 = vpop.permute.xlu1 %1963 }
 0x313   : > { %v2187_v21 = vadd.f32 %v2150_v3, %v2091_v63  ;;  %v1998_v11 = vadd.f32 %v1964_v35, %v7596_v54 }
 0x315   : > { %v2203_v40 = vmax.f32 %v2187_v21, 0.0 }
 0x316   : > { %v2060_v43 = vpop.permute.xlu0 %2059  ;;  %v1962_v36 = vpop.permute.xlu1 %1961 }
 0x317   : > { %5971 = vmatprep.mubr.msk.f32.mxu0 %vm1546_vm3, %v2203_v40  ;;  %v1997_v13 = vadd.f32 %v1962_v36, %v7601_v29  ;;  %v2094_v6 = vadd.f32 %v2060_v43, %v1998_v11  ;;  %v6402_v40 = vld [vmem:[%s6681_s4 + $0x8] sm:$0xff]  ;;  %v6404_v43 = vld [vmem:[%s6681_s4 + $0x18] sm:$0xff]  ;;  %v6405_v36 = vld [vmem:[%s6681_s4 + $0x20] sm:$0xff] }
 0x318   : > { %5972 = vmatmul.mubr.msk.f32.gmra.mrb[42].mxu0 %vm1546_vm3, %v2204_v50  ;;  %v6403_v50 = vld [vmem:[%s6681_s4 + $0x10] sm:$0xff]  ;;  %v6406_v11 = vld [vmem:[%s6681_s4 + $0x28] sm:$0xff] }
 0x31a   : > { %v2156_v32 = vpop.permute.xlu0 %2155  ;;  %v2058_v39 = vpop.permute.xlu1 %2057 }
 0x31b   : > { %v2093_v48 = vadd.f32 %v2058_v39, %v1997_v13  ;;  %v2190_v49 = vadd.f32 %v2156_v32, %v2094_v6  ;;  %v6407_v32 = vld [vmem:[%s6681_s4 + $0x30] sm:$0xff]  ;;  %v6408_v6 = vld [vmem:[%s6681_s4 + $0x38] sm:$0xff] }
 0x31d   : > { %v2206_v51 = vmax.f32 %v2190_v49, 0.0  ;;  %v6410_v49 = vld [vmem:[%s6681_s4 + $0x48] sm:$0xff] }
 0x31e   : > { %v2154_v19 = vpop.permute.xlu0 %2153  ;;  %v1968_v1 = vpop.permute.xlu1 %1967 }
 0x31f   : > { %v2189_v18 = vadd.f32 %v2154_v19, %v2093_v48  ;;  %v2000_v54 = vadd.f32 %v1968_v1, %v7620_v10  ;;  %v6401_v10 = vld [vmem:[%s6681_s4] sm:$0xff]  ;;  %v6411_v19 = vld [vmem:[%s6681_s4 + $0x50] sm:$0xff]  ;;  %v6412_v1 = vld [vmem:[%s6681_s4 + $0x58] sm:$0xff] }
 0x320   : > { %v6409_v48 = vld [vmem:[%s6681_s4 + $0x40] sm:$0xff] }
 0x321   : > { %v2205_v44 = vmax.f32 %v2189_v18, 0.0  ;;  %v6413_v18 = vld [vmem:[%s6681_s4 + $0x60] sm:$0xff] }
 0x322   : > { %v2064_v52 = vpop.permute.xlu0 %2063  ;;  %v1966_v23 = vpop.permute.xlu1 %1965 }
 0x323   : > { %5974 = vmatprep.mubr.msk.f32.mxu0 %vm1546_vm3, %v2205_v44  ;;  %v1999_v29 = vadd.f32 %v1966_v23, %v7623_v24  ;;  %v2096_v38 = vadd.f32 %v2064_v52, %v2000_v54  ;;  %v6414_v52 = vld [vmem:[%s6681_s4 + $0x68] sm:$0xff]  ;;  %v6415_v23 = vld [vmem:[%s6681_s4 + $0x70] sm:$0xff]  ;;  %v6416_v54 = vld [vmem:[%s6681_s4 + $0x78] sm:$0xff]  ;;  %s6519_s4 = smov 124  }
 0x324   : > { %5975 = vmatmul.mubr.msk.f32.gmra.mrb[44].mxu0 %vm1546_vm3, %v2206_v51 }
 0x326   : > { %v2062_v59 = vpop.permute.xlu1 %2061  ;;  %v2160_v16 = vpop.permute.xlu0 %2159 }
 0x327   : > { %v2095_v12 = vadd.f32 %v2062_v59, %v1999_v29  ;;  %v2192_v17 = vadd.f32 %v2160_v16, %v2096_v38 }
 0x329   : > { %v2208_v35 = vmax.f32 %v2192_v17, 0.0 }
 0x32a   : > { %v2158_v63 = vpop.permute.xlu1 %2157 }
 0x32b   : > { %v2191_v34 = vadd.f32 %v2158_v63, %v2095_v12 }
 0x32d   : > { %v2207_v3 = vmax.f32 %v2191_v34, 0.0 }
 0x32e   : > { %v7709_v24 = vpop.f32.mrb[32].mxu1 }
 0x32f   : > { %5977 = vmatprep.mubr.msk.f32.mxu0 %vm1546_vm3, %v2207_v3  ;;  %v7711_v21 = vpop.f32.mrb[33].mxu1 }
 0x330   : > { %5978 = vmatmul.mubr.msk.f32.gmra.mrb[46].mxu0 %vm1546_vm3, %v2208_v35 }
 0x331   : > { %6008 = vmatprep.mubr.msk.f32.mxu0 %vm573_vm1, %v6401_v10 }
 0x332   : > { %v7725_v39 = vpop.f32.mrb[34].mxu1 }
 0x333   : > { %v7727_v13 = vpop.f32.mrb[35].mxu1 }
 0x334   : > { %6009 = vmatmul.mubr.msk.f32.vlgmr.msra.gmra.mrb[48].mxu0 %vm573_vm1, %v6402_v40 }
 0x335   : > { %6011 = vmatprep.mubr.msk.f32.mxu0 %vm573_vm1, %v6403_v50 }
 0x336   : > { %v7741_v44 = vpop.f32.mrb[36].mxu1 }
 0x337   : > { %v7743_v51 = vpop.f32.mrb[37].mxu1 }
 0x338   : > { %6012 = vmatmul.mubr.msk.f32.gmra.mrb[50].mxu0 %vm573_vm1, %v6404_v43 }
 0x339   : > { %6014 = vmatprep.mubr.msk.f32.mxu0 %vm573_vm1, %v6405_v36 }
 0x33a   : > { %v7751_v59 = vpop.f32.mrb[38].mxu1 }
 0x33b   : > { %v7753_v29 = vpop.f32.mrb[39].mxu1 }
 0x33c   : > { %6015 = vmatmul.mubr.msk.f32.gmra.mrb[52].mxu0 %vm573_vm1, %v6406_v11 }
 0x33d   : > { %6017 = vmatprep.mubr.msk.f32.mxu0 %vm573_vm1, %v6407_v32 }
 0x33e   : > { %v7755_v16 = vpop.f32.mrb[40].mxu1 }
 0x33f   : > { %v7757_v38 = vpop.f32.mrb[41].mxu1 }
 0x340   : > { %6018 = vmatmul.mubr.msk.f32.gmra.mrb[54].mxu0 %vm573_vm1, %v6408_v6 }
 0x341   : > { %6020 = vmatprep.mubr.msk.f32.mxu0 %vm573_vm1, %v6409_v48 }
 0x344   : > { %6021 = vmatmul.mubr.msk.f32.gmra.mrb[56].mxu0 %vm573_vm1, %v6410_v49  ;;  %v7759_v12 = vpop.f32.mrb[42].mxu1 }
 0x345   : > { %6023 = vmatprep.mubr.msk.f32.mxu0 %vm573_vm1, %v6411_v19  ;;  %v7761_v17 = vpop.f32.mrb[43].mxu1 }
 0x348   : > { %6024 = vmatmul.mubr.msk.f32.gmra.mrb[58].mxu0 %vm573_vm1, %v6412_v1  ;;  %v7763_v63 = vpop.f32.mrb[44].mxu1 }
 0x349   : > { %6026 = vmatprep.mubr.msk.f32.mxu0 %vm573_vm1, %v6413_v18  ;;  %v7765_v34 = vpop.f32.mrb[45].mxu1 }
 0x34c   : > { %6027 = vmatmul.mubr.msk.f32.gmra.mrb[60].mxu0 %vm573_vm1, %v6414_v52  ;;  %v7767_v3 = vpop.f32.mrb[46].mxu1 }
 0x34d   : > { %6029 = vmatprep.mubr.msk.f32.mxu0 %vm573_vm1, %v6415_v23  ;;  %v7769_v35 = vpop.f32.mrb[47].mxu1 }
 0x350   : > { %6030 = vmatmul.mubr.msk.f32.gmra.mrb[62].mxu0 %vm573_vm1, %v6416_v54 }
 0x382   : > { %v7771_v10 = vpop.f32.mrb[48].mxu1 }
 0x383   : > { %v7773_v40 = vpop.f32.mrb[49].mxu1 }
 0x386   : > { %v7775_v50 = vpop.f32.mrb[50].mxu1 }
 0x387   : > { %v7777_v43 = vpop.f32.mrb[51].mxu1 }
 0x38a   : > { %v7779_v36 = vpop.f32.mrb[52].mxu1 }
 0x38b   : > { %v7781_v11 = vpop.f32.mrb[53].mxu1 }
 0x38e   : > { %v7783_v32 = vpop.f32.mrb[54].mxu1 }
 0x38f   : > { %v7785_v6 = vpop.f32.mrb[55].mxu1 }
 0x390   : > { %10025 = vst [vmem:[#allocation75_spill] sm:$0xff] %v7785_v6  ;;  %v10055_v6 = vld [vmem:[#allocation42_spill] sm:$0xff] }
 0x392   : > { %v7787_v48 = vpop.f32.mrb[56].mxu1 }
 0x393   : > { %10026 = vst [vmem:[#allocation83_spill] sm:$0xff] %v7787_v48  ;;  %v7789_v49 = vpop.f32.mrb[57].mxu1  ;;  %v10053_v48 = vld [vmem:[#allocation17_spill] sm:$0xff] }
 0x394   : > { %10027 = vst [vmem:[#allocation84_spill] sm:$0xff] %v7789_v49 }
 0x396   : > { %v7791_v19 = vpop.f32.mrb[58].mxu1 }
 0x397   : > { %10028 = vst [vmem:[#allocation85_spill] sm:$0xff] %v7791_v19  ;;  %v7793_v1 = vpop.f32.mrb[59].mxu1 }
 0x398   : > { %10029 = vst [vmem:[#allocation86_spill] sm:$0xff] %v7793_v1 }
 0x39a   : > { %v7795_v18 = vpop.f32.mrb[60].mxu1 }
 0x39b   : > { %10030 = vst [vmem:[#allocation87_spill] sm:$0xff] %v7795_v18  ;;  %v7797_v52 = vpop.f32.mrb[61].mxu1  ;;  %v10039_v18 = vld [vmem:[#allocation64_spill] sm:$0xff] }
 0x39c   : > { %10031 = vst [vmem:[#allocation88_spill] sm:$0xff] %v7797_v52 }
 0x39e   : > { %v7799_v23 = vpop.f32.mrb[62].mxu1 }
 0x39f   : > { %10032 = vst [vmem:[#allocation89_spill] sm:$0xff] %v7799_v23  ;;  %v7801_v54 = vpop.f32.mrb[63].mxu1 }
 0x3a0   : > { %10033 = vst [vmem:[#allocation90_spill] sm:$0xff] %v7801_v54 }
 0x3af   : > { %v7803_v0 = vpop.f32.mrb[32].mxu0 }
 0x3b0   : > { %10034 = vst [vmem:[#allocation91_spill] sm:$0xff] %v7803_v0  ;;  %v2572_v8 = vmul.f32 %v7803_v0, %v10035_v55  ;;  %v7807_v47 = vpop.f32.mrb[33].mxu0  ;;  %v2408_v58 = vmul.f32 %v7803_v0, %v10037_v28  ;;  %v2668_v19 = vmul.f32 %v7803_v0, %v10042_v42  ;;  %v10049_v0 = vld [vmem:[#allocation40_spill] sm:$0xff] }
 0x3b1   : > { %10036 = vst [vmem:[#allocation92_spill] sm:$0xff] %v7807_v47  ;;  %v2571_v1 = vmul.f32 %v7807_v47, %v10038_v45  ;;  %v2407_v52 = vmul.f32 %v7807_v47, %v10039_v18  ;;  %v2667_v49 = vmul.f32 %v7807_v47, %v10043_v60 }
 0x3b2   : > { %v7816_v23 = vadd.f32 %v7709_v24, %v2408_v58  ;;  %2605 = vrot.lane.b32.xlu0 %v2572_v8, %s6519_s4  ;;  %v10045_v24 = vld [vmem:[#allocation12_spill] sm:$0xff] }
 0x3b3   : > { %v7820_v54 = vadd.f32 %v7711_v21, %v2407_v52  ;;  %2603 = vrot.lane.b32.xlu1 %v2571_v1, %s6519_s4  ;;  %v10047_v52 = vld [vmem:[#allocation66_spill] sm:$0xff] }
 0x3b4   : > { %10040 = vst [vmem:[#allocation93_spill] sm:$0xff] %v7816_v23 }
 0x3b5   : > { %10041 = vst [vmem:[#allocation94_spill] sm:$0xff] %v7820_v54  ;;  %v10048_v54 = vld [vmem:[#allocation10_spill] sm:$0xff] }
 0x3b6   : > { %2701 = vrot.lane.b32.xlu0 %v2668_v19, %s9820_s16 }
 0x3b7   : > { %2699 = vrot.lane.b32.xlu1 %v2667_v49, %s9820_s16  ;;  %s6522_s16 = smov 116  }
 0x3bb   : > { %v7829_v58 = vpop.f32.mrb[34].mxu0 }
 0x3bc   : > { %10044 = vst [vmem:[#allocation95_spill] sm:$0xff] %v7829_v58  ;;  %v2574_v8 = vmul.f32 %v7829_v58, %v10045_v24  ;;  %v7833_v21 = vpop.f32.mrb[35].mxu0  ;;  %v2410_v1 = vmul.f32 %v7829_v58, %v10047_v52 }
 0x3bd   : > { %10046 = vst [vmem:[#allocation96_spill] sm:$0xff] %v7833_v21  ;;  %v2573_v23 = vmul.f32 %v7833_v21, %v10048_v54  ;;  %v2409_v47 = vmul.f32 %v7833_v21, %v10049_v0 }
 0x3be   : > { %v7842_v19 = vadd.f32 %v7725_v39, %v2410_v1  ;;  %2609 = vrot.lane.b32.xlu0 %v2574_v8, %s6519_s4  ;;  %v10057_v1 = vld [vmem:[#allocation67_spill] sm:$0xff] }
 0x3bf   : > { %v7846_v49 = vadd.f32 %v7727_v13, %v2409_v47  ;;  %2607 = vrot.lane.b32.xlu1 %v2573_v23, %s6519_s4 }
 0x3c0   : > { %10050 = vst [vmem:[#allocation97_spill] sm:$0xff] %v7842_v19 }
 0x3c1   : > { %10051 = vst [vmem:[#allocation98_spill] sm:$0xff] %v7846_v49  ;;  %v10060_v49 = vld [vmem:[#allocation26_spill] sm:$0xff] }
 0x3c7   : > { %v7849_v56 = vpop.f32.mrb[36].mxu0 }
 0x3c8   : > { %10052 = vst [vmem:[#allocation99_spill] sm:$0xff] %v7849_v56  ;;  %v2576_v58 = vmul.f32 %v7849_v56, %v10053_v48  ;;  %v7853_v22 = vpop.f32.mrb[37].mxu0  ;;  %v2412_v21 = vmul.f32 %v7849_v56, %v10055_v6 }
 0x3c9   : > { %10054 = vst [vmem:[#allocation100_spill] sm:$0xff] %v7853_v22  ;;  %v2575_v39 = vmul.f32 %v7853_v22, %v10056_v62  ;;  %v2411_v8 = vmul.f32 %v7853_v22, %v10057_v1  ;;  %v10062_v62 = vld [vmem:[#allocation47_spill] sm:$0xff] }
 0x3ca   : > { %v7862_v47 = vadd.f32 %v7741_v44, %v2412_v21  ;;  %2613 = vrot.lane.b32.xlu0 %v2576_v58, %s6519_s4  ;;  %v10063_v21 = vld [vmem:[#allocation44_spill] sm:$0xff] }
 0x3cb   : > { %v7866_v13 = vadd.f32 %v7743_v51, %v2411_v8  ;;  %2611 = vrot.lane.b32.xlu1 %v2575_v39, %s6519_s4 }
 0x3cc   : > { %10058 = vst [vmem:[#allocation101_spill] sm:$0xff] %v7862_v47 }
 0x3cd   : > { %10059 = vst [vmem:[#allocation102_spill] sm:$0xff] %v7866_v13 }
 0x3d3   : > { %v7869_v23 = vpop.f32.mrb[38].mxu0 }
 0x3d4   : > { %v2578_v19 = vmul.f32 %v7869_v23, %v10060_v49  ;;  %v7873_v56 = vpop.f32.mrb[39].mxu0  ;;  %v2414_v22 = vmul.f32 %v7869_v23, %v10062_v62 }
 0x3d5   : > { %10061 = vst [vmem:[#allocation103_spill] sm:$0xff] %v7873_v56  ;;  %v2577_v44 = vmul.f32 %v7873_v56, %v6921_v57  ;;  %v2413_v58 = vmul.f32 %v7873_v56, %v10063_v21 }
 0x3d6   : > { %v7882_v51 = vadd.f32 %v7751_v59, %v2414_v22  ;;  %2617 = vrot.lane.b32.xlu0 %v2578_v19, %s6519_s4 }
 0x3d7   : > { %v7886_v39 = vadd.f32 %v7753_v29, %v2413_v58  ;;  %2615 = vrot.lane.b32.xlu1 %v2577_v44, %s6519_s4 }
 0x3d8   : > { %10064 = vst [vmem:[#allocation104_spill] sm:$0xff] %v7882_v51 }
 0x3d9   : > { %10065 = vst [vmem:[#allocation105_spill] sm:$0xff] %v7886_v39 }
 0x3df   : > { %v7889_v8 = vpop.f32.mrb[40].mxu0 }
 0x3e0   : > { %v2580_v13 = vmul.f32 %v7889_v8, %v6948_v7  ;;  %v7893_v47 = vpop.f32.mrb[41].mxu0  ;;  %v2416_v56 = vmul.f32 %v7889_v8, %v10008_v46 }
 0x3e1   : > { %v2579_v22 = vmul.f32 %v7893_v47, %v6944_v4  ;;  %v2415_v59 = vmul.f32 %v7893_v47, %v7259_v15 }
 0x3e2   : > { %v7902_v29 = vadd.f32 %v7755_v16, %v2416_v56  ;;  %2621 = vrot.lane.b32.xlu0 %v2580_v13, %s6519_s4 }
 0x3e3   : > { %v7906_v19 = vadd.f32 %v7757_v38, %v2415_v59  ;;  %2619 = vrot.lane.b32.xlu1 %v2579_v22, %s6519_s4 }
 0x3e4   : > { %10066 = vst [vmem:[#allocation106_spill] sm:$0xff] %v7902_v29 }
 0x3e5   : > { %10067 = vst [vmem:[#allocation107_spill] sm:$0xff] %v7906_v19 }
 0x3eb   : > { %v7909_v44 = vpop.f32.mrb[42].mxu0 }
 0x3ec   : > { %v2582_v58 = vmul.f32 %v7909_v44, %v6972_v30  ;;  %v7913_v39 = vpop.f32.mrb[43].mxu0  ;;  %v2418_v51 = vmul.f32 %v7909_v44, %v10009_v61 }
 0x3ed   : > { %v2581_v56 = vmul.f32 %v7913_v39, %v6962_v20  ;;  %v2417_v16 = vmul.f32 %v7913_v39, %v7274_v27 }
 0x3ee   : > { %v7922_v38 = vadd.f32 %v7759_v12, %v2418_v51  ;;  %2625 = vrot.lane.b32.xlu0 %v2582_v58, %s6519_s4 }
 0x3ef   : > { %v7926_v13 = vadd.f32 %v7761_v17, %v2417_v16  ;;  %2623 = vrot.lane.b32.xlu1 %v2581_v56, %s6519_s4 }
 0x3f0   : > { %10068 = vst [vmem:[#allocation108_spill] sm:$0xff] %v7922_v38 }
 0x3f1   : > { %10069 = vst [vmem:[#allocation109_spill] sm:$0xff] %v7926_v13 }
 0x3f7   : > { %v7929_v22 = vpop.f32.mrb[44].mxu0 }
 0x3f8   : > { %10070 = vst [vmem:[#allocation110_spill] sm:$0xff] %v7929_v22  ;;  %v2584_v59 = vmul.f32 %v7929_v22, %v7075_v37  ;;  %v7933_v19 = vpop.f32.mrb[45].mxu0  ;;  %v2420_v29 = vmul.f32 %v7929_v22, %v10010_v41 }
 0x3f9   : > { %10071 = vst [vmem:[#allocation111_spill] sm:$0xff] %v7933_v19  ;;  %v2583_v12 = vmul.f32 %v7933_v19, %v10012_v26  ;;  %v2419_v51 = vmul.f32 %v7933_v19, %v7287_v5 }
 0x3fa   : > { %v7942_v17 = vadd.f32 %v7763_v63, %v2420_v29  ;;  %2629 = vrot.lane.b32.xlu0 %v2584_v59, %s6519_s4  ;;  %v3474_v63 = vld [vmem:[%s9678_s11] sm:$0xff] }
 0x3fb   : > { %v7946_v58 = vadd.f32 %v7765_v34, %v2419_v51  ;;  %2627 = vrot.lane.b32.xlu1 %v2583_v12, %s6519_s4  ;;  %v3475_v34 = vld [vmem:[%s9678_s11 + $0x8] sm:$0xff] }
 0x3fc   : > { %10072 = vst [vmem:[#allocation112_spill] sm:$0xff] %v7942_v17  ;;  %v6190_v51 = vpack.c.bf16 %v3475_v34, %v3474_v63 }
 0x3fd   : > { %10073 = vst [vmem:[#allocation113_spill] sm:$0xff] %v7946_v58 }
 0x3fe   : > { %6191 = vmatprep.subr.bf16.mxu0 %v6190_v51 }
 0x3ff   : > { %6193 = vmatpush3.bf16.msra.mxu0 %v6190_v51 }
 0x403   : > { %v7949_v56 = vpop.f32.mrb[46].mxu0 }
 0x404   : > { %10074 = vst [vmem:[#allocation114_spill] sm:$0xff] %v7949_v56  ;;  %v2586_v16 = vmul.f32 %v7949_v56, %v10017_v53  ;;  %v7953_v13 = vpop.f32.mrb[47].mxu0  ;;  %v2422_v38 = vmul.f32 %v7949_v56, %v10015_v14 }
 0x405   : > { %v2585_v29 = vmul.f32 %v7953_v13, %v10020_v31  ;;  %v2421_v59 = vmul.f32 %v7953_v13, %v10018_v2 }
 0x406   : > { %v7968_v12 = vadd.f32 %v7767_v3, %v2422_v38  ;;  %2633 = vrot.lane.b32.xlu0 %v2586_v16, %s6519_s4  ;;  %v3476_v3 = vld [vmem:[%s9678_s11 + $0x10] sm:$0xff]  ;;  %v3477_v38 = vld [vmem:[%s9678_s11 + $0x18] sm:$0xff] }
 0x407   : > { %v7972_v58 = vadd.f32 %v7769_v35, %v2421_v59  ;;  %v6010_v17 = vpop.f32.mrb[48].mxu0  ;;  %2631 = vrot.lane.b32.xlu1 %v2585_v29, %s6519_s4  ;;  %v6194_v34 = vpack.c.bf16 %v3477_v38, %v3476_v3  ;;  %v10077_v38 = vld [vmem:[#allocation11_spill] sm:$0xff]  ;;  %s8327_s4 = scalar_lea.vmem [#allocation2], %s5411_s25  ;;  %s6525_s25 = smov 125  }
 0x408   : > { %10075 = vst [vmem:[#allocation115_spill] sm:$0xff] %v7968_v12  ;;  %v3171_v56 = vmul.f32 %v6010_v17, %v10035_v55  ;;  %v2926_v19 = vpop.f32.mrb[49].mxu0  ;;  %v3007_v22 = vmul.f32 %v6010_v17, %v10037_v28  ;;  %v3267_v55 = vmul.f32 %v6010_v17, %v10042_v42  ;;  %v10086_v42 = vld [vmem:[#allocation84_spill] sm:$0xff]  ;;  %s5321_s5 = sshll.u32 %s8327_s4, 4  ;;  %s9614_s5 = int_to_ptr.vmem [resolvable:$true] %s5321_s5 }
 0x409   : > { %10076 = vst [vmem:[#allocation116_spill] sm:$0xff] %v7972_v58  ;;  %v3170_v35 = vmul.f32 %v2926_v19, %v10038_v45  ;;  %v3006_v16 = vmul.f32 %v2926_v19, %v10039_v18  ;;  %6195 = vmatprep.subr.bf16.mxu0 %v6194_v34  ;;  %v3266_v51 = vmul.f32 %v2926_v19, %v10043_v60  ;;  %v10104_v18 = vld [vmem:[#allocation90_spill] sm:$0xff] }
 0x40a   : > { %v7986_v63 = vadd.f32 %v7771_v10, %v3007_v22  ;;  %3204 = vrot.lane.b32.xlu0 %v3171_v56, %s9975_s23  ;;  %6197 = vmatpush3.bf16.msra.mxu0 %v6194_v34 }
 0x40b   : > { %v7990_v29 = vadd.f32 %v7773_v40, %v3006_v16  ;;  %v6013_v59 = vpop.f32.mrb[50].mxu0  ;;  %3202 = vrot.lane.b32.xlu1 %v3170_v35, %s9975_s23  ;;  %v3671_v40 = vld [vmem:[%s9679_s12] sm:$0xf]  ;;  %v3363_v35 = vmul.f32 %v6010_v17, %v10077_v38 }
 0x40c   : > { %v2936_v28 = vpop.f32.mrb[51].mxu0  ;;  %v3009_v45 = vmul.f32 %v6013_v59, %v10047_v52  ;;  %6090 = vmatprep.subr.msk.mxu1 %vm897_vm0, %v3671_v40 }
 0x40d   : > { %v3008_v10 = vmul.f32 %v2936_v28, %v10049_v0  ;;  %6091 = vmatpush3.msk.msra.mxu1 %vm897_vm0, %v3671_v40 }
 0x40e   : > { %v7998_v22 = vadd.f32 %v7775_v50, %v3009_v45  ;;  %3300 = vrot.lane.b32.xlu0 %v3267_v55, %s9978_s0  ;;  %v3173_v55 = vmul.f32 %v6013_v59, %v10045_v24  ;;  %6093 = vmatmul.mubr.msk.f32.vlgmr.msra.gmra.mrb[64].mxu1 %vm864_vm2, %v7411_v9 }
 0x40f   : > { %v8005_v56 = vadd.f32 %v7777_v43, %v3008_v10  ;;  %v8007_v3 = vpop.f32.mrb[52].mxu0  ;;  %3298 = vrot.lane.b32.xlu1 %v3266_v51, %s9978_s0  ;;  %6095 = vmatprep.mubr.msk.f32.mxu1 %vm864_vm2, %v7417_v33  ;;  %v10078_v51 = vld [vmem:[#allocation9_spill] sm:$0xff] }
 0x410   : > { %v8012_v16 = vpop.f32.mrb[53].mxu0  ;;  %v3011_v45 = vmul.f32 %v8007_v3, %v10055_v6  ;;  %v3362_v10 = vmul.f32 %v2926_v19, %v10078_v51  ;;  %v10080_v19 = vld [vmem:[#allocation75_spill] sm:$0xff] }
 0x411   : > { %v3010_v50 = vmul.f32 %v8012_v16, %v10057_v1 }
 0x412   : > { %v8023_v43 = vadd.f32 %v7779_v36, %v3011_v45  ;;  %3396 = vrot.lane.b32.xlu0 %v3363_v35, %s9980_s17  ;;  %v3172_v36 = vmul.f32 %v2936_v28, %v10048_v54  ;;  %6096 = vmatmul.mubr.msk.f32.gmra.mrb[66].mxu1 %vm864_vm2, %v7426_v25 }
 0x413   : > { %v8029_v17 = vadd.f32 %v7781_v11, %v3010_v50  ;;  %v8031_v34 = vpop.f32.mrb[54].mxu0  ;;  %3208 = vrot.lane.b32.xlu1 %v3173_v55, %s9975_s23  ;;  %v10079_v11 = vld [vmem:[#allocation46_spill] sm:$0xff]  ;;  %v10081_v50 = vld [vmem:[#allocation13_spill] sm:$0xff] }
 0x414   : > { %v8035_v40 = vpop.f32.mrb[55].mxu0  ;;  %v3013_v9 = vmul.f32 %v8031_v34, %v10062_v62  ;;  %6098 = vmatprep.mubr.msk.f32.mxu1 %vm864_vm2, %v10079_v11  ;;  %v3269_v24 = vmul.f32 %v6013_v59, %v10081_v50  ;;  %v10083_v11 = vld [vmem:[#allocation49_spill] sm:$0xff] }
 0x415   : > { %v3012_v35 = vmul.f32 %v8035_v40, %v10063_v21  ;;  %v10087_v21 = vld [vmem:[#allocation19_spill] sm:$0xff] }
 0x416   : > { %v8045_v33 = vadd.f32 %v7783_v32, %v3013_v9  ;;  %3394 = vrot.lane.b32.xlu0 %v3362_v10, %s9980_s17  ;;  %v10082_v32 = vld [vmem:[#allocation14_spill] sm:$0xff]  ;;  %6099 = vmatmul.mubr.msk.f32.gmra.mrb[68].mxu1 %vm864_vm2, %v10083_v11 }
 0x417   : > { %v8051_v45 = vadd.f32 %v10080_v19, %v3012_v35  ;;  %v8053_v55 = vpop.f32.mrb[56].mxu0  ;;  %3206 = vrot.lane.b32.xlu1 %v3172_v36, %s9975_s23  ;;  %v3268_v9 = vmul.f32 %v2936_v28, %v10082_v32  ;;  %v10084_v35 = vld [vmem:[#allocation83_spill] sm:$0xff] }
 0x418   : > { %v8057_v54 = vpop.f32.mrb[57].mxu0  ;;  %v3015_v25 = vmul.f32 %v8053_v55, %v10008_v46  ;;  %v10085_v36 = vld [vmem:[#allocation71_spill] sm:$0xff] }
 0x419   : > { %v3014_v10 = vmul.f32 %v8057_v54, %v7259_v15  ;;  %6101 = vmatprep.mubr.msk.f32.mxu1 %vm864_vm2, %v10085_v36  ;;  %v3365_v15 = vmul.f32 %v6013_v59, %v10087_v21  ;;  %v10090_v59 = vld [vmem:[#allocation73_spill] sm:$0xff] }
 0x41a   : > { %v8067_v19 = vadd.f32 %v10084_v35, %v3015_v25  ;;  %3304 = vrot.lane.b32.xlu0 %v3269_v24, %s9978_s0  ;;  %v3175_v24 = vmul.f32 %v8007_v3, %v10053_v48  ;;  %v10088_v35 = vld [vmem:[#allocation72_spill] sm:$0xff]  ;;  %v10092_v48 = vld [vmem:[#allocation27_spill] sm:$0xff] }
 0x41b   : > { %v8073_v60 = vadd.f32 %v10086_v42, %v3014_v10  ;;  %v8075_v46 = vpop.f32.mrb[58].mxu0  ;;  %3302 = vrot.lane.b32.xlu1 %v3268_v9, %s9978_s0  ;;  %6102 = vmatmul.mubr.msk.f32.gmra.mrb[70].mxu1 %vm864_vm2, %v10088_v35  ;;  %v10089_v42 = vld [vmem:[#allocation85_spill] sm:$0xff]  ;;  %v10091_v9 = vld [vmem:[#allocation86_spill] sm:$0xff]  ;;  %v10093_v35 = vld [vmem:[#allocation15_spill] sm:$0xff] }
 0x41c   : > { %v8079_v62 = vpop.f32.mrb[59].mxu0  ;;  %v3017_v25 = vmul.f32 %v8075_v46, %v10009_v61  ;;  %6104 = vmatprep.mubr.msk.f32.mxu1 %vm864_vm2, %v10090_v59  ;;  %v10094_v59 = vld [vmem:[#allocation74_spill] sm:$0xff] }
 0x41d   : > { %v3016_v11 = vmul.f32 %v8079_v62, %v7274_v27  ;;  %v3364_v27 = vmul.f32 %v2936_v28, %v10092_v48  ;;  %v10096_v28 = vld [vmem:[#allocation76_spill] sm:$0xff] }
 0x41e   : > { %v8090_v10 = vadd.f32 %v10089_v42, %v3017_v25  ;;  %3400 = vrot.lane.b32.xlu0 %v3365_v15, %s9980_s17  ;;  %v3174_v15 = vmul.f32 %v8012_v16, %v10093_v35  ;;  %v10098_v35 = vld [vmem:[#allocation22_spill] sm:$0xff] }
 0x41f   : > { %v8096_v36 = vadd.f32 %v10091_v9, %v3016_v11  ;;  %v8098_v61 = vpop.f32.mrb[60].mxu0  ;;  %3212 = vrot.lane.b32.xlu1 %v3175_v24, %s9975_s23  ;;  %6105 = vmatmul.mubr.msk.f32.gmra.mrb[72].mxu1 %vm864_vm2, %v10094_v59  ;;  %v10095_v11 = vld [vmem:[#allocation87_spill] sm:$0xff]  ;;  %v10097_v24 = vld [vmem:[#allocation88_spill] sm:$0xff] }
 0x420   : > { %v8102_v1 = vpop.f32.mrb[61].mxu0  ;;  %v3019_v25 = vmul.f32 %v8098_v61, %v10010_v41  ;;  %6107 = vmatprep.mubr.msk.f32.mxu1 %vm864_vm2, %v10096_v28  ;;  %v10099_v59 = vld [vmem:[#allocation16_spill] sm:$0xff] }
 0x421   : > { %v3018_v42 = vmul.f32 %v8102_v1, %v7287_v5  ;;  %v3271_v5 = vmul.f32 %v8007_v3, %v10098_v35 }
 0x422   : > { %v8113_v9 = vadd.f32 %v10095_v11, %v3019_v25  ;;  %3398 = vrot.lane.b32.xlu0 %v3364_v27, %s9980_s17  ;;  %v3270_v27 = vmul.f32 %v8012_v16, %v10099_v59  ;;  %v10100_v11 = vld [vmem:[#allocation77_spill] sm:$0xff] }
 0x423   : > { %v8119_v6 = vadd.f32 %v10097_v24, %v3018_v42  ;;  %v8121_v41 = vpop.f32.mrb[62].mxu0  ;;  %3210 = vrot.lane.b32.xlu1 %v3174_v15, %s9975_s23  ;;  %6108 = vmatmul.mubr.msk.f32.gmra.mrb[74].mxu1 %vm864_vm2, %v10100_v11  ;;  %v10101_v42 = vld [vmem:[#allocation89_spill] sm:$0xff]  ;;  %v10102_v24 = vld [vmem:[#allocation78_spill] sm:$0xff]  ;;  %v10105_v11 = vld [vmem:[#allocation79_spill] sm:$0xff] }
 0x424   : > { %v8126_v0 = vpop.f32.mrb[63].mxu0  ;;  %v3021_v25 = vmul.f32 %v8121_v41, %v10015_v14  ;;  %6110 = vmatprep.mubr.msk.f32.mxu1 %vm864_vm2, %v10102_v24  ;;  %v10103_v14 = vld [vmem:[#allocation28_spill] sm:$0xff] }
 0x425   : > { %v3020_v15 = vmul.f32 %v8126_v0, %v10018_v2  ;;  %v3367_v52 = vmul.f32 %v8007_v3, %v10103_v14  ;;  %v10108_v3 = vld [vmem:[#allocation81_spill] sm:$0xff] }
 0x426   : > { %v8135_v28 = vadd.f32 %v10101_v42, %v3021_v25  ;;  %3308 = vrot.lane.b32.xlu0 %v3271_v5, %s9978_s0  ;;  %v3177_v25 = vmul.f32 %v8031_v34, %v10060_v49  ;;  %v10106_v5 = vld [vmem:[#allocation80_spill] sm:$0xff]  ;;  %v8224_v49 = vpop.permute.xlu0 %2605 }
 0x427   : > { %3306 = vrot.lane.b32.xlu1 %v3270_v27, %s9978_s0  ;;  %v8146_v58 = vadd.f32 %v10104_v18, %v3020_v15  ;;  %6111 = vmatmul.mubr.msk.f32.gmra.mrb[76].mxu1 %vm864_vm2, %v10105_v11  ;;  %v10107_v27 = vld [vmem:[#allocation29_spill] sm:$0xff]  ;;  %v3176_v18 = vmul.f32 %v8035_v40, %v6921_v57  ;;  %v10109_v15 = vld [vmem:[#allocation82_spill] sm:$0xff] }
 0x428   : > { %6113 = vmatprep.mubr.msk.f32.mxu1 %vm864_vm2, %v10106_v5  ;;  %v3366_v42 = vmul.f32 %v8012_v16, %v10107_v27  ;;  %v10112_v16 = vld [vmem:[#allocation37_spill] sm:$0xff] }
 0x429   : > { %v3369_v5 = vmul.f32 %v8031_v34, %v10112_v16 }
 0x42a   : > { %3404 = vrot.lane.b32.xlu0 %v3367_v52, %s9980_s17  ;;  %v10110_v52 = vld [vmem:[#allocation30_spill] sm:$0xff]  ;;  %v8238_v57 = vpop.permute.xlu0 %2701 }
 0x42b   : > { %3216 = vrot.lane.b32.xlu1 %v3177_v25, %s9975_s23  ;;  %6114 = vmatmul.mubr.msk.f32.gmra.mrb[78].mxu1 %vm864_vm2, %v10108_v3  ;;  %v3273_v24 = vmul.f32 %v8031_v34, %v10110_v52  ;;  %v10111_v25 = vld [vmem:[#allocation18_spill] sm:$0xff]  ;;  %10127 = vst [vmem:[#allocation9_spill] sm:$0xff] %v8238_v57 }
 0x42c   : > { %6150 = vmatprep.mubr.msk.f32.mxu1 %vm864_vm2, %v10109_v15  ;;  %v3272_v11 = vmul.f32 %v8035_v40, %v10111_v25  ;;  %v3178_v15 = vmul.f32 %v8057_v54, %v6944_v4  ;;  %v3180_v4 = vmul.f32 %v8079_v62, %v6962_v20  ;;  %v3182_v20 = vmul.f32 %v8102_v1, %v10012_v26 }
 0x42e   : > { %3402 = vrot.lane.b32.xlu0 %v3366_v42, %s9980_s17  ;;  %v3179_v42 = vmul.f32 %v8053_v55, %v6948_v7 }
 0x42f   : > { %3214 = vrot.lane.b32.xlu1 %v3176_v18, %s9975_s23  ;;  %v10113_v18 = vld [vmem:[#allocation31_spill] sm:$0xff] }
 0x430   : > { %v3368_v3 = vmul.f32 %v8035_v40, %v10113_v18 }
 0x432   : > { %3312 = vrot.lane.b32.xlu0 %v3273_v24, %s9978_s0  ;;  %v10114_v24 = vld [vmem:[#allocation39_spill] sm:$0xff] }
 0x433   : > { %3310 = vrot.lane.b32.xlu1 %v3272_v11, %s9978_s0  ;;  %v3275_v34 = vmul.f32 %v8053_v55, %v10114_v24  ;;  %v10115_v11 = vld [vmem:[#allocation20_spill] sm:$0xff] }
 0x434   : > { %v3274_v7 = vmul.f32 %v8057_v54, %v10115_v11 }
 0x436   : > { %3408 = vrot.lane.b32.xlu0 %v3369_v5, %s9980_s17  ;;  %v10116_v5 = vld [vmem:[#allocation45_spill] sm:$0xff] }
 0x437   : > { %3220 = vrot.lane.b32.xlu1 %v3179_v42, %s9975_s23  ;;  %v3371_v40 = vmul.f32 %v8053_v55, %v10116_v5  ;;  %v3181_v42 = vmul.f32 %v8075_v46, %v6972_v30 }
 0x43a   : > { %3406 = vrot.lane.b32.xlu0 %v3368_v3, %s9980_s17  ;;  %v10117_v3 = vld [vmem:[#allocation33_spill] sm:$0xff] }
 0x43b   : > { %3218 = vrot.lane.b32.xlu1 %v3178_v15, %s9975_s23  ;;  %v3370_v15 = vmul.f32 %v8057_v54, %v10117_v3 }
 0x43e   : > { %3316 = vrot.lane.b32.xlu0 %v3275_v34, %s9978_s0  ;;  %v10119_v34 = vld [vmem:[#allocation21_spill] sm:$0xff] }
 0x43f   : > { %3314 = vrot.lane.b32.xlu1 %v3274_v7, %s9978_s0  ;;  %v10118_v7 = vld [vmem:[#allocation48_spill] sm:$0xff]  ;;  %v3276_v30 = vmul.f32 %v8079_v62, %v10119_v34 }
 0x440   : > { %v3277_v55 = vmul.f32 %v8075_v46, %v10118_v7 }
 0x442   : > { %3412 = vrot.lane.b32.xlu0 %v3371_v40, %s9980_s17  ;;  %v10120_v40 = vld [vmem:[#allocation56_spill] sm:$0xff] }
 0x443   : > { %3224 = vrot.lane.b32.xlu1 %v3181_v42, %s9975_s23  ;;  %v3373_v54 = vmul.f32 %v8075_v46, %v10120_v40  ;;  %v3183_v42 = vmul.f32 %v8098_v61, %v7075_v37 }
 0x446   : > { %3410 = vrot.lane.b32.xlu0 %v3370_v15, %s9980_s17 }
 0x447   : > { %3222 = vrot.lane.b32.xlu1 %v3180_v4, %s9975_s23  ;;  %v10121_v4 = vld [vmem:[#allocation35_spill] sm:$0xff] }
 0x448   : > { %v3372_v15 = vmul.f32 %v8079_v62, %v10121_v4  ;;  %v10125_v62 = vld [vmem:[#allocation61_spill] sm:$0xff] }
 0x44a   : > { %3320 = vrot.lane.b32.xlu0 %v3277_v55, %s9978_s0  ;;  %v10123_v55 = vld [vmem:[#allocation23_spill] sm:$0xff] }
 0x44b   : > { %3318 = vrot.lane.b32.xlu1 %v3276_v30, %s9978_s0  ;;  %v10122_v30 = vld [vmem:[#allocation58_spill] sm:$0xff]  ;;  %v3278_v37 = vmul.f32 %v8102_v1, %v10123_v55 }
 0x44c   : > { %v3279_v46 = vmul.f32 %v8098_v61, %v10122_v30 }
 0x44e   : > { %3416 = vrot.lane.b32.xlu0 %v3373_v54, %s9980_s17  ;;  %v8227_v54 = vpop.permute.xlu1 %2603 }
 0x44f   : > { %3228 = vrot.lane.b32.xlu1 %v3183_v42, %s9975_s23  ;;  %10124 = vst [vmem:[#allocation11_spill] sm:$0xff] %v8227_v54  ;;  %v3375_v42 = vmul.f32 %v8098_v61, %v10125_v62 }
 0x452   : > { %3414 = vrot.lane.b32.xlu0 %v3372_v15, %s9980_s17  ;;  %v10126_v15 = vld [vmem:[#allocation36_spill] sm:$0xff]  ;;  %v8242_v2 = vpop.permute.xlu1 %2699 }
 0x453   : > { %3226 = vrot.lane.b32.xlu1 %v3182_v20, %s9975_s23  ;;  %v3185_v20 = vmul.f32 %v8121_v41, %v10017_v53  ;;  %v3374_v26 = vmul.f32 %v8102_v1, %v10126_v15  ;;  %10128 = vst [vmem:[#allocation46_spill] sm:$0xff] %v8242_v2 }
 0x456   : > { %3324 = vrot.lane.b32.xlu0 %v3279_v46, %s9978_s0  ;;  %v3184_v46 = vmul.f32 %v8126_v0, %v10020_v31  ;;  %v8252_v1 = vpop.permute.xlu1 %2607  ;;  %v10133_v31 = vld [vmem:[#allocation38_spill] sm:$0xff] }
 0x457   : > { %3322 = vrot.lane.b32.xlu1 %v3278_v37, %s9978_s0  ;;  %v10129_v37 = vld [vmem:[#allocation62_spill] sm:$0xff]  ;;  %10132 = vst [vmem:[#allocation49_spill] sm:$0xff] %v8252_v1  ;;  %v3377_v12 = vmul.f32 %v8121_v41, %v10133_v31  ;;  %v10137_v1 = vld [vmem:[#allocation95_spill] sm:$0xff] }
 0x458   : > { %v3281_v61 = vmul.f32 %v8121_v41, %v10129_v37 }
 0x45a   : > { %3420 = vrot.lane.b32.xlu0 %v3375_v42, %s9980_s17  ;;  %v8248_v42 = vpop.permute.xlu0 %2609  ;;  %v8262_v57 = vpop.permute.xlu1 %2611 }
 0x45b   : > { %3232 = vrot.lane.b32.xlu1 %v3185_v20, %s9975_s23  ;;  %10130 = vst [vmem:[#allocation75_spill] sm:$0xff] %v8248_v42  ;;  %v10131_v20 = vld [vmem:[#allocation25_spill] sm:$0xff]  ;;  %10136 = vst [vmem:[#allocation71_spill] sm:$0xff] %v8262_v57  ;;  %v2670_v42 = vmul.f32 %v10137_v1, %v10081_v50 }
 0x45c   : > { %v3280_v53 = vmul.f32 %v8126_v0, %v10131_v20 }
 0x45e   : > { %3418 = vrot.lane.b32.xlu0 %v3374_v26, %s9980_s17  ;;  %v8258_v26 = vpop.permute.xlu0 %2613  ;;  %v8272_v41 = vpop.permute.xlu1 %2615 }
 0x45f   : > { %3230 = vrot.lane.b32.xlu1 %v3184_v46, %s9975_s23  ;;  %10134 = vst [vmem:[#allocation83_spill] sm:$0xff] %v8258_v26  ;;  %v10135_v46 = vld [vmem:[#allocation63_spill] sm:$0xff]  ;;  %10139 = vst [vmem:[#allocation84_spill] sm:$0xff] %v8272_v41 }
 0x460   : > { %v3376_v2 = vmul.f32 %v8126_v0, %v10135_v46  ;;  %v10141_v0 = vld [vmem:[#allocation99_spill] sm:$0xff] }
 0x461   : > { %v2672_v57 = vmul.f32 %v10141_v0, %v10098_v35 }
 0x462   : > { %3328 = vrot.lane.b32.xlu0 %v3281_v61, %s9978_s0  ;;  %v8268_v61 = vpop.permute.xlu0 %2617  ;;  %v8282_v50 = vpop.permute.xlu1 %2619 }
 0x463   : > { %3326 = vrot.lane.b32.xlu1 %v3280_v53, %s9978_s0  ;;  %v10138_v53 = vld [vmem:[#allocation96_spill] sm:$0xff]  ;;  %10144 = vst [vmem:[#allocation72_spill] sm:$0xff] %v8282_v50 }
 0x464   : > { %v2669_v54 = vmul.f32 %v10138_v53, %v10082_v32  ;;  %v2674_v32 = vmul.f32 %v7869_v23, %v10110_v52 }
 0x466   : > { %3424 = vrot.lane.b32.xlu0 %v3377_v12, %s9980_s17  ;;  %v8278_v12 = vpop.permute.xlu0 %2621  ;;  %v8292_v35 = vpop.permute.xlu1 %2623 }
 0x467   : > { %3422 = vrot.lane.b32.xlu1 %v3376_v2, %s9980_s17  ;;  %10142 = vst [vmem:[#allocation19_spill] sm:$0xff] %v8278_v12  ;;  %v10143_v2 = vld [vmem:[#allocation100_spill] sm:$0xff]  ;;  %10147 = vst [vmem:[#allocation73_spill] sm:$0xff] %v8292_v35 }
 0x468   : > { %v2671_v26 = vmul.f32 %v10143_v2, %v10099_v59  ;;  %v2676_v59 = vmul.f32 %v7889_v8, %v10114_v24  ;;  %v2677_v24 = vmul.f32 %v7913_v39, %v10119_v34 }
 0x46a   : > { %2705 = vrot.lane.b32.xlu0 %v2670_v42, %s10140_s30  ;;  %v8288_v42 = vpop.permute.xlu0 %2625 }
 0x46b   : > { %2703 = vrot.lane.b32.xlu1 %v2669_v54, %s10140_s30  ;;  %10145 = vst [vmem:[#allocation85_spill] sm:$0xff] %v8288_v42  ;;  %v10146_v54 = vld [vmem:[#allocation103_spill] sm:$0xff] }
 0x46c   : > { %v2673_v41 = vmul.f32 %v10146_v54, %v10111_v25 }
 0x46d   : > { %v8302_v52 = vpop.permute.xlu1 %2627 }
 0x46e   : > { %2709 = vrot.lane.b32.xlu0 %v2672_v57, %s10140_s30  ;;  %v8298_v57 = vpop.permute.xlu0 %2629  ;;  %10149 = vst [vmem:[#allocation27_spill] sm:$0xff] %v8302_v52 }
 0x46f   : > { %2707 = vrot.lane.b32.xlu1 %v2671_v26, %s10140_s30  ;;  %10148 = vst [vmem:[#allocation86_spill] sm:$0xff] %v8298_v57  ;;  %v2675_v26 = vmul.f32 %v7893_v47, %v10115_v11  ;;  %v10152_v11 = vld [vmem:[#allocation110_spill] sm:$0xff] }
 0x470   : > { %v2680_v52 = vmul.f32 %v10152_v11, %v10122_v30 }
 0x472   : > { %2713 = vrot.lane.b32.xlu0 %v2674_v32, %s10140_s30  ;;  %v2678_v32 = vmul.f32 %v7909_v44, %v10118_v7  ;;  %v10154_v7 = vld [vmem:[#allocation114_spill] sm:$0xff] }
 0x473   : > { %2711 = vrot.lane.b32.xlu1 %v2673_v41, %s10140_s30 }
 0x476   : > { %2717 = vrot.lane.b32.xlu0 %v2676_v59, %s10140_s30 }
 0x477   : > { %2715 = vrot.lane.b32.xlu1 %v2675_v26, %s10140_s30  ;;  %v10153_v26 = vld [vmem:[#allocation111_spill] sm:$0xff] }
 0x478   : > { %v8308_v41 = vpop.permute.xlu0 %2633  ;;  %v2679_v57 = vmul.f32 %v10153_v26, %v10123_v55 }
 0x479   : > { %10150 = vst [vmem:[#allocation74_spill] sm:$0xff] %v8308_v41  ;;  %v8312_v25 = vpop.permute.xlu1 %2631  ;;  %v10156_v41 = vld [vmem:[#allocation92_spill] sm:$0xff] }
 0x47a   : > { %10151 = vst [vmem:[#allocation87_spill] sm:$0xff] %v8312_v25  ;;  %2721 = vrot.lane.b32.xlu0 %v2678_v32, %s10140_s30  ;;  %v2682_v32 = vmul.f32 %v10154_v7, %v10129_v37  ;;  %v10155_v37 = vld [vmem:[#allocation91_spill] sm:$0xff]  ;;  %v2763_v42 = vmul.f32 %v10156_v41, %v10078_v51 }
 0x47b   : > { %2719 = vrot.lane.b32.xlu1 %v2677_v24, %s10140_s30  ;;  %v2681_v24 = vmul.f32 %v7953_v13, %v10131_v20  ;;  %v2764_v30 = vmul.f32 %v10155_v37, %v10077_v38 }
 0x47c   : > { %v3205_v59 = vpop.permute.xlu0 %3204 }
 0x47d   : > { %v3203_v35 = vpop.permute.xlu1 %3202  ;;  %v3251_v55 = vadd.f32 %v3205_v59, %v7986_v63  ;;  %v2765_v63 = vmul.f32 %v10138_v53, %v10092_v48  ;;  %v2769_v53 = vmul.f32 %v10146_v54, %v10113_v18  ;;  %v2774_v54 = vmul.f32 %v7909_v44, %v10120_v40 }
 0x47e   : > { %2725 = vrot.lane.b32.xlu0 %v2680_v52, %s10140_s30  ;;  %v6521_v52 = vmov 0.0   ;;  %v3250_v50 = vadd.f32 %v3203_v35, %v7990_v29 }
 0x47f   : > { %2723 = vrot.lane.b32.xlu1 %v2679_v57, %s10140_s30  ;;  %5160 = vst [vmem:[%s8327_s4] sm:$0xff] %v6521_v52  ;;  %5161 = vst [vmem:[%s8327_s4 + $0x8] sm:$0xff] %v6521_v52 }
 0x480   : > { %v3301_v34 = vpop.permute.xlu0 %3300  ;;  %5162 = vst [vmem:[%s8327_s4 + $0x10] sm:$0xff] %v6521_v52  ;;  %5163 = vst [vmem:[%s8327_s4 + $0x18] sm:$0xff] %v6521_v52 }
 0x481   : > { %5164 = vst [vmem:[%s8327_s4 + $0x20] sm:$0xff] %v6521_v52  ;;  %5165 = vst [vmem:[%s8327_s4 + $0x28] sm:$0xff] %v6521_v52  ;;  %v3299_v57 = vpop.permute.xlu1 %3298  ;;  %v3347_v12 = vadd.f32 %v3301_v34, %v3251_v55  ;;  %v2770_v55 = vmul.f32 %v7869_v23, %v10112_v16 }
 0x482   : > { %5166 = vst [vmem:[%s8327_s4 + $0x30] sm:$0xff] %v6521_v52  ;;  %5167 = vst [vmem:[%s8327_s4 + $0x38] sm:$0xff] %v6521_v52  ;;  %2729 = vrot.lane.b32.xlu0 %v2682_v32, %s10140_s30  ;;  %v3346_v20 = vadd.f32 %v3299_v57, %v3250_v50  ;;  %v2766_v32 = vmul.f32 %v10137_v1, %v10087_v21  ;;  %v2768_v50 = vmul.f32 %v10141_v0, %v10103_v14 }
 0x483   : > { %5168 = vst [vmem:[%s8327_s4 + $0x40] sm:$0xff] %v6521_v52  ;;  %5169 = vst [vmem:[%s8327_s4 + $0x48] sm:$0xff] %v6521_v52  ;;  %2727 = vrot.lane.b32.xlu1 %v2681_v24, %s10140_s30  ;;  %v2772_v57 = vmul.f32 %v7889_v8, %v10116_v5  ;;  %v2773_v8 = vmul.f32 %v7913_v39, %v10121_v4  ;;  %s6524_s30 = smov 126  }
 0x484   : > { %5170 = vst [vmem:[%s8327_s4 + $0x50] sm:$0xff] %v6521_v52  ;;  %5171 = vst [vmem:[%s8327_s4 + $0x58] sm:$0xff] %v6521_v52  ;;  %v3397_v25 = vpop.permute.xlu0 %3396 }
 0x485   : > { %5172 = vst [vmem:[%s8327_s4 + $0x60] sm:$0xff] %v6521_v52  ;;  %5173 = vst [vmem:[%s8327_s4 + $0x68] sm:$0xff] %v6521_v52  ;;  %v3443_v37 = vadd.f32 %v3397_v25, %v3347_v12 }
 0x486   : > { %5174 = vst [vmem:[%s8327_s4 + $0x70] sm:$0xff] %v6521_v52  ;;  %5175 = vst [vmem:[%s8327_s4 + $0x78] sm:$0xff] %v6521_v52  ;;  %v3209_v52 = vpop.permute.xlu1 %3208  ;;  %2797 = vrot.lane.b32.xlu0 %v2764_v30, %s6522_s16  ;;  %v2767_v30 = vmul.f32 %v10143_v2, %v10107_v27 }
 0x487   : > { %2795 = vrot.lane.b32.xlu1 %v2763_v42, %s6522_s16  ;;  %v3459_v35 = vmax.f32 %v3443_v37, 0.0 }
 0x488   : > { %v3395_v24 = vpop.permute.xlu0 %3394 }
 0x489   : > { %v3442_v59 = vadd.f32 %v3395_v24, %v3346_v20  ;;  %v3253_v20 = vadd.f32 %v3209_v52, %v7998_v22  ;;  %v2771_v22 = vmul.f32 %v7893_v47, %v10117_v3  ;;  %v2776_v47 = vmul.f32 %v10152_v11, %v10125_v62 }
 0x48a   : > { %v3207_v41 = vpop.permute.xlu1 %3206  ;;  %2801 = vrot.lane.b32.xlu0 %v2766_v32, %s6522_s16 }
 0x48b   : > { %v3458_v29 = vmax.f32 %v3442_v59, 0.0  ;;  %2799 = vrot.lane.b32.xlu1 %v2765_v63, %s6522_s16  ;;  %v3252_v0 = vadd.f32 %v3207_v41, %v8005_v56 }
 0x48c   : > { %v3305_v34 = vpop.permute.xlu0 %3304 }
 0x48d   : > { %6066 = vmatprep.mubr.msk.f32.mxu0 %vm1546_vm3, %v3458_v29  ;;  %v3349_v2 = vadd.f32 %v3305_v34, %v3253_v20  ;;  %v2775_v29 = vmul.f32 %v10153_v26, %v10126_v15 }
 0x48e   : > { %v3303_v25 = vpop.permute.xlu1 %3302  ;;  %2805 = vrot.lane.b32.xlu0 %v2768_v50, %s6522_s16  ;;  %6067 = vmatmul.mubr.msk.f32.vlgmr.msra.gmra.mrb[64].mxu0 %vm1546_vm3, %v3459_v35 }
 0x48f   : > { %2803 = vrot.lane.b32.xlu1 %v2767_v30, %s6522_s16  ;;  %v3348_v42 = vadd.f32 %v3303_v25, %v3252_v0  ;;  %v2778_v30 = vmul.f32 %v10154_v7, %v10133_v31 }
 0x490   : > { %v3401_v1 = vpop.permute.xlu0 %3400 }
 0x491   : > { %v3445_v32 = vadd.f32 %v3401_v1, %v3349_v2 }
 0x492   : > { %v3213_v12 = vpop.permute.xlu1 %3212  ;;  %2809 = vrot.lane.b32.xlu0 %v2770_v55, %s6522_s16 }
 0x493   : > { %2807 = vrot.lane.b32.xlu1 %v2769_v53, %s6522_s16  ;;  %v3461_v24 = vmax.f32 %v3445_v32, 0.0  ;;  %v3255_v41 = vadd.f32 %v3213_v12, %v8023_v43  ;;  %v2777_v43 = vmul.f32 %v7953_v13, %v10135_v46 }
 0x494   : > { %v3399_v23 = vpop.permute.xlu0 %3398 }
 0x495   : > { %v3444_v52 = vadd.f32 %v3399_v23, %v3348_v42 }
 0x496   : > { %v3211_v37 = vpop.permute.xlu1 %3210  ;;  %2813 = vrot.lane.b32.xlu0 %v2772_v57, %s6522_s16 }
 0x497   : > { %v3460_v56 = vmax.f32 %v3444_v52, 0.0  ;;  %2811 = vrot.lane.b32.xlu1 %v2771_v22, %s6522_s16  ;;  %v3254_v39 = vadd.f32 %v3211_v37, %v8029_v17 }
 0x498   : > { %v3309_v63 = vpop.permute.xlu0 %3308 }
 0x499   : > { %6069 = vmatprep.mubr.msk.f32.mxu0 %vm1546_vm3, %v3460_v56  ;;  %v3351_v35 = vadd.f32 %v3309_v63, %v3255_v41 }
 0x49a   : > { %v3307_v59 = vpop.permute.xlu1 %3306  ;;  %2817 = vrot.lane.b32.xlu0 %v2774_v54, %s6522_s16  ;;  %6070 = vmatmul.mubr.msk.f32.gmra.mrb[66].mxu0 %vm1546_vm3, %v3461_v24 }
 0x49b   : > { %2815 = vrot.lane.b32.xlu1 %v2773_v8, %s6522_s16  ;;  %v3350_v34 = vadd.f32 %v3307_v59, %v3254_v39 }
 0x49c   : > { %v3405_v44 = vpop.permute.xlu0 %3404 }
 0x49d   : > { %v3447_v25 = vadd.f32 %v3405_v44, %v3351_v35 }
 0x49e   : > { %v3217_v50 = vpop.permute.xlu1 %3216  ;;  %2821 = vrot.lane.b32.xlu0 %v2776_v47, %s6522_s16 }
 0x49f   : > { %2819 = vrot.lane.b32.xlu1 %v2775_v29, %s6522_s16  ;;  %v3463_v26 = vmax.f32 %v3447_v25, 0.0  ;;  %v3257_v7 = vadd.f32 %v3217_v50, %v8045_v33 }
 0x4a0   : > { %v3403_v11 = vpop.permute.xlu0 %3402 }
 0x4a1   : > { %v3446_v55 = vadd.f32 %v3403_v11, %v3350_v34 }
 0x4a2   : > { %v3215_v20 = vpop.permute.xlu1 %3214  ;;  %2825 = vrot.lane.b32.xlu0 %v2778_v30, %s6522_s16 }
 0x4a3   : > { %v3462_v17 = vmax.f32 %v3446_v55, 0.0  ;;  %2823 = vrot.lane.b32.xlu1 %v2777_v43, %s6522_s16  ;;  %v3256_v12 = vadd.f32 %v3215_v20, %v8051_v45 }
 0x4a4   : > { %v3313_v1 = vpop.permute.xlu0 %3312 }
 0x4a5   : > { %6072 = vmatprep.mubr.msk.f32.mxu0 %vm1546_vm3, %v3462_v17  ;;  %v3353_v2 = vadd.f32 %v3313_v1, %v3257_v7 }
 0x4a6   : > { %v3311_v53 = vpop.permute.xlu1 %3310  ;;  %6073 = vmatmul.mubr.msk.f32.gmra.mrb[68].mxu0 %vm1546_vm3, %v3463_v26 }
 0x4a7   : > { %v3352_v42 = vadd.f32 %v3311_v53, %v3256_v12 }
 0x4a8   : > { %v3409_v0 = vpop.permute.xlu0 %3408 }
 0x4a9   : > { %v3449_v57 = vadd.f32 %v3409_v0, %v3353_v2 }
 0x4aa   : > { %v3221_v13 = vpop.permute.xlu1 %3220 }
 0x4ab   : > { %v3465_v37 = vmax.f32 %v3449_v57, 0.0  ;;  %v3259_v33 = vadd.f32 %v3221_v13, %v8067_v19 }
 0x4ac   : > { %v3407_v32 = vpop.permute.xlu0 %3406 }
 0x4ad   : > { %v3448_v23 = vadd.f32 %v3407_v32, %v3352_v42 }
 0x4ae   : > { %v3219_v22 = vpop.permute.xlu1 %3218 }
 0x4af   : > { %v3464_v52 = vmax.f32 %v3448_v23, 0.0  ;;  %v3258_v45 = vadd.f32 %v3219_v22, %v8073_v60 }
 0x4b0   : > { %v3317_v56 = vpop.permute.xlu0 %3316 }
 0x4b1   : > { %6075 = vmatprep.mubr.msk.f32.mxu0 %vm1546_vm3, %v3464_v52  ;;  %v3355_v8 = vadd.f32 %v3317_v56, %v3259_v33 }
 0x4b2   : > { %v3315_v54 = vpop.permute.xlu1 %3314  ;;  %6076 = vmatmul.mubr.msk.f32.gmra.mrb[70].mxu0 %vm1546_vm3, %v3465_v37 }
 0x4b3   : > { %v3354_v59 = vadd.f32 %v3315_v54, %v3258_v45 }
 0x4b4   : > { %v3413_v24 = vpop.permute.xlu0 %3412 }
 0x4b5   : > { %v3451_v47 = vadd.f32 %v3413_v24, %v3355_v8 }
 0x4b6   : > { %v3225_v63 = vpop.permute.xlu1 %3224 }
 0x4b7   : > { %v3467_v50 = vmax.f32 %v3451_v47, 0.0  ;;  %v3261_v19 = vadd.f32 %v3225_v63, %v8090_v10 }
 0x4b8   : > { %v3411_v41 = vpop.permute.xlu0 %3410 }
 0x4b9   : > { %v3450_v44 = vadd.f32 %v3411_v41, %v3354_v59 }
 0x4ba   : > { %v3223_v29 = vpop.permute.xlu1 %3222 }
 0x4bb   : > { %v3466_v39 = vmax.f32 %v3450_v44, 0.0  ;;  %v3260_v60 = vadd.f32 %v3223_v29, %v8096_v36 }
 0x4bc   : > { %v3321_v35 = vpop.permute.xlu0 %3320 }
 0x4bd   : > { %6078 = vmatprep.mubr.msk.f32.mxu0 %vm1546_vm3, %v3466_v39  ;;  %v3357_v11 = vadd.f32 %v3321_v35, %v3261_v19 }
 0x4be   : > { %v3319_v34 = vpop.permute.xlu1 %3318  ;;  %6079 = vmatmul.mubr.msk.f32.gmra.mrb[72].mxu0 %vm1546_vm3, %v3467_v50 }
 0x4bf   : > { %v3356_v43 = vadd.f32 %v3319_v34, %v3260_v60 }
 0x4c0   : > { %v3417_v30 = vpop.permute.xlu0 %3416 }
 0x4c1   : > { %v3453_v55 = vadd.f32 %v3417_v30, %v3357_v11 }
 0x4c2   : > { %v3229_v25 = vpop.permute.xlu1 %3228 }
 0x4c3   : > { %v3469_v53 = vmax.f32 %v3453_v55, 0.0  ;;  %v3263_v10 = vadd.f32 %v3229_v25, %v8113_v9 }
 0x4c4   : > { %v3415_v20 = vpop.permute.xlu0 %3414 }
 0x4c5   : > { %v3452_v17 = vadd.f32 %v3415_v20, %v3356_v43 }
 0x4c6   : > { %v3227_v26 = vpop.permute.xlu1 %3226 }
 0x4c7   : > { %v3468_v1 = vmax.f32 %v3452_v17, 0.0  ;;  %v3262_v36 = vadd.f32 %v3227_v26, %v8119_v6  ;;  %v10157_v26 = vld [vmem:[#allocation93_spill] sm:$0xff] }
 0x4c8   : > { %v3325_v7 = vpop.permute.xlu0 %3324 }
 0x4c9   : > { %6081 = vmatprep.mubr.msk.f32.mxu0 %vm1546_vm3, %v3468_v1  ;;  %v3359_v2 = vadd.f32 %v3325_v7, %v3263_v10  ;;  %v2652_v1 = vadd.f32 %v8224_v49, %v10157_v26  ;;  %v10158_v7 = vld [vmem:[#allocation94_spill] sm:$0xff] }
 0x4ca   : > { %v3323_v0 = vpop.permute.xlu1 %3322  ;;  %6082 = vmatmul.mubr.msk.f32.gmra.mrb[74].mxu0 %vm1546_vm3, %v3469_v53 }
 0x4cb   : > { %v3358_v42 = vadd.f32 %v3323_v0, %v3262_v36  ;;  %v10159_v0 = vld [vmem:[#allocation11_spill] sm:$0xff] }
 0x4cc   : > { %v3421_v12 = vpop.permute.xlu0 %3420  ;;  %v2651_v10 = vadd.f32 %v10159_v0, %v10158_v7 }
 0x4cd   : > { %v3455_v57 = vadd.f32 %v3421_v12, %v3359_v2  ;;  %v10160_v12 = vld [vmem:[#allocation9_spill] sm:$0xff] }
 0x4ce   : > { %v3233_v13 = vpop.permute.xlu1 %3232  ;;  %v2748_v36 = vadd.f32 %v10160_v12, %v2652_v1  ;;  %v10168_v1 = vld [vmem:[#allocation102_spill] sm:$0xff] }
 0x4cf   : > { %v3471_v37 = vmax.f32 %v3455_v57, 0.0  ;;  %v3265_v54 = vadd.f32 %v3233_v13, %v8135_v28  ;;  %v10161_v13 = vld [vmem:[#allocation46_spill] sm:$0xff]  ;;  %v10162_v57 = vld [vmem:[#allocation97_spill] sm:$0xff] }
 0x4d0   : > { %v3419_v32 = vpop.permute.xlu0 %3418  ;;  %v2747_v2 = vadd.f32 %v10161_v13, %v2651_v10 }
 0x4d1   : > { %v3454_v23 = vadd.f32 %v3419_v32, %v3358_v42  ;;  %v10163_v32 = vld [vmem:[#allocation75_spill] sm:$0xff] }
 0x4d2   : > { %v3231_v22 = vpop.permute.xlu1 %3230 }
 0x4d3   : > { %v3470_v52 = vmax.f32 %v3454_v23, 0.0  ;;  %v3264_v9 = vadd.f32 %v3231_v22, %v8146_v58  ;;  %v2654_v23 = vadd.f32 %v10163_v32, %v10162_v57 }
 0x4d4   : > { %v3329_v56 = vpop.permute.xlu0 %3328 }
 0x4d5   : > { %6084 = vmatprep.mubr.msk.f32.mxu0 %vm1546_vm3, %v3470_v52  ;;  %v3361_v6 = vadd.f32 %v3329_v56, %v3265_v54  ;;  %v10165_v56 = vld [vmem:[#allocation49_spill] sm:$0xff] }
 0x4d6   : > { %v3327_v33 = vpop.permute.xlu1 %3326  ;;  %6085 = vmatmul.mubr.msk.f32.gmra.mrb[76].mxu0 %vm1546_vm3, %v3471_v37  ;;  %v10164_v37 = vld [vmem:[#allocation98_spill] sm:$0xff] }
 0x4d7   : > { %v3360_v24 = vadd.f32 %v3327_v33, %v3264_v9  ;;  %v2653_v49 = vadd.f32 %v10165_v56, %v10164_v37 }
 0x4d8   : > { %v3425_v45 = vpop.permute.xlu0 %3424 }
 0x4d9   : > { %v3457_v63 = vadd.f32 %v3425_v45, %v3361_v6 }
 0x4da   : > { %v3423_v8 = vpop.permute.xlu1 %3422 }
 0x4db   : > { %v3456_v59 = vadd.f32 %v3423_v8, %v3360_v24  ;;  %v3473_v44 = vmax.f32 %v3457_v63, 0.0 }
 0x4dc   : > { %v2706_v41 = vpop.permute.xlu0 %2705 }
 0x4dd   : > { %v3472_v47 = vmax.f32 %v3456_v59, 0.0  ;;  %v2750_v33 = vadd.f32 %v2706_v41, %v2654_v23  ;;  %v10166_v59 = vld [vmem:[#allocation101_spill] sm:$0xff] }
 0x4de   : > { %v2704_v29 = vpop.permute.xlu1 %2703  ;;  %v10171_v23 = vld [vmem:[#allocation105_spill] sm:$0xff] }
 0x4df   : > { %6087 = vmatprep.mubr.msk.f32.mxu0 %vm1546_vm3, %v3472_v47  ;;  %v2749_v24 = vadd.f32 %v2704_v29, %v2653_v49  ;;  %v10167_v47 = vld [vmem:[#allocation83_spill] sm:$0xff] }
 0x4e0   : > { %6088 = vmatmul.mubr.msk.f32.gmra.mrb[78].mxu0 %vm1546_vm3, %v3473_v44  ;;  %v2710_v28 = vpop.permute.xlu0 %2709  ;;  %v2656_v41 = vadd.f32 %v10167_v47, %v10166_v59  ;;  %v10169_v29 = vld [vmem:[#allocation71_spill] sm:$0xff] }
 0x4e1   : > { %v8429_v58 = vpop.f32.mrb[64].mxu1  ;;  %v2655_v7 = vadd.f32 %v10169_v29, %v10168_v1  ;;  %v10175_v47 = vld [vmem:[#allocation107_spill] sm:$0xff] }
 0x4e2   : > { %v2708_v39 = vpop.permute.xlu1 %2707  ;;  %v8431_v34 = vpop.f32.mrb[65].mxu1  ;;  %v2752_v10 = vadd.f32 %v2710_v28, %v2656_v41  ;;  %v10176_v41 = vld [vmem:[#allocation72_spill] sm:$0xff] }
 0x4e4   : > { %v2714_v50 = vpop.permute.xlu0 %2713 }
 0x4e5   : > { %v8441_v11 = vpop.f32.mrb[66].mxu1 }
 0x4e6   : > { %v2712_v35 = vpop.permute.xlu1 %2711  ;;  %v8445_v55 = vpop.f32.mrb[67].mxu1 }
 0x4e8   : > { %v8433_v19 = vpop.permute.xlu0 %2717 }
 0x4e9   : > { %v8469_v6 = vpop.f32.mrb[68].mxu1 }
 0x4ea   : > { %v8435_v30 = vpop.permute.xlu1 %2715  ;;  %v8476_v8 = vpop.f32.mrb[69].mxu1 }
 0x4ec   : > { %v8437_v60 = vpop.permute.xlu0 %2721 }
 0x4ee   : > { %v8439_v25 = vpop.permute.xlu1 %2719 }
 0x4f0   : > { %v8443_v43 = vpop.permute.xlu0 %2725 }
 0x4f2   : > { %v8447_v20 = vpop.permute.xlu1 %2723 }
 0x4f4   : > { %v8449_v17 = vpop.permute.xlu0 %2729 }
 0x4f6   : > { %v8453_v53 = vpop.permute.xlu1 %2727 }
 0x4f8   : > { %v2798_v42 = vpop.permute.xlu0 %2797 }
 0x4f9   : > { %v8461_v22 = vadd.f32 %v2798_v42, %v2748_v36  ;;  %v2751_v36 = vadd.f32 %v2708_v39, %v2655_v7  ;;  %v10170_v42 = vld [vmem:[#allocation104_spill] sm:$0xff]  ;;  %v8528_v7 = vpop.f32.mrb[70].mxu1 }
 0x4fa   : > { %v2796_v52 = vpop.permute.xlu1 %2795  ;;  %v2658_v57 = vadd.f32 %v8268_v61, %v10170_v42 }
 0x4fb   : > { %v8465_v54 = vadd.f32 %v2796_v52, %v2747_v2  ;;  %v4713_v9 = vsel %vm864_vm2, %v8461_v22, -inf  ;;  %5177 = vst.msk [vmem:[%s8327_s4 + $0x8] sm:$0xff] %vm864_vm2, %v8461_v22  ;;  %v10172_v52 = vld [vmem:[#allocation84_spill] sm:$0xff] }
 0x4fc   : > { %4714 = vmax.xlane.f32.xlu0 %v4713_v9  ;;  %v2802_v45 = vpop.permute.xlu0 %2801  ;;  %v2657_v37 = vadd.f32 %v10172_v52, %v10171_v23  ;;  %v2754_v56 = vadd.f32 %v2714_v50, %v2658_v57  ;;  %v10179_v23 = vld [vmem:[#allocation109_spill] sm:$0xff] }
 0x4fd   : > { %v4710_v63 = vsel %vm864_vm2, %v8465_v54, -inf  ;;  %5176 = vst.msk [vmem:[%s8327_s4] sm:$0xff] %vm864_vm2, %v8465_v54  ;;  %v8483_v44 = vadd.f32 %v2802_v45, %v2750_v33  ;;  %v10174_v45 = vld [vmem:[#allocation19_spill] sm:$0xff] }
 0x4fe   : > { %4711 = vmax.xlane.f32.xlu1 %v4710_v63  ;;  %v2800_v26 = vpop.permute.xlu1 %2799  ;;  %v2753_v33 = vadd.f32 %v2712_v35, %v2657_v37 }
 0x4ff   : > { %v8487_v0 = vadd.f32 %v2800_v26, %v2749_v24  ;;  %v4719_v12 = vsel %vm864_vm2, %v8483_v44, -inf  ;;  %5179 = vst.msk [vmem:[%s8327_s4 + $0x18] sm:$0xff] %vm864_vm2, %v8483_v44  ;;  %v10173_v24 = vld [vmem:[#allocation106_spill] sm:$0xff]  ;;  %v2659_v26 = vadd.f32 %v10176_v41, %v10175_v47  ;;  %v10183_v47 = vld [vmem:[#allocation113_spill] sm:$0xff]  ;;  %v10184_v41 = vld [vmem:[#allocation27_spill] sm:$0xff] }
 0x500   : > { %v2806_v13 = vpop.permute.xlu0 %2805  ;;  %v2660_v63 = vadd.f32 %v10174_v45, %v10173_v24  ;;  %v10181_v24 = vld [vmem:[#allocation112_spill] sm:$0xff]  ;;  %v10182_v45 = vld [vmem:[#allocation86_spill] sm:$0xff] }
 0x501   : > { %v4716_v2 = vsel %vm864_vm2, %v8487_v0, -inf  ;;  %5178 = vst.msk [vmem:[%s8327_s4 + $0x10] sm:$0xff] %vm864_vm2, %v8487_v0  ;;  %v8501_v28 = vadd.f32 %v2806_v13, %v2752_v10  ;;  %v2755_v10 = vadd.f32 %v8435_v30, %v2659_v26  ;;  %v8536_v13 = vpop.f32.mrb[71].mxu1  ;;  %v10180_v30 = vld [vmem:[#allocation73_spill] sm:$0xff]  ;;  %v2663_v26 = vadd.f32 %v10184_v41, %v10183_v47 }
 0x502   : > { %4720 = vmax.xlane.f32.xlu1 %v4719_v12  ;;  %4717 = vmax.xlane.f32.xlu0 %v4716_v2  ;;  %v2804_v32 = vpop.permute.xlu1 %2803  ;;  %v2756_v1 = vadd.f32 %v8433_v19, %v2660_v63  ;;  %v10177_v19 = vld [vmem:[#allocation108_spill] sm:$0xff]  ;;  %v10178_v2 = vld [vmem:[#allocation85_spill] sm:$0xff]  ;;  %v2661_v52 = vadd.f32 %v10180_v30, %v10179_v23  ;;  %v10188_v30 = vld [vmem:[#allocation87_spill] sm:$0xff] }
 0x503   : > { %v8505_v39 = vadd.f32 %v2804_v32, %v2751_v36  ;;  %v4725_v49 = vsel %vm864_vm2, %v8501_v28, -inf  ;;  %5181 = vst.msk [vmem:[%s8327_s4 + $0x28] sm:$0xff] %vm864_vm2, %v8501_v28  ;;  %v2662_v42 = vadd.f32 %v10178_v2, %v10177_v19  ;;  %v10185_v19 = vld [vmem:[#allocation115_spill] sm:$0xff]  ;;  %v10186_v2 = vld [vmem:[#allocation74_spill] sm:$0xff]  ;;  %v10187_v23 = vld [vmem:[#allocation116_spill] sm:$0xff] }
 0x504   : > { %v2810_v61 = vpop.permute.xlu0 %2809 }
 0x505   : > { %v4722_v9 = vsel %vm864_vm2, %v8505_v39, -inf  ;;  %5180 = vst.msk [vmem:[%s8327_s4 + $0x20] sm:$0xff] %vm864_vm2, %v8505_v39  ;;  %v8519_v50 = vadd.f32 %v2810_v61, %v2754_v56  ;;  %v2758_v56 = vadd.f32 %v8437_v60, %v2662_v42  ;;  %v2664_v60 = vadd.f32 %v10182_v45, %v10181_v24  ;;  %v6106_v45 = vpop.f32.mrb[72].mxu1 }
 0x506   : > { %4726 = vmax.xlane.f32.xlu1 %v4725_v49  ;;  %4723 = vmax.xlane.f32.xlu0 %v4722_v9  ;;  %v2808_v59 = vpop.permute.xlu1 %2807 }
 0x507   : > { %v8523_v35 = vadd.f32 %v2808_v59, %v2753_v33  ;;  %v4731_v29 = vsel %vm864_vm2, %v8519_v50, -inf  ;;  %5183 = vst.msk [vmem:[%s8327_s4 + $0x38] sm:$0xff] %vm864_vm2, %v8519_v50  ;;  %v2757_v33 = vadd.f32 %v8439_v25, %v2661_v52  ;;  %v2665_v52 = vadd.f32 %v10188_v30, %v10187_v23 }
 0x508   : > { %v2814_v12 = vpop.permute.xlu0 %2813 }
 0x509   : > { %v4728_v36 = vsel %vm864_vm2, %v8523_v35, -inf  ;;  %5182 = vst.msk [vmem:[%s8327_s4 + $0x30] sm:$0xff] %vm864_vm2, %v8523_v35  ;;  %v8543_v57 = vadd.f32 %v2814_v12, %v2756_v1  ;;  %v2760_v1 = vadd.f32 %v8443_v43, %v2664_v60  ;;  %v2666_v43 = vadd.f32 %v10186_v2, %v10185_v19  ;;  %v10189_v2 = vld [vmem:[#allocation65_spill] sm:$0xff] }
 0x50a   : > { %4732 = vmax.xlane.f32.xlu1 %v4731_v29  ;;  %4729 = vmax.xlane.f32.xlu0 %v4728_v36  ;;  %v2812_v32 = vpop.permute.xlu1 %2811 }
 0x50b   : > { %v8547_v37 = vadd.f32 %v2812_v32, %v2755_v10  ;;  %v4737_v49 = vsel %vm864_vm2, %v8543_v57, -inf  ;;  %5185 = vst.msk [vmem:[%s8327_s4 + $0x48] sm:$0xff] %vm864_vm2, %v8543_v57  ;;  %v2759_v10 = vadd.f32 %v8447_v20, %v2663_v26 }
 0x50c   : > { %v2818_v61 = vpop.permute.xlu0 %2817 }
 0x50d   : > { %v4734_v9 = vsel %vm864_vm2, %v8547_v37, -inf  ;;  %5184 = vst.msk [vmem:[%s8327_s4 + $0x40] sm:$0xff] %vm864_vm2, %v8547_v37  ;;  %v8563_v63 = vadd.f32 %v2818_v61, %v2758_v56  ;;  %v2762_v56 = vadd.f32 %v8449_v17, %v2666_v43 }
 0x50e   : > { %4738 = vmax.xlane.f32.xlu1 %v4737_v49  ;;  %4735 = vmax.xlane.f32.xlu0 %v4734_v9  ;;  %v2816_v59 = vpop.permute.xlu1 %2815 }
 0x50f   : > { %v8567_v25 = vadd.f32 %v2816_v59, %v2757_v33  ;;  %v4743_v29 = vsel %vm864_vm2, %v8563_v63, -inf  ;;  %5187 = vst.msk [vmem:[%s8327_s4 + $0x58] sm:$0xff] %vm864_vm2, %v8563_v63  ;;  %v2761_v33 = vadd.f32 %v8453_v53, %v2665_v52  ;;  %v8605_v59 = vpop.f32.mrb[73].mxu1 }
 0x510   : > { %v2822_v12 = vpop.permute.xlu0 %2821  ;;  %v8617_v41 = vpop.f32.mrb[74].mxu1 }
 0x511   : > { %v4740_v36 = vsel %vm864_vm2, %v8567_v25, -inf  ;;  %5186 = vst.msk [vmem:[%s8327_s4 + $0x50] sm:$0xff] %vm864_vm2, %v8567_v25  ;;  %v8583_v42 = vadd.f32 %v2822_v12, %v2760_v1  ;;  %v8619_v26 = vpop.f32.mrb[75].mxu1 }
 0x512   : > { %4744 = vmax.xlane.f32.xlu1 %v4743_v29  ;;  %4741 = vmax.xlane.f32.xlu0 %v4740_v36  ;;  %v2820_v32 = vpop.permute.xlu1 %2819  ;;  %v8621_v1 = vpop.f32.mrb[76].mxu1 }
 0x513   : > { %v8587_v20 = vadd.f32 %v2820_v32, %v2759_v10  ;;  %v4749_v49 = vsel %vm864_vm2, %v8583_v42, -inf  ;;  %5189 = vst.msk [vmem:[%s8327_s4 + $0x68] sm:$0xff] %vm864_vm2, %v8583_v42  ;;  %v8623_v29 = vpop.f32.mrb[77].mxu1  ;;  %v10190_v32 = vld [vmem:[#allocation64_spill] sm:$0xff] }
 0x514   : > { %v2826_v61 = vpop.permute.xlu0 %2825  ;;  %v8625_v10 = vpop.f32.mrb[78].mxu1 }
 0x515   : > { %v4746_v9 = vsel %vm864_vm2, %v8587_v20, -inf  ;;  %5188 = vst.msk [vmem:[%s8327_s4 + $0x60] sm:$0xff] %vm864_vm2, %v8587_v20  ;;  %v8601_v24 = vadd.f32 %v2826_v61, %v2762_v56  ;;  %v8627_v12 = vpop.f32.mrb[79].mxu1 }
 0x516   : > { %4750 = vmax.xlane.f32.xlu1 %v4749_v49  ;;  %4747 = vmax.xlane.f32.xlu0 %v4746_v9  ;;  %v2824_v17 = vpop.permute.xlu1 %2823  ;;  %v10192_v9 = vld [vmem:[#allocation40_spill] sm:$0xff] }
 0x517   : > { %v8603_v60 = vadd.f32 %v2824_v17, %v2761_v33  ;;  %v4755_v53 = vsel %vm864_vm2, %v8601_v24, -inf  ;;  %5191 = vst.msk [vmem:[%s8327_s4 + $0x78] sm:$0xff] %vm864_vm2, %v8601_v24  ;;  %v10191_v33 = vld [vmem:[#allocation66_spill] sm:$0xff] }
 0x519   : > { %v4752_v47 = vsel %vm864_vm2, %v8603_v60, -inf  ;;  %5190 = vst.msk [vmem:[%s8327_s4 + $0x70] sm:$0xff] %vm864_vm2, %v8603_v60 }
 0x51a   : > { %4756 = vmax.xlane.f32.xlu1 %v4755_v53  ;;  %4753 = vmax.xlane.f32.xlu0 %v4752_v47 }
 0x561   : > { %v8629_v36 = vpop.f32.mrb[64].mxu0 }
 0x562   : > { %v8631_v19 = vpop.f32.mrb[65].mxu0  ;;  %v3673_v43 = vmul.f32 %v8629_v36, %v10189_v2  ;;  %v10195_v2 = vld [vmem:[#allocation42_spill] sm:$0xff] }
 0x563   : > { %v3672_v23 = vmul.f32 %v8631_v19, %v10190_v32  ;;  %v10196_v32 = vld [vmem:[#allocation67_spill] sm:$0xff] }
 0x564   : > { %v8638_v30 = vadd.f32 %v8429_v58, %v3673_v43 }
 0x565   : > { %v8641_v52 = vadd.f32 %v8431_v34, %v3672_v23 }
 0x56d   : > { %v8643_v56 = vpop.f32.mrb[66].mxu0 }
 0x56e   : > { %v8645_v49 = vpop.f32.mrb[67].mxu0  ;;  %v3675_v61 = vmul.f32 %v8643_v56, %v10191_v33 }
 0x56f   : > { %v3674_v17 = vmul.f32 %v8645_v49, %v10192_v9 }
 0x570   : > { %v8652_v53 = vadd.f32 %v8441_v11, %v3675_v61  ;;  %v10199_v61 = vld [vmem:[#allocation47_spill] sm:$0xff] }
 0x571   : > { %v8655_v47 = vadd.f32 %v8445_v55, %v3674_v17 }
 0x572   : > { %10193 = vst [vmem:[#allocation76_spill] sm:$0xff] %v8652_v53  ;;  %v10200_v53 = vld [vmem:[#allocation44_spill] sm:$0xff] }
 0x573   : > { %10194 = vst [vmem:[#allocation88_spill] sm:$0xff] %v8655_v47 }
 0x579   : > { %v8657_v58 = vpop.f32.mrb[68].mxu0 }
 0x57a   : > { %v8659_v34 = vpop.f32.mrb[69].mxu0  ;;  %v3677_v43 = vmul.f32 %v8657_v58, %v10195_v2 }
 0x57b   : > { %v3676_v23 = vmul.f32 %v8659_v34, %v10196_v32 }
 0x57c   : > { %v8666_v33 = vadd.f32 %v8469_v6, %v3677_v43 }
 0x57d   : > { %v8669_v9 = vadd.f32 %v8476_v8, %v3676_v23 }
 0x57e   : > { %10197 = vst [vmem:[#allocation77_spill] sm:$0xff] %v8666_v33 }
 0x57f   : > { %10198 = vst [vmem:[#allocation89_spill] sm:$0xff] %v8669_v9 }
 0x585   : > { %v8671_v11 = vpop.f32.mrb[70].mxu0 }
 0x586   : > { %v8673_v55 = vpop.f32.mrb[71].mxu0  ;;  %v3679_v17 = vmul.f32 %v8671_v11, %v10199_v61 }
 0x587   : > { %v3678_v47 = vmul.f32 %v8673_v55, %v10200_v53 }
 0x588   : > { %v8680_v2 = vadd.f32 %v8528_v7, %v3679_v17 }
 0x589   : > { %v8683_v32 = vadd.f32 %v8536_v13, %v3678_v47  ;;  %v4715_v6 = vpop.xlane.xlu0 %4714 }
 0x58a   : > { %v8686_v8 = vsub.f32 %v8461_v22, %v4715_v6 }
 0x58b   : > { %v4712_v43 = vpop.xlane.xlu1 %4711 }
 0x58c   : > { %10201 = vst [vmem:[#allocation78_spill] sm:$0xff] %v8686_v8  ;;  %v8689_v23 = vsub.f32 %v8465_v54, %v4712_v43  ;;  %v4776_v33 = vmul.f32 1.442695, %v8686_v8  ;;  %v10205_v43 = vld [vmem:[#allocation51_spill] sm:$0xff] }
 0x58e   : > { %10202 = vst [vmem:[#allocation28_spill] sm:$0xff] %v8689_v23  ;;  %v4774_v61 = vmul.f32 1.442695, %v8689_v23  ;;  %6289 = vpow2.f32 %v4776_v33 }
 0x58f   : > { %v4718_v53 = vpop.xlane.xlu0 %4717  ;;  %v4721_v9 = vpop.xlane.xlu1 %4720 }
 0x590   : > { %6291 = vpow2.f32 %v4774_v61  ;;  %v8694_v7 = vsub.f32 %v8487_v0, %v4718_v53  ;;  %v8697_v13 = vsub.f32 %v8483_v44, %v4721_v9  ;;  %v10206_v53 = vld [vmem:[#allocation50_spill] sm:$0xff] }
 0x591   : > { %v8701_v54 = vpop.f32.mrb[72].mxu0 }
 0x592   : > { %10203 = vst [vmem:[#allocation90_spill] sm:$0xff] %v8694_v7  ;;  %10204 = vst [vmem:[#allocation79_spill] sm:$0xff] %v8697_v13  ;;  %v4778_v22 = vmul.f32 1.442695, %v8694_v7  ;;  %v4780_v47 = vmul.f32 1.442695, %v8697_v13  ;;  %v3681_v33 = vmul.f32 %v8701_v54, %v10205_v43 }
 0x593   : > { %v8703_v17 = vpop.f32.mrb[73].mxu0  ;;  %v4724_v6 = vpop.xlane.xlu0 %4723 }
 0x594   : > { %6293 = vpow2.f32 %v4778_v22  ;;  %v4727_v61 = vpop.xlane.xlu1 %4726  ;;  %v8708_v0 = vsub.f32 %v8505_v39, %v4724_v6  ;;  %v8713_v9 = vadd.f32 %v6106_v45, %v3681_v33  ;;  %v3680_v7 = vmul.f32 %v8703_v17, %v10206_v53 }
 0x595   : > { %6295 = vpow2.f32 %v4780_v47  ;;  %v8711_v44 = vsub.f32 %v8501_v28, %v4727_v61 }
 0x596   : > { %v4782_v13 = vmul.f32 1.442695, %v8708_v0  ;;  %v8720_v22 = vadd.f32 %v8605_v59, %v3680_v7 }
 0x597   : > { %v4784_v23 = vmul.f32 1.442695, %v8711_v44  ;;  %v4730_v8 = vpop.xlane.xlu0 %4729 }
 0x598   : > { %v8723_v47 = vsub.f32 %v8523_v35, %v4730_v8  ;;  %v4733_v39 = vpop.xlane.xlu1 %4732  ;;  %v6290_v6 = vpop.eup %6289  ;;  %6297 = vpow2.f32 %v4782_v13 }
 0x599   : > { %v8726_v28 = vsub.f32 %v8519_v50, %v4733_v39  ;;  %6299 = vpow2.f32 %v4784_v23  ;;  %v4809_v33 = vsel %vm864_vm2, %v6290_v6, 0.0 }
 0x59a   : > { %v6292_v45 = vpop.eup %6291  ;;  %v4786_v43 = vmul.f32 1.442695, %v8723_v47  ;;  %4810 = vadd.xlane.f32.xlu1 %v4809_v33 }
 0x59b   : > { %10207 = vst [vmem:[#allocation80_spill] sm:$0xff] %v8726_v28  ;;  %v4788_v61 = vmul.f32 1.442695, %v8726_v28  ;;  %v4736_v59 = vpop.xlane.xlu0 %4735  ;;  %v4806_v7 = vsel %vm864_vm2, %v6292_v45, 0.0 }
 0x59c   : > { %6301 = vpow2.f32 %v4786_v43  ;;  %v8733_v35 = vsub.f32 %v8547_v37, %v4736_v59  ;;  %v4739_v8 = vpop.xlane.xlu1 %4738  ;;  %4807 = vadd.xlane.f32.xlu0 %v4806_v7 }
 0x59d   : > { %6303 = vpow2.f32 %v4788_v61  ;;  %v8736_v50 = vsub.f32 %v8543_v57, %v4739_v8  ;;  %v8739_v53 = vpop.f32.mrb[74].mxu0  ;;  %v10210_v61 = vld [vmem:[#allocation53_spill] sm:$0xff] }
 0x59e   : > { %10208 = vst [vmem:[#allocation29_spill] sm:$0xff] %v8733_v35  ;;  %v6294_v23 = vpop.eup %6293  ;;  %v4790_v13 = vmul.f32 1.442695, %v8733_v35  ;;  %v8742_v33 = vpop.f32.mrb[75].mxu0  ;;  %v3683_v59 = vmul.f32 %v8739_v53, %v10210_v61 }
 0x59f   : > { %10209 = vst [vmem:[#allocation81_spill] sm:$0xff] %v8736_v50  ;;  %v6296_v39 = vpop.eup %6295  ;;  %v4792_v6 = vmul.f32 1.442695, %v8736_v50  ;;  %v4742_v45 = vpop.xlane.xlu0 %4741  ;;  %v4812_v8 = vsel %vm864_vm2, %v6294_v23, 0.0  ;;  %v10211_v50 = vld [vmem:[#allocation68_spill] sm:$0xff] }
 0x5a0   : > { %6305 = vpow2.f32 %v4790_v13  ;;  %v4745_v37 = vpop.xlane.xlu1 %4744  ;;  %v8745_v43 = vsub.f32 %v8567_v25, %v4742_v45  ;;  %v4815_v7 = vsel %vm864_vm2, %v6296_v39, 0.0  ;;  %v3682_v35 = vmul.f32 %v8742_v33, %v10211_v50  ;;  %4813 = vadd.xlane.f32.xlu0 %v4812_v8 }
 0x5a1   : > { %6307 = vpow2.f32 %v4792_v6  ;;  %v8748_v57 = vsub.f32 %v8563_v63, %v4745_v37  ;;  %v8759_v25 = vadd.f32 %v8617_v41, %v3683_v59  ;;  %4816 = vadd.xlane.f32.xlu1 %v4815_v7 }
 0x5a2   : > { %v6298_v28 = vpop.eup %6297  ;;  %v4794_v13 = vmul.f32 1.442695, %v8745_v43  ;;  %v8762_v37 = vadd.f32 %v8619_v26, %v3682_v35 }
 0x5a3   : > { %v4796_v6 = vmul.f32 1.442695, %v8748_v57  ;;  %v4748_v63 = vpop.xlane.xlu0 %4747  ;;  %v6300_v45 = vpop.eup %6299  ;;  %v4818_v50 = vsel %vm864_vm2, %v6298_v28, 0.0 }
 0x5a4   : > { %v8765_v23 = vsub.f32 %v8587_v20, %v4748_v63  ;;  %v4751_v39 = vpop.xlane.xlu1 %4750  ;;  %6309 = vpow2.f32 %v4794_v13  ;;  %v4821_v41 = vsel %vm864_vm2, %v6300_v45, 0.0  ;;  %4819 = vadd.xlane.f32.xlu0 %v4818_v50  ;;  %v10214_v63 = vld [vmem:[#allocation55_spill] sm:$0xff] }
 0x5a5   : > { %v8769_v61 = vsub.f32 %v8583_v42, %v4751_v39  ;;  %6311 = vpow2.f32 %v4796_v6  ;;  %4822 = vadd.xlane.f32.xlu1 %v4821_v41  ;;  %v10215_v41 = vld [vmem:[#allocation69_spill] sm:$0xff] }
 0x5a6   : > { %10212 = vst [vmem:[#allocation82_spill] sm:$0xff] %v8765_v23  ;;  %v6302_v59 = vpop.eup %6301  ;;  %v4798_v7 = vmul.f32 1.442695, %v8765_v23 }
 0x5a7   : > { %10213 = vst [vmem:[#allocation37_spill] sm:$0xff] %v8769_v61  ;;  %v6304_v8 = vpop.eup %6303  ;;  %v4800_v26 = vmul.f32 1.442695, %v8769_v61  ;;  %v4824_v28 = vsel %vm864_vm2, %v6302_v59, 0.0 }
 0x5a8   : > { %6313 = vpow2.f32 %v4798_v7  ;;  %v4827_v20 = vsel %vm864_vm2, %v6304_v8, 0.0  ;;  %4825 = vadd.xlane.f32.xlu0 %v4824_v28 }
 0x5a9   : > { %6315 = vpow2.f32 %v4800_v26  ;;  %v8776_v42 = vpop.f32.mrb[76].mxu0  ;;  %4828 = vadd.xlane.f32.xlu1 %v4827_v20 }
 0x5aa   : > { %v6306_v35 = vpop.eup %6305  ;;  %v8778_v6 = vpop.f32.mrb[77].mxu0  ;;  %v3685_v45 = vmul.f32 %v8776_v42, %v10214_v63 }
 0x5ab   : > { %v6308_v13 = vpop.eup %6307  ;;  %v4830_v50 = vsel %vm864_vm2, %v6306_v35, 0.0  ;;  %v3684_v7 = vmul.f32 %v8778_v6, %v10215_v41 }
 0x5ac   : > { %v4833_v39 = vsel %vm864_vm2, %v6308_v13, 0.0  ;;  %v8787_v8 = vadd.f32 %v8621_v1, %v3685_v45  ;;  %4831 = vadd.xlane.f32.xlu0 %v4830_v50  ;;  %v10217_v50 = vld [vmem:[#allocation70_spill] sm:$0xff] }
 0x5ad   : > { %4834 = vadd.xlane.f32.xlu1 %v4833_v39  ;;  %v8790_v20 = vadd.f32 %v8623_v29, %v3684_v7  ;;  %v10216_v39 = vld [vmem:[#allocation57_spill] sm:$0xff] }
 0x5ae   : > { %v6310_v59 = vpop.eup %6309 }
 0x5af   : > { %v6312_v26 = vpop.eup %6311  ;;  %v4836_v28 = vsel %vm864_vm2, %v6310_v59, 0.0 }
 0x5b0   : > { %v4839_v63 = vsel %vm864_vm2, %v6312_v26, 0.0  ;;  %4837 = vadd.xlane.f32.xlu0 %v4836_v28  ;;  %v10218_v28 = vld [vmem:[#allocation6_spill] sm:$0xff] }
 0x5b1   : > { %4840 = vadd.xlane.f32.xlu1 %v4839_v63  ;;  %v3836_v63 = vmul.f32 %v8631_v19, %v10218_v28  ;;  %v4029_v28 = vmul.f32 %v8629_v36, %v10077_v38  ;;  %v4337_v38 = vld [vmem:[%s9681_s14] sm:$0xf] }
 0x5b2   : > { %v6314_v13 = vpop.eup %6313  ;;  %6148 = vmatprep.subr.msk.mxu1 %vm897_vm0, %v4337_v38 }
 0x5b3   : > { %v6316_v23 = vpop.eup %6315  ;;  %v8794_v35 = vpop.f32.mrb[78].mxu0  ;;  %v4842_v45 = vsel %vm864_vm2, %v6314_v13, 0.0  ;;  %6149 = vmatpush3.msk.msra.mxu1 %vm897_vm0, %v4337_v38  ;;  %v6424_v38 = vld [vmem:[%s6675_s3 + $0x40] sm:$0xff] }
 0x5b4   : > { %v8796_v41 = vpop.f32.mrb[79].mxu0  ;;  %v4845_v1 = vsel %vm864_vm2, %v6316_v23, 0.0  ;;  %v3687_v29 = vmul.f32 %v8794_v35, %v10216_v39  ;;  %4843 = vadd.xlane.f32.xlu0 %v4842_v45  ;;  %v10219_v23 = vld [vmem:[#allocation5_spill] sm:$0xff]  ;;  %v10220_v39 = vld [vmem:[#allocation8_spill] sm:$0xff]  ;;  %v10221_v45 = vld [vmem:[#allocation7_spill] sm:$0xff] }
 0x5b5   : > { %v3686_v7 = vmul.f32 %v8796_v41, %v10217_v50  ;;  %4846 = vadd.xlane.f32.xlu1 %v4845_v1  ;;  %v3932_v13 = vmul.f32 %v8631_v19, %v10219_v23  ;;  %v3837_v61 = vmul.f32 %v8629_v36, %v10220_v39  ;;  %v4141_v1 = vld [vmem:[%s9680_s13 + $0x8] sm:$0xff]  ;;  %v10224_v39 = vld [vmem:[#allocation12_spill] sm:$0xff] }
 0x5b6   : > { %v8805_v59 = vadd.f32 %v8625_v10, %v3687_v29  ;;  %v4028_v10 = vmul.f32 %v8631_v19, %v10078_v51  ;;  %v3933_v29 = vmul.f32 %v8629_v36, %v10221_v45  ;;  %v4142_v19 = vld [vmem:[%s9680_s13 + $0x10] sm:$0xff]  ;;  %v10223_v23 = vld [vmem:[#allocation14_spill] sm:$0xff]  ;;  %v4030_v36 = vmul.f32 %v8645_v49, %v10092_v48 }
 0x5b7   : > { %v8808_v26 = vadd.f32 %v8627_v12, %v3686_v7  ;;  %v4140_v12 = vld [vmem:[%s9680_s13] sm:$0xff]  ;;  %v4143_v7 = vld [vmem:[%s9680_s13 + $0x18] sm:$0xff]  ;;  %v6417_v45 = vld [vmem:[%s6675_s3 + $0x8] sm:$0xff] }
 0x5b8   : > { %v6198_v50 = vpack.c.bf16 %v4141_v1, %v4140_v12  ;;  %v10225_v12 = vld [vmem:[#allocation13_spill] sm:$0xff]  ;;  %6151 = vmatmul.mubr.msk.f32.vlgmr.msra.gmra.mrb[80].mxu1 %vm864_vm2, %v6417_v45  ;;  %v10231_v45 = vld [vmem:[#allocation18_spill] sm:$0xff] }
 0x5b9   : > { %v3935_v1 = vmul.f32 %v8643_v56, %v10225_v12 }
 0x5ba   : > { %6199 = vmatprep.subr.bf16.mxu0 %v6198_v50 }
 0x5bb   : > { %6201 = vmatpush3.bf16.msra.mxu0 %v6198_v50  ;;  %v10226_v50 = vld [vmem:[#allocation15_spill] sm:$0xff] }
 0x5bc   : > { %v3840_v48 = vmul.f32 %v8659_v34, %v10226_v50  ;;  %v10232_v50 = vld [vmem:[#allocation26_spill] sm:$0xff] }
 0x5c6   : > { %3868 = vrot.lane.b32.xlu1 %v3836_v63, %s9975_s23  ;;  %v6202_v63 = vpack.c.bf16 %v4143_v7, %v4142_v19  ;;  %v10227_v19 = vld [vmem:[#allocation16_spill] sm:$0xff] }
 0x5c7   : > { %v3936_v7 = vmul.f32 %v8659_v34, %v10227_v19  ;;  %v6429_v19 = vld [vmem:[%s6675_s3 + $0x68] sm:$0xff] }
 0x5c8   : > { %6203 = vmatprep.subr.bf16.mxu0 %v6202_v63 }
 0x5c9   : > { %6205 = vmatpush3.bf16.msra.mxu0 %v6202_v63 }
 0x5ca   : > { %3964 = vrot.lane.b32.xlu1 %v3932_v13, %s9978_s0  ;;  %3870 = vrot.lane.b32.xlu0 %v3837_v61, %s9975_s23  ;;  %v10222_v61 = vld [vmem:[#allocation10_spill] sm:$0xff]  ;;  %v3934_v13 = vmul.f32 %v8645_v49, %v10223_v23 }
 0x5cb   : > { %v3838_v51 = vmul.f32 %v8645_v49, %v10222_v61  ;;  %v4031_v49 = vmul.f32 %v8643_v56, %v10087_v21  ;;  %v6419_v61 = vld [vmem:[%s6675_s3 + $0x18] sm:$0xff]  ;;  %v6421_v23 = vld [vmem:[%s6675_s3 + $0x28] sm:$0xff]  ;;  %v6422_v21 = vld [vmem:[%s6675_s3 + $0x30] sm:$0xff] }
 0x5ce   : > { %4060 = vrot.lane.b32.xlu1 %v4028_v10, %s9980_s17  ;;  %3966 = vrot.lane.b32.xlu0 %v3933_v29, %s9978_s0  ;;  %v3839_v10 = vmul.f32 %v8643_v56, %v10224_v39  ;;  %v6418_v29 = vld [vmem:[%s6675_s3 + $0x10] sm:$0xff]  ;;  %v4032_v56 = vmul.f32 %v8659_v34, %v10107_v27  ;;  %v4033_v27 = vmul.f32 %v8657_v58, %v10103_v14  ;;  %v6425_v34 = vld [vmem:[%s6675_s3 + $0x48] sm:$0xff] }
 0x5cf   : > { %6153 = vmatprep.mubr.msk.f32.mxu1 %vm864_vm2, %v6418_v29  ;;  %v3938_v29 = vmul.f32 %v8673_v55, %v10231_v45  ;;  %v6428_v14 = vld [vmem:[%s6675_s3 + $0x60] sm:$0xff] }
 0x5d0   : > { %6154 = vmatmul.mubr.msk.f32.gmra.mrb[82].mxu1 %vm864_vm2, %v6419_v61  ;;  %v10233_v61 = vld [vmem:[#allocation30_spill] sm:$0xff] }
 0x5d2   : > { %3872 = vrot.lane.b32.xlu1 %v3838_v51, %s9975_s23  ;;  %4062 = vrot.lane.b32.xlu0 %v4029_v28, %s9980_s17  ;;  %v6420_v51 = vld [vmem:[%s6675_s3 + $0x20] sm:$0xff] }
 0x5d3   : > { %6156 = vmatprep.mubr.msk.f32.mxu1 %vm864_vm2, %v6420_v51  ;;  %v10228_v28 = vld [vmem:[#allocation17_spill] sm:$0xff]  ;;  %v3939_v51 = vmul.f32 %v8671_v11, %v10233_v61  ;;  %v4041_v61 = vmul.f32 %v8776_v42, %v10125_v62 }
 0x5d4   : > { %v3841_v63 = vmul.f32 %v8657_v58, %v10228_v28  ;;  %6157 = vmatmul.mubr.msk.f32.gmra.mrb[84].mxu1 %vm864_vm2, %v6421_v23  ;;  %v10234_v28 = vld [vmem:[#allocation32_spill] sm:$0xff]  ;;  %v4035_v23 = vmul.f32 %v8671_v11, %v10112_v16  ;;  %v4036_v16 = vmul.f32 %v8703_v17, %v10117_v3 }
 0x5d5   : > { %6159 = vmatprep.mubr.msk.f32.mxu1 %vm864_vm2, %v6422_v21 }
 0x5d6   : > { %3968 = vrot.lane.b32.xlu1 %v3934_v13, %s9978_s0  ;;  %3874 = vrot.lane.b32.xlu0 %v3839_v10, %s9975_s23  ;;  %v10229_v13 = vld [vmem:[#allocation22_spill] sm:$0xff]  ;;  %v6423_v10 = vld [vmem:[%s6675_s3 + $0x38] sm:$0xff] }
 0x5d7   : > { %v3937_v39 = vmul.f32 %v8657_v58, %v10229_v13  ;;  %v4034_v58 = vmul.f32 %v8673_v55, %v10113_v18  ;;  %v6431_v18 = vld [vmem:[%s6675_s3 + $0x78] sm:$0xff] }
 0x5d8   : > { %6160 = vmatmul.mubr.msk.f32.gmra.mrb[86].mxu1 %vm864_vm2, %v6423_v10  ;;  %v10238_v10 = vld [vmem:[#allocation41_spill] sm:$0xff] }
 0x5d9   : > { %6162 = vmatprep.mubr.msk.f32.mxu1 %vm864_vm2, %v6424_v38  ;;  %v3846_v38 = vmul.f32 %v8742_v33, %v10238_v10 }
 0x5da   : > { %4064 = vrot.lane.b32.xlu1 %v4030_v36, %s9980_s17  ;;  %3970 = vrot.lane.b32.xlu0 %v3935_v1, %s9978_s0  ;;  %v10230_v36 = vld [vmem:[#allocation24_spill] sm:$0xff]  ;;  %v6426_v1 = vld [vmem:[%s6675_s3 + $0x50] sm:$0xff] }
 0x5db   : > { %v3842_v12 = vmul.f32 %v8673_v55, %v10230_v36  ;;  %v10235_v55 = vld [vmem:[#allocation20_spill] sm:$0xff]  ;;  %v4037_v36 = vmul.f32 %v8701_v54, %v10116_v5 }
 0x5dc   : > { %6163 = vmatmul.mubr.msk.f32.gmra.mrb[88].mxu1 %vm864_vm2, %v6425_v34  ;;  %v3940_v21 = vmul.f32 %v8703_v17, %v10235_v55  ;;  %v4038_v34 = vmul.f32 %v8742_v33, %v10121_v4 }
 0x5dd   : > { %6165 = vmatprep.mubr.msk.f32.mxu1 %vm864_vm2, %v6426_v1  ;;  %v10241_v1 = vld [vmem:[#allocation48_spill] sm:$0xff] }
 0x5de   : > { %3876 = vrot.lane.b32.xlu1 %v3840_v48, %s9975_s23  ;;  %4066 = vrot.lane.b32.xlu0 %v4031_v49, %s9980_s17  ;;  %v3843_v48 = vmul.f32 %v8671_v11, %v10232_v50  ;;  %v6427_v49 = vld [vmem:[%s6675_s3 + $0x58] sm:$0xff]  ;;  %v10237_v11 = vld [vmem:[#allocation39_spill] sm:$0xff]  ;;  %v3943_v5 = vmul.f32 %v8739_v53, %v10241_v1 }
 0x5df   : > { %v10243_v50 = vld [vmem:[#allocation23_spill] sm:$0xff] }
 0x5e0   : > { %6166 = vmatmul.mubr.msk.f32.gmra.mrb[90].mxu1 %vm864_vm2, %v6427_v49  ;;  %v3944_v4 = vmul.f32 %v8778_v6, %v10243_v50  ;;  %v4040_v49 = vmul.f32 %v8778_v6, %v10126_v15 }
 0x5e1   : > { %6168 = vmatprep.mubr.msk.f32.mxu1 %vm864_vm2, %v6428_v14  ;;  %v10245_v14 = vld [vmem:[#allocation58_spill] sm:$0xff] }
 0x5e2   : > { %3972 = vrot.lane.b32.xlu1 %v3936_v7, %s9978_s0  ;;  %3878 = vrot.lane.b32.xlu0 %v3841_v63, %s9975_s23  ;;  %v6430_v7 = vld [vmem:[%s6675_s3 + $0x70] sm:$0xff]  ;;  %v3844_v63 = vmul.f32 %v8703_v17, %v10234_v28  ;;  %v10249_v28 = vld [vmem:[#allocation62_spill] sm:$0xff] }
 0x5e3   : > { %v10240_v17 = vld [vmem:[#allocation43_spill] sm:$0xff]  ;;  %v3947_v62 = vmul.f32 %v8794_v35, %v10249_v28 }
 0x5e4   : > { %6169 = vmatmul.mubr.msk.f32.gmra.mrb[92].mxu1 %vm864_vm2, %v6429_v19 }
 0x5e5   : > { %6171 = vmatprep.mubr.msk.f32.mxu1 %vm864_vm2, %v6430_v7  ;;  %v4042_v7 = vmul.f32 %v8796_v41, %v10135_v46 }
 0x5e6   : > { %4068 = vrot.lane.b32.xlu1 %v4032_v56, %s9980_s17  ;;  %3974 = vrot.lane.b32.xlu0 %v3937_v39, %s9978_s0  ;;  %v10236_v56 = vld [vmem:[#allocation34_spill] sm:$0xff]  ;;  %v3941_v39 = vmul.f32 %v8701_v54, %v10237_v11 }
 0x5e7   : > { %v3845_v13 = vmul.f32 %v8701_v54, %v10236_v56  ;;  %v10242_v54 = vld [vmem:[#allocation52_spill] sm:$0xff] }
 0x5e8   : > { %6172 = vmatmul.mubr.msk.f32.gmra.mrb[94].mxu1 %vm864_vm2, %v6431_v18  ;;  %v3848_v45 = vmul.f32 %v8778_v6, %v10242_v54  ;;  %v10248_v6 = vld [vmem:[#allocation60_spill] sm:$0xff] }
 0x5e9   : > { %v3851_v19 = vmul.f32 %v8794_v35, %v10248_v6  ;;  %v10250_v6 = vld [vmem:[#allocation88_spill] sm:$0xff] }
 0x5ea   : > { %3880 = vrot.lane.b32.xlu1 %v3842_v12, %s9975_s23  ;;  %4070 = vrot.lane.b32.xlu0 %v4033_v27, %s9980_s17  ;;  %v10239_v12 = vld [vmem:[#allocation21_spill] sm:$0xff]  ;;  %v3847_v27 = vmul.f32 %v8739_v53, %v10240_v17 }
 0x5eb   : > { %v3942_v3 = vmul.f32 %v8742_v33, %v10239_v12  ;;  %v10244_v33 = vld [vmem:[#allocation54_spill] sm:$0xff] }
 0x5ee   : > { %3976 = vrot.lane.b32.xlu1 %v3938_v29, %s9978_s0  ;;  %3882 = vrot.lane.b32.xlu0 %v3843_v48, %s9975_s23  ;;  %v4039_v29 = vmul.f32 %v8739_v53, %v10120_v40  ;;  %v3849_v48 = vmul.f32 %v8776_v42, %v10244_v33  ;;  %v3945_v40 = vmul.f32 %v8776_v42, %v10245_v14  ;;  %v10246_v53 = vld [vmem:[#allocation59_spill] sm:$0xff]  ;;  %v4757_v42 = vpop.xlane.xlu1 %4756 }
 0x5ef   : > { %v9013_v56 = vsub.f32 %v8601_v24, %v4757_v42 }
 0x5f2   : > { %4072 = vrot.lane.b32.xlu1 %v4034_v58, %s9980_s17  ;;  %3978 = vrot.lane.b32.xlu0 %v3939_v51, %s9978_s0  ;;  %v3850_v58 = vmul.f32 %v8796_v41, %v10246_v53  ;;  %v10247_v51 = vld [vmem:[#allocation25_spill] sm:$0xff] }
 0x5f3   : > { %v3946_v15 = vmul.f32 %v8796_v41, %v10247_v51 }
 0x5f6   : > { %3884 = vrot.lane.b32.xlu1 %v3844_v63, %s9975_s23  ;;  %4074 = vrot.lane.b32.xlu0 %v4035_v23, %s9980_s17  ;;  %v4754_v63 = vpop.xlane.xlu0 %4753  ;;  %v4043_v23 = vmul.f32 %v8794_v35, %v10133_v31  ;;  %v4804_v35 = vmul.f32 1.442695, %v9013_v56 }
 0x5f7   : > { %v9010_v41 = vsub.f32 %v8603_v60, %v4754_v63 }
 0x5f9   : > { %v4802_v31 = vmul.f32 1.442695, %v9010_v41 }
 0x5fa   : > { %3980 = vrot.lane.b32.xlu1 %v3940_v21, %s9978_s0  ;;  %3886 = vrot.lane.b32.xlu0 %v3845_v13, %s9975_s23 }
 0x5fb   : > { %6317 = vpow2.f32 %v4802_v31 }
 0x5fc   : > { %6319 = vpow2.f32 %v4804_v35 }
 0x5fe   : > { %4076 = vrot.lane.b32.xlu1 %v4036_v16, %s9980_s17  ;;  %3982 = vrot.lane.b32.xlu0 %v3941_v39, %s9978_s0 }
 0x602   : > { %3888 = vrot.lane.b32.xlu1 %v3846_v38, %s9975_s23  ;;  %4078 = vrot.lane.b32.xlu0 %v4037_v36, %s9980_s17 }
 0x605   : > { %v6318_v36 = vpop.eup %6317 }
 0x606   : > { %3984 = vrot.lane.b32.xlu1 %v3942_v3, %s9978_s0  ;;  %3890 = vrot.lane.b32.xlu0 %v3847_v27, %s9975_s23  ;;  %v6320_v12 = vpop.eup %6319 }
 0x607   : > { %v4851_v27 = vsel %vm864_vm2, %v6320_v12, 0.0 }
 0x60a   : > { %4080 = vrot.lane.b32.xlu1 %v4038_v34, %s9980_s17  ;;  %3986 = vrot.lane.b32.xlu0 %v3943_v5, %s9978_s0  ;;  %v4848_v34 = vsel %vm864_vm2, %v6318_v36, 0.0 }
 0x60e   : > { %3892 = vrot.lane.b32.xlu1 %v3848_v45, %s9975_s23  ;;  %4082 = vrot.lane.b32.xlu0 %v4039_v29, %s9980_s17 }
 0x612   : > { %3988 = vrot.lane.b32.xlu1 %v3944_v4, %s9978_s0  ;;  %3894 = vrot.lane.b32.xlu0 %v3849_v48, %s9975_s23 }
 0x616   : > { %4084 = vrot.lane.b32.xlu1 %v4040_v49, %s9980_s17  ;;  %3990 = vrot.lane.b32.xlu0 %v3945_v40, %s9978_s0 }
 0x61a   : > { %3896 = vrot.lane.b32.xlu1 %v3850_v58, %s9975_s23  ;;  %4086 = vrot.lane.b32.xlu0 %v4041_v61, %s9980_s17 }
 0x61e   : > { %3992 = vrot.lane.b32.xlu1 %v3946_v15, %s9978_s0  ;;  %3898 = vrot.lane.b32.xlu0 %v3851_v19, %s9975_s23 }
 0x622   : > { %4088 = vrot.lane.b32.xlu1 %v4042_v7, %s9980_s17  ;;  %3994 = vrot.lane.b32.xlu0 %v3947_v62, %s9978_s0  ;;  %v10251_v7 = vld [vmem:[#allocation76_spill] sm:$0xff]  ;;  %s9612_s0 = scalar_lea.hbm %s9682_s15, %s5621_s1 }
 0x626   : > { %4090 = vrot.lane.b32.xlu0 %v4043_v23, %s9980_s17  ;;  %s9045_s17 = scalar_lea.vmem %s9669_s2, %s6669_s26  ;;  %s6523_s26 = smov 127  }
 0x627   : > { %v9001_v18 = vpop.xlane.xlu1 %4810  ;;  %v4936_v62 = vld [vmem:[%s9045_s17 + $0x10] sm:$0xff]  ;;  %v4934_v23 = vld [vmem:[%s9045_s17] sm:$0xff] }
 0x628   : > { %6321 = vlog2.f32 %v9001_v18  ;;  %v4950_v18 = vlaneseq }
 0x629   : > { %v9003_v55 = vpop.xlane.xlu0 %4807 }
 0x62a   : > { %6323 = vlog2.f32 %v9003_v55 }
 0x62d   : > { %v9007_v46 = vpop.xlane.xlu0 %4813 }
 0x62e   : > { %v9005_v21 = vpop.xlane.xlu1 %4816 }
 0x62f   : > { %6325 = vlog2.f32 %v9005_v21 }
 0x630   : > { %6327 = vlog2.f32 %v9007_v46 }
 0x631   : > { %v9017_v16 = vpop.xlane.xlu0 %4819 }
 0x632   : > { %v9015_v13 = vpop.xlane.xlu1 %4822  ;;  %6329 = vlog2.f32 %v9017_v16  ;;  %v10255_v16 = vld [vmem:[#allocation28_spill] sm:$0xff] }
 0x633   : > { %6331 = vlog2.f32 %v9015_v13 }
 0x635   : > { %v9023_v39 = vpop.xlane.xlu0 %4825 }
 0x636   : > { %v9021_v11 = vpop.xlane.xlu1 %4828  ;;  %6333 = vlog2.f32 %v9023_v39 }
 0x637   : > { %6335 = vlog2.f32 %v9021_v11 }
 0x639   : > { %v9027_v60 = vpop.xlane.xlu0 %4831 }
 0x63a   : > { %v9025_v10 = vpop.xlane.xlu1 %4834  ;;  %6337 = vlog2.f32 %v9027_v60 }
 0x63d   : > { %v9031_v38 = vpop.xlane.xlu0 %4837 }
 0x63e   : > { %v9029_v24 = vpop.xlane.xlu1 %4840 }
 0x641   : > { %v9035_v17 = vpop.xlane.xlu0 %4843 }
 0x642   : > { %v9033_v3 = vpop.xlane.xlu1 %4846 }
 0x645   : > { %4849 = vadd.xlane.f32.xlu0 %v4848_v34  ;;  %v3871_v5 = vpop.permute.xlu0 %3870 }
 0x646   : > { %4852 = vadd.xlane.f32.xlu1 %v4851_v27  ;;  %v3869_v1 = vpop.permute.xlu1 %3868  ;;  %v3917_v50 = vadd.f32 %v3871_v5, %v8638_v30  ;;  %v4935_v30 = vld [vmem:[%s9045_s17 + $0x8] sm:$0xff]  ;;  %v4938_v27 = vld [vmem:[%s9045_s17 + $0x20] sm:$0xff]  ;;  %v4937_v5 = vld [vmem:[%s9045_s17 + $0x18] sm:$0xff] }
 0x647   : > { %v3916_v29 = vadd.f32 %v3869_v1, %v8641_v52 }
 0x649   : > { %v3967_v45 = vpop.permute.xlu0 %3966 }
 0x64a   : > { %v3965_v54 = vpop.permute.xlu1 %3964  ;;  %v4013_v33 = vadd.f32 %v3967_v45, %v3917_v50  ;;  %v4939_v50 = vld [vmem:[%s9045_s17 + $0x28] sm:$0xff] }
 0x64b   : > { %v4012_v4 = vadd.f32 %v3965_v54, %v3916_v29  ;;  %v4940_v29 = vld [vmem:[%s9045_s17 + $0x30] sm:$0xff] }
 0x64d   : > { %v4063_v49 = vpop.permute.xlu0 %4062 }
 0x64e   : > { %v4061_v48 = vpop.permute.xlu1 %4060  ;;  %v4109_v40 = vadd.f32 %v4063_v49, %v4013_v33 }
 0x64f   : > { %v4108_v14 = vadd.f32 %v4061_v48, %v4012_v4  ;;  %v10252_v48 = vld [vmem:[#allocation89_spill] sm:$0xff] }
 0x650   : > { %v4125_v58 = vmax.f32 %v4109_v40, 0.0 }
 0x651   : > { %v4124_v53 = vmax.f32 %v4108_v14, 0.0  ;;  %v3875_v52 = vpop.permute.xlu0 %3874  ;;  %v10253_v14 = vld [vmem:[#allocation77_spill] sm:$0xff] }
 0x652   : > { %v3873_v61 = vpop.permute.xlu1 %3872  ;;  %v3919_v28 = vadd.f32 %v3875_v52, %v10251_v7  ;;  %v4941_v52 = vld [vmem:[%s9045_s17 + $0x38] sm:$0xff] }
 0x653   : > { %6124 = vmatprep.mubr.msk.f32.mxu0 %vm1546_vm3, %v4124_v53  ;;  %v3918_v19 = vadd.f32 %v3873_v61, %v10250_v6  ;;  %v4942_v53 = vld [vmem:[%s9045_s17 + $0x40] sm:$0xff] }
 0x654   : > { %6125 = vmatmul.mubr.msk.f32.vlgmr.msra.gmra.mrb[80].mxu0 %vm1546_vm3, %v4125_v58 }
 0x655   : > { %v3971_v15 = vpop.permute.xlu0 %3970 }
 0x656   : > { %v3969_v51 = vpop.permute.xlu1 %3968  ;;  %v4015_v63 = vadd.f32 %v3971_v15, %v3919_v28 }
 0x657   : > { %4956 = vperm.xlu1 %6287, %v4935_v30   ;;  %v4014_v42 = vadd.f32 %v3969_v51, %v3918_v19  ;;  %v4944_v19 = vld [vmem:[%s9045_s17 + $0x50] sm:$0xff] }
 0x659   : > { %v4067_v35 = vpop.permute.xlu0 %4066 }
 0x65a   : > { %v4065_v31 = vpop.permute.xlu1 %4064  ;;  %v4111_v12 = vadd.f32 %v4067_v35, %v4015_v63 }
 0x65b   : > { %v4110_v36 = vadd.f32 %v4065_v31, %v4014_v42  ;;  %4959 = vperm.xlu1 %6287, %v4936_v62   ;;  %4953 = vperm.xlu0 %6288, %v4934_v23   ;;  %v4943_v62 = vld [vmem:[%s9045_s17 + $0x48] sm:$0xff]  ;;  %v4946_v23 = vld [vmem:[%s9045_s17 + $0x60] sm:$0xff]  ;;  %v4945_v31 = vld [vmem:[%s9045_s17 + $0x58] sm:$0xff] }
 0x65c   : > { %v4127_v1 = vmax.f32 %v4111_v12, 0.0 }
 0x65d   : > { %v4126_v34 = vmax.f32 %v4110_v36, 0.0  ;;  %v3879_v45 = vpop.permute.xlu0 %3878 }
 0x65e   : > { %v3877_v54 = vpop.permute.xlu1 %3876  ;;  %v3921_v40 = vadd.f32 %v3879_v45, %v10253_v14 }
 0x65f   : > { %4965 = vperm.xlu1 %6287, %v4938_v27   ;;  %6127 = vmatprep.mubr.msk.f32.mxu0 %vm1546_vm3, %v4126_v34  ;;  %v3920_v49 = vadd.f32 %v3877_v54, %v10252_v48  ;;  %v4948_v34 = vld [vmem:[%s9045_s17 + $0x70] sm:$0xff]  ;;  %v4947_v54 = vld [vmem:[%s9045_s17 + $0x68] sm:$0xff] }
 0x660   : > { %4962 = vperm.xlu0 %6288, %v4937_v5   ;;  %6128 = vmatmul.mubr.msk.f32.gmra.mrb[82].mxu0 %vm1546_vm3, %v4127_v1 }
 0x661   : > { %v3975_v33 = vpop.permute.xlu0 %3974 }
 0x662   : > { %v3973_v4 = vpop.permute.xlu1 %3972  ;;  %v4017_v61 = vadd.f32 %v3975_v33, %v3921_v40 }
 0x663   : > { %4971 = vperm.xlu1 %6287, %v4940_v29   ;;  %v4016_v58 = vadd.f32 %v3973_v4, %v3920_v49  ;;  %v4949_v49 = vld [vmem:[%s9045_s17 + $0x78] sm:$0xff]  ;;  %s9626_s17 = scalar_lea.sflag [#allocation3], %s10271_s22 }
 0x664   : > { %4968 = vperm.xlu0 %6288, %v4939_v50  }
 0x665   : > { %v4071_v51 = vpop.permute.xlu0 %4070 }
 0x666   : > { %v4069_v30 = vpop.permute.xlu1 %4068  ;;  %v4113_v6 = vadd.f32 %v4071_v51, %v4017_v61 }
 0x667   : > { %v4112_v15 = vadd.f32 %v4069_v30, %v4016_v58  ;;  %4977 = vperm.xlu1 %6287, %v4942_v53  }
 0x668   : > { %4974 = vperm.xlu0 %6288, %v4941_v52   ;;  %v4129_v28 = vmax.f32 %v4113_v6, 0.0 }
 0x669   : > { %v4128_v7 = vmax.f32 %v4112_v15, 0.0  ;;  %v3883_v63 = vpop.permute.xlu0 %3882 }
 0x66a   : > { %v3881_v42 = vpop.permute.xlu1 %3880  ;;  %v3923_v27 = vadd.f32 %v3883_v63, %v8680_v2 }
 0x66b   : > { %4983 = vperm.xlu1 %6287, %v4944_v19   ;;  %6130 = vmatprep.mubr.msk.f32.mxu0 %vm1546_vm3, %v4128_v7  ;;  %v3922_v12 = vadd.f32 %v3881_v42, %v8683_v32 }
 0x66c   : > { %4980 = vperm.xlu0 %6288, %v4943_v62   ;;  %6131 = vmatmul.mubr.msk.f32.gmra.mrb[84].mxu0 %vm1546_vm3, %v4129_v28 }
 0x66d   : > { %v3979_v36 = vpop.permute.xlu0 %3978 }
 0x66e   : > { %v3977_v35 = vpop.permute.xlu1 %3976  ;;  %v4019_v5 = vadd.f32 %v3979_v36, %v3923_v27 }
 0x66f   : > { %4989 = vperm.xlu1 %6287, %v4946_v23   ;;  %v4018_v1 = vadd.f32 %v3977_v35, %v3922_v12 }
 0x670   : > { %4986 = vperm.xlu0 %6288, %v4945_v31  }
 0x671   : > { %v4075_v29 = vpop.permute.xlu0 %4074 }
 0x672   : > { %v4073_v45 = vpop.permute.xlu1 %4072  ;;  %v4115_v4 = vadd.f32 %v4075_v29, %v4019_v5 }
 0x673   : > { %v4114_v50 = vadd.f32 %v4073_v45, %v4018_v1  ;;  %4995 = vperm.xlu1 %6287, %v4948_v34  }
 0x674   : > { %4992 = vperm.xlu0 %6288, %v4947_v54   ;;  %v4131_v48 = vmax.f32 %v4115_v4, 0.0 }
 0x675   : > { %v4130_v33 = vmax.f32 %v4114_v50, 0.0  ;;  %v3887_v32 = vpop.permute.xlu0 %3886 }
 0x676   : > { %v3885_v14 = vpop.permute.xlu1 %3884  ;;  %v3925_v58 = vadd.f32 %v3887_v32, %v8713_v9 }
 0x677   : > { %6133 = vmatprep.mubr.msk.f32.mxu0 %vm1546_vm3, %v4130_v33  ;;  %v3924_v53 = vadd.f32 %v3885_v14, %v8720_v22 }
 0x678   : > { %4998 = vperm.xlu0 %6288, %v4949_v49   ;;  %6134 = vmatmul.mubr.msk.f32.gmra.mrb[86].mxu0 %vm1546_vm3, %v4131_v48 }
 0x679   : > { %v3983_v40 = vpop.permute.xlu0 %3982 }
 0x67a   : > { %v3981_v2 = vpop.permute.xlu1 %3980  ;;  %v4021_v52 = vadd.f32 %v3983_v40, %v3925_v58 }
 0x67b   : > { %v4020_v61 = vadd.f32 %v3981_v2, %v3924_v53 }
 0x67d   : > { %v4079_v51 = vpop.permute.xlu0 %4078 }
 0x67e   : > { %v4077_v30 = vpop.permute.xlu1 %4076  ;;  %v4117_v6 = vadd.f32 %v4079_v51, %v4021_v52 }
 0x67f   : > { %v4116_v15 = vadd.f32 %v4077_v30, %v4020_v61 }
 0x680   : > { %v4133_v7 = vmax.f32 %v4117_v6, 0.0 }
 0x681   : > { %v4132_v19 = vmax.f32 %v4116_v15, 0.0  ;;  %v3891_v62 = vpop.permute.xlu0 %3890 }
 0x682   : > { %v3889_v28 = vpop.permute.xlu1 %3888  ;;  %v3927_v9 = vadd.f32 %v3891_v62, %v8759_v25 }
 0x683   : > { %6136 = vmatprep.mubr.msk.f32.mxu0 %vm1546_vm3, %v4132_v19  ;;  %v3926_v22 = vadd.f32 %v3889_v28, %v8762_v37 }
 0x684   : > { %6137 = vmatmul.mubr.msk.f32.gmra.mrb[88].mxu0 %vm1546_vm3, %v4133_v7 }
 0x685   : > { %v3987_v63 = vpop.permute.xlu0 %3986 }
 0x686   : > { %v3985_v42 = vpop.permute.xlu1 %3984  ;;  %v4023_v31 = vadd.f32 %v3987_v63, %v3927_v9  ;;  %v6322_v9 = vpop.eup %6321 }
 0x687   : > { %v4022_v23 = vadd.f32 %v3985_v42, %v3926_v22 }
 0x689   : > { %v4083_v36 = vpop.permute.xlu0 %4082 }
 0x68a   : > { %v4081_v35 = vpop.permute.xlu1 %4080  ;;  %v4119_v27 = vadd.f32 %v4083_v36, %v4023_v31 }
 0x68b   : > { %v4118_v12 = vadd.f32 %v4081_v35, %v4022_v23  ;;  %v9093_v62 = vpop.f32.mrb[80].mxu1  ;;  %v4857_v23 = vmul.f32 0.6931472, %v6322_v9  ;;  %v6324_v35 = vpop.eup %6323 }
 0x68c   : > { %v4135_v1 = vmax.f32 %v4119_v27, 0.0  ;;  %v9095_v42 = vpop.f32.mrb[81].mxu1  ;;  %v4855_v55 = vmul.f32 0.6931472, %v6324_v35 }
 0x68d   : > { %v4134_v34 = vmax.f32 %v4118_v12, 0.0  ;;  %v3895_v54 = vpop.permute.xlu0 %3894  ;;  %v10254_v12 = vld [vmem:[#allocation78_spill] sm:$0xff] }
 0x68e   : > { %v3893_v5 = vpop.permute.xlu1 %3892  ;;  %v3929_v25 = vadd.f32 %v3895_v54, %v8787_v8  ;;  %v9116_v27 = vsub.f32 %v10254_v12, %v4857_v23  ;;  %v9125_v54 = vsub.f32 %v10255_v16, %v4855_v55 }
 0x68f   : > { %6139 = vmatprep.mubr.msk.f32.mxu0 %vm1546_vm3, %v4134_v34  ;;  %v3928_v37 = vadd.f32 %v3893_v5, %v8790_v20  ;;  %v6326_v34 = vpop.eup %6325 }
 0x690   : > { %6140 = vmatmul.mubr.msk.f32.gmra.mrb[90].mxu0 %vm1546_vm3, %v4135_v1  ;;  %v6328_v46 = vpop.eup %6327  ;;  %v9121_v1 = vand.u32 127, %v4950_v18  ;;  %v4904_v5 = vmul.f32 1.442695, %v9116_v27 }
 0x691   : > { %v3991_v29 = vpop.permute.xlu0 %3990  ;;  %v4859_v13 = vmul.f32 0.6931472, %v6328_v46 }
 0x692   : > { %v3989_v45 = vpop.permute.xlu1 %3988  ;;  %v4025_v4 = vadd.f32 %v3991_v29, %v3929_v25  ;;  %v6330_v25 = vpop.eup %6329  ;;  %6339 = vpow2.f32 %v4904_v5 }
 0x693   : > { %v4024_v50 = vadd.f32 %v3989_v45, %v3928_v37  ;;  %v4861_v45 = vmul.f32 0.6931472, %v6326_v34  ;;  %v6332_v39 = vpop.eup %6331  ;;  %v4863_v60 = vmul.f32 0.6931472, %v6330_v25  ;;  %6341 = vlog2.f32 %v9025_v10 }
 0x695   : > { %v4087_v48 = vpop.permute.xlu0 %4086 }
 0x696   : > { %v4085_v33 = vpop.permute.xlu1 %4084  ;;  %v4121_v14 = vadd.f32 %v4087_v48, %v4025_v4  ;;  %v10256_v4 = vld [vmem:[#allocation79_spill] sm:$0xff] }
 0x697   : > { %v4120_v49 = vadd.f32 %v4085_v33, %v4024_v50  ;;  %v4902_v50 = vmul.f32 1.442695, %v9125_v54  ;;  %v9134_v33 = vsub.f32 %v10256_v4, %v4861_v45 }
 0x698   : > { %v4137_v2 = vmax.f32 %v4121_v14, 0.0 }
 0x699   : > { %v4136_v32 = vmax.f32 %v4120_v49, 0.0  ;;  %v3899_v53 = vpop.permute.xlu0 %3898  ;;  %6343 = vpow2.f32 %v4902_v50 }
 0x69a   : > { %v3897_v40 = vpop.permute.xlu1 %3896  ;;  %v3931_v8 = vadd.f32 %v3899_v53, %v8805_v59  ;;  %6345 = vlog2.f32 %v9031_v38 }
 0x69b   : > { %6142 = vmatprep.mubr.msk.f32.mxu0 %vm1546_vm3, %v4136_v32  ;;  %v3930_v20 = vadd.f32 %v3897_v40, %v8808_v26  ;;  %v10257_v32 = vld [vmem:[#allocation90_spill] sm:$0xff] }
 0x69c   : > { %6143 = vmatmul.mubr.msk.f32.gmra.mrb[92].mxu0 %vm1546_vm3, %v4137_v2  ;;  %v9143_v2 = vsub.f32 %v10257_v32, %v4859_v13 }
 0x69d   : > { %v3995_v61 = vpop.permute.xlu0 %3994 }
 0x69e   : > { %v3993_v58 = vpop.permute.xlu1 %3992  ;;  %v4027_v30 = vadd.f32 %v3995_v61, %v3931_v8  ;;  %v4865_v61 = vmul.f32 0.6931472, %v6332_v39  ;;  %v4906_v9 = vmul.f32 1.442695, %v9143_v2 }
 0x69f   : > { %v4026_v52 = vadd.f32 %v3993_v58, %v3930_v20  ;;  %v6334_v58 = vpop.eup %6333  ;;  %v4908_v20 = vmul.f32 1.442695, %v9134_v33 }
 0x6a1   : > { %v4091_v15 = vpop.permute.xlu0 %4090  ;;  %6347 = vpow2.f32 %v4908_v20 }
 0x6a2   : > { %v4089_v51 = vpop.permute.xlu1 %4088  ;;  %v4123_v19 = vadd.f32 %v4091_v15, %v4027_v30  ;;  %v9154_v15 = vsub.f32 %v8708_v0, %v4863_v60  ;;  %6349 = vlog2.f32 %v9029_v24 }
 0x6a3   : > { %v4122_v6 = vadd.f32 %v4089_v51, %v4026_v52  ;;  %v9097_v63 = vpop.f32.mrb[82].mxu1  ;;  %6351 = vpow2.f32 %v4906_v9 }
 0x6a4   : > { %v4139_v28 = vmax.f32 %v4123_v19, 0.0  ;;  %v9099_v26 = vpop.f32.mrb[83].mxu1  ;;  %6353 = vlog2.f32 %v9033_v3 }
 0x6a5   : > { %v4138_v7 = vmax.f32 %v4122_v6, 0.0  ;;  %v4867_v6 = vmul.f32 0.6931472, %v6334_v58  ;;  %6355 = vlog2.f32 %v9035_v17 }
 0x6a7   : > { %6145 = vmatprep.mubr.msk.f32.mxu0 %vm1546_vm3, %v4138_v7  ;;  %v9102_v59 = vpop.f32.mrb[84].mxu1  ;;  %v6336_v7 = vpop.eup %6335  ;;  %v9168_v38 = vsub.f32 %v8723_v47, %v4867_v6 }
 0x6a8   : > { %6146 = vmatmul.mubr.msk.f32.gmra.mrb[94].mxu0 %vm1546_vm3, %v4139_v28  ;;  %v9104_v22 = vpop.f32.mrb[85].mxu1  ;;  %v9157_v28 = vsub.f32 %v8711_v44, %v4865_v61  ;;  %v6338_v35 = vpop.eup %6337  ;;  %v4869_v55 = vmul.f32 0.6931472, %v6336_v7 }
 0x6a9   : > { %v6340_v44 = vpop.eup %6339  ;;  %v4871_v16 = vmul.f32 0.6931472, %v6338_v35 }
 0x6aa   : > { %v4912_v5 = vmul.f32 1.442695, %v9157_v28  ;;  %v5081_v39 = vmul.f32 %v6340_v44, %v9116_v27 }
 0x6ab   : > { %v9109_v31 = vpop.f32.mrb[86].mxu1 }
 0x6ac   : > { %v9112_v36 = vpop.f32.mrb[87].mxu1  ;;  %6357 = vpow2.f32 %v4912_v5  ;;  %v5099_v20 = vsel %vm864_vm2, %v5081_v39, 0.0 }
 0x6af   : > { %v9137_v49 = vpop.f32.mrb[88].mxu1 }
 0x6b0   : > { %v9140_v14 = vpop.f32.mrb[89].mxu1 }
 0x6b3   : > { %v9176_v47 = vpop.f32.mrb[90].mxu1 }
 0x6b4   : > { %v9181_v50 = vpop.f32.mrb[91].mxu1 }
 0x6b7   : > { %v9214_v5 = vpop.f32.mrb[92].mxu1 }
 0x6d2   : > { %v9128_v29 = vpop.xlane.xlu0 %4849 }
 0x6d3   : > { %v9119_v21 = vpop.xlane.xlu1 %4852  ;;  %6359 = vlog2.f32 %v9128_v29 }
 0x6d7   : > { %v4957_v37 = vpop.permute.xlu1 %4956 }
 0x6d8   : > { %vm5001_vm4 = vcmp.eq.s32.totalorder %v9121_v1, %v4957_v37  ;;  %v6342_v37 = vpop.eup %6341 }
 0x6d9   : > { %v5017_v48 = vsel %vm5001_vm4, %v9116_v27, 0.0  ;;  %v6344_v4 = vpop.eup %6343  ;;  %v4873_v27 = vmul.f32 0.6931472, %v6342_v37  ;;  %v9219_v37 = vpop.f32.mrb[93].mxu1 }
 0x6da   : > { %v5035_v11 = vsel %vm864_vm2, %v5017_v48, 0.0  ;;  %v4954_v53 = vpop.permute.xlu0 %4953  ;;  %v10258_v48 = vld [vmem:[#allocation80_spill] sm:$0xff]  ;;  %v6346_v3 = vpop.eup %6345 }
 0x6db   : > { %v4960_v40 = vpop.permute.xlu1 %4959  ;;  %5036 = vadd.xlane.f32.xlu0 %v5035_v11  ;;  %vm5000_vm6 = vcmp.eq.s32.totalorder %v9121_v1, %v4954_v53  ;;  %v9184_v11 = vsub.f32 %v10258_v48, %v4869_v55  ;;  %v10259_v53 = vld [vmem:[#allocation29_spill] sm:$0xff]  ;;  %v4875_v9 = vmul.f32 0.6931472, %v6346_v3 }
 0x6dc   : > { %vm5002_vm5 = vcmp.eq.s32.totalorder %v9121_v1, %v4960_v40  ;;  %v5016_v52 = vsel %vm5000_vm6, %v9125_v54, 0.0  ;;  %v4910_v40 = vmul.f32 1.442695, %v9154_v15  ;;  %v9192_v58 = vsub.f32 %v10259_v53, %v4871_v16 }
 0x6dd   : > { %v5018_v8 = vsel %vm5002_vm5, %v9143_v2, 0.0  ;;  %v5032_v51 = vsel %vm864_vm2, %v5016_v52, 0.0  ;;  %v5080_v52 = vmul.f32 %v6344_v4, %v9125_v54  ;;  %vm5273_vm5 = vcmask 48168  }
 0x6de   : > { %v5038_v30 = vsel %vm864_vm2, %v5018_v8, 0.0  ;;  %5033 = vadd.xlane.f32.xlu1 %v5032_v51  ;;  %6361 = vpow2.f32 %v4910_v40  ;;  %vm5290_vm6 = vcmask 56368  }
 0x6df   : > { %v4966_v10 = vpop.permute.xlu1 %4965  ;;  %5039 = vadd.xlane.f32.xlu0 %v5038_v30  ;;  %v4963_v19 = vpop.permute.xlu0 %4962 }
 0x6e0   : > { %vm5004_vm7 = vcmp.eq.s32.totalorder %v9121_v1, %v4966_v10  ;;  %vm5003_vm8 = vcmp.eq.s32.totalorder %v9121_v1, %v4963_v19  ;;  %v6348_v30 = vpop.eup %6347  ;;  %v4916_v10 = vmul.f32 1.442695, %v9184_v11  ;;  %v10260_v19 = vld [vmem:[#allocation81_spill] sm:$0xff] }
 0x6e1   : > { %v5020_v0 = vsel %vm5004_vm7, %v9154_v15, 0.0  ;;  %v5019_v23 = vsel %vm5003_vm8, %v9134_v33, 0.0  ;;  %v6350_v6 = vpop.eup %6349  ;;  %v9203_v7 = vsub.f32 %v10260_v19, %v4873_v27  ;;  %v5083_v35 = vmul.f32 %v6348_v30, %v9134_v33 }
 0x6e2   : > { %v5044_v18 = vsel %vm864_vm2, %v5020_v0, 0.0  ;;  %v5041_v12 = vsel %vm864_vm2, %v5019_v23, 0.0  ;;  %v5096_v23 = vsel %vm864_vm2, %v5080_v52, 0.0  ;;  %v4877_v44 = vmul.f32 0.6931472, %v6350_v6  ;;  %v10261_v52 = vld [vmem:[#allocation37_spill] sm:$0xff] }
 0x6e3   : > { %v4972_v34 = vpop.permute.xlu1 %4971  ;;  %5045 = vadd.xlane.f32.xlu0 %v5044_v18  ;;  %5042 = vadd.xlane.f32.xlu1 %v5041_v12  ;;  %v4969_v46 = vpop.permute.xlu0 %4968  ;;  %6363 = vpow2.f32 %v4916_v10  ;;  %v5105_v33 = vsel %vm864_vm2, %v5083_v35, 0.0 }
 0x6e4   : > { %vm5006_vm9 = vcmp.eq.s32.totalorder %v9121_v1, %v4972_v34  ;;  %vm5005_vm10 = vcmp.eq.s32.totalorder %v9121_v1, %v4969_v46  ;;  %v6352_v18 = vpop.eup %6351  ;;  %v4914_v34 = vmul.f32 1.442695, %v9168_v38  ;;  %v9212_v46 = vsub.f32 %v8745_v43, %v4875_v9 }
 0x6e5   : > { %v5022_v45 = vsel %vm5006_vm9, %v9168_v38, 0.0  ;;  %v5021_v13 = vsel %vm5005_vm10, %v9157_v28, 0.0  ;;  %v6354_v55 = vpop.eup %6353  ;;  %v9226_v4 = vsub.f32 %v8748_v57, %v4877_v44 }
 0x6e6   : > { %v5050_v24 = vsel %vm864_vm2, %v5022_v45, 0.0  ;;  %v5047_v25 = vsel %vm864_vm2, %v5021_v13, 0.0  ;;  %v6356_v16 = vpop.eup %6355  ;;  %v5082_v13 = vmul.f32 %v6352_v18, %v9143_v2  ;;  %v4881_v48 = vmul.f32 0.6931472, %v6354_v55 }
 0x6e7   : > { %v4978_v32 = vpop.permute.xlu1 %4977  ;;  %5051 = vadd.xlane.f32.xlu0 %v5050_v24  ;;  %5048 = vadd.xlane.f32.xlu1 %v5047_v25  ;;  %v4975_v60 = vpop.permute.xlu0 %4974  ;;  %v4920_v25 = vmul.f32 1.442695, %v9203_v7  ;;  %6365 = vpow2.f32 %v4914_v34  ;;  %v4918_v2 = vmul.f32 1.442695, %v9192_v58 }
 0x6e8   : > { %vm5008_vm11 = vcmp.eq.s32.totalorder %v9121_v1, %v4978_v32  ;;  %vm5007_vm12 = vcmp.eq.s32.totalorder %v9121_v1, %v4975_v60  ;;  %v6358_v24 = vpop.eup %6357  ;;  %v4879_v32 = vmul.f32 0.6931472, %v6356_v16  ;;  %v5102_v53 = vsel %vm864_vm2, %v5082_v13, 0.0 }
 0x6e9   : > { %v5023_v61 = vsel %vm5007_vm12, %v9184_v11, 0.0  ;;  %v5024_v51 = vsel %vm5008_vm11, %v9192_v58, 0.0  ;;  %v6360_v40 = vpop.eup %6359  ;;  %6367 = vpow2.f32 %v4920_v25  ;;  %v4899_v30 = vsub.f32 %v10261_v52, %v4881_v48 }
 0x6ea   : > { %v5053_v8 = vsel %vm864_vm2, %v5023_v61, 0.0  ;;  %v5056_v54 = vsel %vm864_vm2, %v5024_v51, 0.0  ;;  %v5085_v61 = vmul.f32 %v6358_v24, %v9157_v28  ;;  %v6362_v3 = vpop.eup %6361  ;;  %6369 = vpow2.f32 %v4918_v2 }
 0x6eb   : > { %5100 = vadd.xlane.f32.xlu0 %v5099_v20  ;;  %5054 = vadd.xlane.f32.xlu1 %v5053_v8  ;;  %v4981_v17 = vpop.permute.xlu0 %4980  ;;  %v4984_v0 = vpop.permute.xlu1 %4983  ;;  %v4924_v8 = vmul.f32 1.442695, %v9226_v4  ;;  %v4922_v28 = vmul.f32 1.442695, %v9212_v46  ;;  %v4883_v6 = vmul.f32 0.6931472, %v6360_v40  ;;  %v5084_v9 = vmul.f32 %v6362_v3, %v9154_v15 }
 0x6ec   : > { %vm5009_vm13 = vcmp.eq.s32.totalorder %v9121_v1, %v4981_v17  ;;  %vm5010_vm14 = vcmp.eq.s32.totalorder %v9121_v1, %v4984_v0  ;;  %v10262_v17 = vld [vmem:[#allocation82_spill] sm:$0xff]  ;;  %v5111_v10 = vsel %vm864_vm2, %v5085_v61, 0.0 }
 0x6ed   : > { %v5025_v12 = vsel %vm5009_vm13, %v9203_v7, 0.0  ;;  %v5026_v43 = vsel %vm5010_vm14, %v9212_v46, 0.0  ;;  %v4898_v51 = vsub.f32 %v10262_v17, %v4879_v32  ;;  %v6364_v0 = vpop.eup %6363  ;;  %6371 = vpow2.f32 %v4924_v8 }
 0x6ee   : > { %v5059_v45 = vsel %vm864_vm2, %v5025_v12, 0.0  ;;  %v5062_v27 = vsel %vm864_vm2, %v5026_v43, 0.0  ;;  %6373 = vpow2.f32 %v4922_v28  ;;  %v9248_v12 = vpop.f32.mrb[94].mxu1  ;;  %v5108_v55 = vsel %vm864_vm2, %v5084_v9, 0.0 }
 0x6ef   : > { %5057 = vadd.xlane.f32.xlu0 %v5056_v54  ;;  %5097 = vadd.xlane.f32.xlu1 %v5096_v23  ;;  %v4987_v29 = vpop.permute.xlu0 %4986  ;;  %v4990_v60 = vpop.permute.xlu1 %4989  ;;  %v4928_v23 = vmul.f32 1.442695, %v4899_v30  ;;  %v4926_v35 = vmul.f32 1.442695, %v4898_v51  ;;  %v5087_v15 = vmul.f32 %v6364_v0, %v9184_v11  ;;  %v6433_v0 = vld [vmem:[%s6675_s3] sm:$0xff] }
 0x6f0   : > { %vm5011_vm15 = vcmp.eq.s32.totalorder %v9121_v1, %v4987_v29  ;;  %vm5012_vm0 = vcmp.eq.s32.totalorder %v9121_v1, %v4990_v60  ;;  %v4900_v29 = vsub.f32 %v9010_v41, %v4883_v6  ;;  %v9253_v34 = vpop.f32.mrb[95].mxu1 }
 0x6f1   : > { %v5027_v20 = vsel %vm5011_vm15, %v9226_v4, 0.0  ;;  %v5028_v54 = vsel %vm5012_vm0, %v4898_v51, 0.0  ;;  %v6366_v16 = vpop.eup %6365  ;;  %6375 = vpow2.f32 %v4928_v23  ;;  %v5117_v13 = vsel %vm864_vm2, %v5087_v15, 0.0 }
 0x6f2   : > { %v5065_v19 = vsel %vm864_vm2, %v5027_v20, 0.0  ;;  %v5068_v44 = vsel %vm864_vm2, %v5028_v54, 0.0  ;;  %6377 = vpow2.f32 %v4926_v35  ;;  %v4930_v41 = vmul.f32 1.442695, %v4900_v29 }
 0x6f3   : > { %5106 = vadd.xlane.f32.xlu0 %v5105_v33  ;;  %5060 = vadd.xlane.f32.xlu1 %v5059_v45  ;;  %v4993_v39 = vpop.permute.xlu0 %4992  ;;  %v4996_v18 = vpop.permute.xlu1 %4995  ;;  %v5086_v25 = vmul.f32 %v6366_v16, %v9168_v38 }
 0x6f4   : > { %vm5013_vm3 = vcmp.eq.s32.totalorder %v9121_v1, %v4993_v39  ;;  %vm5014_vm4 = vcmp.eq.s32.totalorder %v9121_v1, %v4996_v18  ;;  %v6368_v45 = vpop.eup %6367  ;;  %6379 = vpow2.f32 %v4930_v41  ;;  %v6437_v41 = vld [vmem:[%s6675_s3 + $0x20] sm:$0xff] }
 0x6f5   : > { %v5029_v33 = vsel %vm5013_vm3, %v4899_v30, 0.0  ;;  %v6370_v39 = vpop.eup %6369  ;;  %v5030_v11 = vsel %vm5014_vm4, %v4900_v29, 0.0  ;;  %v5114_v2 = vsel %vm864_vm2, %v5086_v25, 0.0  ;;  %v5089_v32 = vmul.f32 %v6368_v45, %v9203_v7 }
 0x6f6   : > { %v5071_v24 = vsel %vm864_vm2, %v5029_v33, 0.0  ;;  %v5074_v48 = vsel %vm864_vm2, %v5030_v11, 0.0  ;;  %v5088_v60 = vmul.f32 %v6370_v39, %v9192_v58  ;;  %v6436_v33 = vld [vmem:[%s6675_s3 + $0x28] sm:$0xff]  ;;  %v6438_v39 = vld [vmem:[%s6675_s3 + $0x38] sm:$0xff]  ;;  %6381 = vlog2.f32 %v9119_v21 }
 0x6f7   : > { %5063 = vadd.xlane.f32.xlu0 %v5062_v27  ;;  %5103 = vadd.xlane.f32.xlu1 %v5102_v53  ;;  %v9233_v57 = vpop.permute.xlu0 %4998  ;;  %v6372_v43 = vpop.eup %6371  ;;  %v5123_v38 = vsel %vm864_vm2, %v5089_v32, 0.0 }
 0x6f8   : > { %vm5015_vm1 = vcmp.eq.s32.totalorder %v9121_v1, %v9233_v57  ;;  %v6374_v40 = vpop.eup %6373  ;;  %v5120_v53 = vsel %vm864_vm2, %v5088_v60, 0.0  ;;  %v5091_v61 = vmul.f32 %v6372_v43, %v9226_v4  ;;  %v6439_v43 = vld [vmem:[%s6675_s3 + $0x30] sm:$0xff]  ;;  %v6440_v60 = vld [vmem:[%s6675_s3 + $0x48] sm:$0xff] }
 0x6f9   : > { %v5090_v3 = vmul.f32 %v6374_v40, %v9212_v46 }
 0x6fa   : > { %v5129_v7 = vsel %vm864_vm2, %v5091_v61, 0.0 }
 0x6fb   : > { %5112 = vadd.xlane.f32.xlu0 %v5111_v10  ;;  %5066 = vadd.xlane.f32.xlu1 %v5065_v19  ;;  %v6376_v27 = vpop.eup %6375  ;;  %v5126_v58 = vsel %vm864_vm2, %v5090_v3, 0.0  ;;  %v6432_v19 = vld [vmem:[%s6675_s3 + $0x8] sm:$0xff]  ;;  %v6442_v3 = vld [vmem:[%s6675_s3 + $0x58] sm:$0xff] }
 0x6fc   : > { %v6378_v20 = vpop.eup %6377  ;;  %v5093_v8 = vmul.f32 %v6376_v27, %v4899_v30  ;;  %v6441_v27 = vld [vmem:[%s6675_s3 + $0x40] sm:$0xff] }
 0x6fd   : > { %v5092_v52 = vmul.f32 %v6378_v20, %v4898_v51 }
 0x6fe   : > { %v6380_v28 = vpop.eup %6379  ;;  %v5135_v17 = vsel %vm864_vm2, %v5093_v8, 0.0 }
 0x6ff   : > { %5069 = vadd.xlane.f32.xlu0 %v5068_v44  ;;  %5109 = vadd.xlane.f32.xlu1 %v5108_v55  ;;  %v5132_v4 = vsel %vm864_vm2, %v5092_v52, 0.0  ;;  %v5094_v6 = vmul.f32 %v6380_v28, %v4900_v29 }
 0x701   : > { %v5138_v46 = vsel %vm864_vm2, %v5094_v6, 0.0 }
 0x703   : > { %5118 = vadd.xlane.f32.xlu0 %v5117_v13  ;;  %5072 = vadd.xlane.f32.xlu1 %v5071_v24 }
 0x707   : > { %5075 = vadd.xlane.f32.xlu0 %v5074_v48  ;;  %5115 = vadd.xlane.f32.xlu1 %v5114_v2 }
 0x70b   : > { %5124 = vadd.xlane.f32.xlu0 %v5123_v38  ;;  %5121 = vadd.xlane.f32.xlu1 %v5120_v53 }
 0x70f   : > { %5130 = vadd.xlane.f32.xlu0 %v5129_v7  ;;  %5127 = vadd.xlane.f32.xlu1 %v5126_v58  ;;  %v6443_v7 = vld [vmem:[%s6675_s3 + $0x50] sm:$0xff] }
 0x713   : > { %5136 = vadd.xlane.f32.xlu0 %v5135_v17  ;;  %5133 = vadd.xlane.f32.xlu1 %v5132_v4  ;;  %v6444_v4 = vld [vmem:[%s6675_s3 + $0x68] sm:$0xff] }
 0x717   : > { %5139 = vadd.xlane.f32.xlu1 %v5138_v46 }
 0x727   : > { %v6126_v10 = vpop.f32.mrb[80].mxu0 }
 0x728   : > { %v4339_v9 = vmul.f32 %v6432_v19, %v6126_v10  ;;  %v4258_v30 = vpop.f32.mrb[81].mxu0  ;;  %v6445_v10 = vld [vmem:[%s6675_s3 + $0x60] sm:$0xff] }
 0x729   : > { %v4338_v51 = vmul.f32 %v6433_v0, %v4258_v30 }
 0x72a   : > { %v9275_v54 = vadd.f32 %v9093_v62, %v4339_v9  ;;  %4520 = vrot.lane.b32.xlu0 %v4339_v9, %s6523_s26  ;;  %v6434_v62 = vld [vmem:[%s6675_s3 + $0x18] sm:$0xff] }
 0x72b   : > { %v9279_v23 = vadd.f32 %v9095_v42, %v4338_v51  ;;  %4518 = vrot.lane.b32.xlu1 %v4338_v51, %s6523_s26  ;;  %v6435_v42 = vld [vmem:[%s6675_s3 + $0x10] sm:$0xff] }
 0x72e   : > { %4584 = vrot.lane.b32.xlu0 %v4339_v9, %s6524_s30 }
 0x72f   : > { %4582 = vrot.lane.b32.xlu1 %v4338_v51, %s6524_s30 }
 0x732   : > { %4648 = vrot.lane.b32.xlu0 %v4339_v9, %s6525_s25 }
 0x733   : > { %v6129_v35 = vpop.f32.mrb[82].mxu0  ;;  %4646 = vrot.lane.b32.xlu1 %v4338_v51, %s6525_s25 }
 0x734   : > { %v4341_v18 = vmul.f32 %v6434_v62, %v6129_v35  ;;  %v4268_v29 = vpop.f32.mrb[83].mxu0 }
 0x735   : > { %v4340_v44 = vmul.f32 %v6435_v42, %v4268_v29 }
 0x736   : > { %v9289_v55 = vadd.f32 %v9097_v63, %v4341_v18  ;;  %4524 = vrot.lane.b32.xlu0 %v4341_v18, %s6523_s26 }
 0x737   : > { %v9293_v15 = vadd.f32 %v9099_v26, %v4340_v44  ;;  %4522 = vrot.lane.b32.xlu1 %v4340_v44, %s6523_s26 }
 0x73a   : > { %4588 = vrot.lane.b32.xlu0 %v4341_v18, %s6524_s30 }
 0x73b   : > { %4586 = vrot.lane.b32.xlu1 %v4340_v44, %s6524_s30 }
 0x73e   : > { %4652 = vrot.lane.b32.xlu0 %v4341_v18, %s6525_s25  ;;  %v6446_v18 = vld [vmem:[%s6675_s3 + $0x78] sm:$0xff] }
 0x73f   : > { %v6132_v16 = vpop.f32.mrb[84].mxu0  ;;  %4650 = vrot.lane.b32.xlu1 %v4340_v44, %s6525_s25 }
 0x740   : > { %v4343_v63 = vmul.f32 %v6436_v33, %v6132_v16  ;;  %v4278_v45 = vpop.f32.mrb[85].mxu0  ;;  %v6447_v16 = vld [vmem:[%s6675_s3 + $0x70] sm:$0xff]  ;;  %s6526_s3 = smov 4  }
 0x741   : > { %v4342_v13 = vmul.f32 %v6437_v41, %v4278_v45 }
 0x742   : > { %v9303_v26 = vadd.f32 %v9102_v59, %v4343_v63  ;;  %4528 = vrot.lane.b32.xlu0 %v4343_v63, %s6523_s26 }
 0x743   : > { %v9307_v24 = vadd.f32 %v9104_v22, %v4342_v13  ;;  %4526 = vrot.lane.b32.xlu1 %v4342_v13, %s6523_s26 }
 0x746   : > { %4592 = vrot.lane.b32.xlu0 %v4343_v63, %s6524_s30 }
 0x747   : > { %4590 = vrot.lane.b32.xlu1 %v4342_v13, %s6524_s30 }
 0x74a   : > { %4656 = vrot.lane.b32.xlu0 %v4343_v63, %s6525_s25 }
 0x74b   : > { %v6135_v25 = vpop.f32.mrb[86].mxu0  ;;  %4654 = vrot.lane.b32.xlu1 %v4342_v13, %s6525_s25 }
 0x74c   : > { %v4345_v59 = vmul.f32 %v6438_v39, %v6135_v25  ;;  %v4288_v11 = vpop.f32.mrb[87].mxu0  ;;  %v6382_v25 = vpop.eup %6381 }
 0x74d   : > { %v4344_v48 = vmul.f32 %v6439_v43, %v4288_v11 }
 0x74e   : > { %v9317_v22 = vadd.f32 %v9109_v31, %v4345_v59  ;;  %4532 = vrot.lane.b32.xlu0 %v4345_v59, %s6523_s26 }
 0x74f   : > { %v9321_v2 = vadd.f32 %v9112_v36, %v4344_v48  ;;  %4530 = vrot.lane.b32.xlu1 %v4344_v48, %s6523_s26 }
 0x752   : > { %4596 = vrot.lane.b32.xlu0 %v4345_v59, %s6524_s30 }
 0x753   : > { %4594 = vrot.lane.b32.xlu1 %v4344_v48, %s6524_s30 }
 0x756   : > { %4660 = vrot.lane.b32.xlu0 %v4345_v59, %s6525_s25  ;;  %v4885_v59 = vmul.f32 0.6931472, %v6382_v25 }
 0x757   : > { %v6138_v32 = vpop.f32.mrb[88].mxu0  ;;  %4658 = vrot.lane.b32.xlu1 %v4344_v48, %s6525_s25 }
 0x758   : > { %v4347_v31 = vmul.f32 %v6440_v60, %v6138_v32  ;;  %v4298_v40 = vpop.f32.mrb[89].mxu0  ;;  %v4901_v43 = vsub.f32 %v9013_v56, %v4885_v59 }
 0x759   : > { %v4346_v38 = vmul.f32 %v6441_v27, %v4298_v40 }
 0x75a   : > { %v9331_v36 = vadd.f32 %v9137_v49, %v4347_v31  ;;  %4536 = vrot.lane.b32.xlu0 %v4347_v31, %s6523_s26  ;;  %v4932_v60 = vmul.f32 1.442695, %v4901_v43 }
 0x75b   : > { %v9335_v53 = vadd.f32 %v9140_v14, %v4346_v38  ;;  %4534 = vrot.lane.b32.xlu1 %v4346_v38, %s6523_s26 }
 0x75c   : > { %6383 = vpow2.f32 %v4932_v60 }
 0x75e   : > { %4600 = vrot.lane.b32.xlu0 %v4347_v31, %s6524_s30 }
 0x75f   : > { %4598 = vrot.lane.b32.xlu1 %v4346_v38, %s6524_s30 }
 0x762   : > { %4664 = vrot.lane.b32.xlu0 %v4347_v31, %s6525_s25 }
 0x763   : > { %v6141_v61 = vpop.f32.mrb[90].mxu0  ;;  %4662 = vrot.lane.b32.xlu1 %v4346_v38, %s6525_s25 }
 0x764   : > { %v4349_v20 = vmul.f32 %v6442_v3, %v6141_v61  ;;  %v4308_v49 = vpop.f32.mrb[91].mxu0 }
 0x765   : > { %v4348_v58 = vmul.f32 %v6443_v7, %v4308_v49 }
 0x766   : > { %v9345_v14 = vadd.f32 %v9176_v47, %v4349_v20  ;;  %4540 = vrot.lane.b32.xlu0 %v4349_v20, %s6523_s26  ;;  %v6384_v56 = vpop.eup %6383 }
 0x767   : > { %v9349_v8 = vadd.f32 %v9181_v50, %v4348_v58  ;;  %4538 = vrot.lane.b32.xlu1 %v4348_v58, %s6523_s26 }
 0x768   : > { %v9352_v52 = vpop.xlane.xlu0 %5036 }
 0x76a   : > { %4604 = vrot.lane.b32.xlu0 %v4349_v20, %s6524_s30 }
 0x76b   : > { %4602 = vrot.lane.b32.xlu1 %v4348_v58, %s6524_s30  ;;  %v9356_v28 = vpop.xlane.xlu1 %5033 }
 0x76c   : > { %v9358_v17 = vpop.xlane.xlu0 %5039 }
 0x76e   : > { %4668 = vrot.lane.b32.xlu0 %v4349_v20, %s6525_s25 }
 0x76f   : > { %v6144_v47 = vpop.f32.mrb[92].mxu0  ;;  %4666 = vrot.lane.b32.xlu1 %v4348_v58, %s6525_s25  ;;  %v5095_v58 = vmul.f32 %v6384_v56, %v4901_v43 }
 0x770   : > { %v4351_v50 = vmul.f32 %v6444_v4, %v6144_v47  ;;  %v4318_v6 = vpop.f32.mrb[93].mxu0  ;;  %v9363_v46 = vpop.xlane.xlu1 %5042 }
 0x771   : > { %v4350_v19 = vmul.f32 %v6445_v10, %v4318_v6  ;;  %v9366_v9 = vpop.xlane.xlu0 %5045  ;;  %v5031_v10 = vsel %vm5015_vm1, %v4901_v43, 0.0 }
 0x772   : > { %v9369_v30 = vadd.f32 %v9214_v5, %v4351_v50  ;;  %4544 = vrot.lane.b32.xlu0 %v4351_v50, %s6523_s26 }
 0x773   : > { %v9373_v0 = vadd.f32 %v9219_v37, %v4350_v19  ;;  %4542 = vrot.lane.b32.xlu1 %v4350_v19, %s6523_s26 }
 0x774   : > { %v9376_v51 = vpop.xlane.xlu1 %5048 }
 0x775   : > { %v9378_v35 = vpop.xlane.xlu0 %5051 }
 0x776   : > { %4608 = vrot.lane.b32.xlu0 %v4351_v50, %s6524_s30 }
 0x777   : > { %4606 = vrot.lane.b32.xlu1 %v4350_v19, %s6524_s30 }
 0x778   : > { %v9382_v62 = vpop.xlane.xlu1 %5054 }
 0x779   : > { %v9384_v5 = vpop.xlane.xlu0 %5100 }
 0x77a   : > { %4672 = vrot.lane.b32.xlu0 %v4351_v50, %s6525_s25  ;;  %v5141_v50 = vsel %vm864_vm2, %v5095_v58, 0.0 }
 0x77b   : > { %v6147_v37 = vpop.f32.mrb[94].mxu0  ;;  %4670 = vrot.lane.b32.xlu1 %v4350_v19, %s6525_s25 }
 0x77c   : > { %v4353_v29 = vmul.f32 %v6446_v18, %v6147_v37  ;;  %v4328_v42 = vpop.f32.mrb[95].mxu0  ;;  %v9390_v44 = vpop.xlane.xlu1 %5097  ;;  %v5077_v18 = vsel %vm864_vm2, %v5031_v10, 0.0  ;;  %vm5256_vm2 = vcmask 39968  }
 0x77d   : > { %v4352_v33 = vmul.f32 %v6447_v16, %v4328_v42  ;;  %v9393_v63 = vpop.xlane.xlu0 %5057 }
 0x77e   : > { %v9396_v45 = vadd.f32 %v9248_v12, %v4353_v29  ;;  %4548 = vrot.lane.b32.xlu0 %v4353_v29, %s6523_s26 }
 0x77f   : > { %v9400_v21 = vadd.f32 %v9253_v34, %v4352_v33  ;;  %4546 = vrot.lane.b32.xlu1 %v4352_v33, %s6523_s26  ;;  %s6448_s26 = scalar_lea.vmem %s9614_s5, 2048 }
 0x780   : > { %v9403_v41 = vpop.xlane.xlu1 %5060  ;;  %p6449_p11 = scmp.ne.s32.totalorder %s9614_s5, %s6448_s26 }
 0x781   : > { %v9405_v13 = vpop.xlane.xlu0 %5106 }
 0x782   : > { %4612 = vrot.lane.b32.xlu0 %v4353_v29, %s6524_s30  ;;  %p6450_p12 = pnand %p6449_p11, %p6648_p5 }
 0x783   : > { %4610 = vrot.lane.b32.xlu1 %v4352_v33, %s6524_s30  ;;  %s6527_s30 = smov [#allocation2]  }
 0x784   : > { %v9409_v39 = vpop.xlane.xlu1 %5103  ;;  %p6451_p13 = pneg %p6450_p12 }
 0x785   : > { %v9411_v12 = vpop.xlane.xlu0 %5063 }
 0x786   : > { %4676 = vrot.lane.b32.xlu0 %v4353_v29, %s6525_s25 }
 0x787   : > { %4674 = vrot.lane.b32.xlu1 %v4352_v33, %s6525_s25  ;;  %s6452_s25 = sshll.u32 %s6527_s30, 4  ;;  %s6453_s25 = int_to_ptr.vmem [resolvable:$false] %s6452_s25 }
 0x788   : > { %v9415_v34 = vpop.xlane.xlu1 %5066  ;;  %p6455_p0 = scmp.lt.s32.totalorder %s9614_s5, %s6453_s25 }
 0x789   : > { %v9417_v11 = vpop.xlane.xlu0 %5112 }
 0x78c   : > { %v9420_v48 = vpop.xlane.xlu1 %5109 }
 0x78d   : > { %v9422_v32 = vpop.xlane.xlu0 %5069 }
 0x78e   : > { %10263 = vst [vmem:[#allocation31_spill] sm:$0xff] %v9422_v32 }
 0x790   : > { %v9424_v31 = vpop.xlane.xlu1 %5072 }
 0x791   : > { %v9426_v40 = vpop.xlane.xlu0 %5118 }
 0x794   : > { %v9428_v27 = vpop.xlane.xlu1 %5115 }
 0x795   : > { %v9430_v38 = vpop.xlane.xlu0 %5075 }
 0x796   : > { %10264 = vst [vmem:[#allocation45_spill] sm:$0xff] %v9430_v38 }
 0x798   : > { %v9432_v61 = vpop.xlane.xlu1 %5121 }
 0x799   : > { %v9434_v3 = vpop.xlane.xlu0 %5124 }
 0x79c   : > { %v9436_v20 = vpop.xlane.xlu1 %5127 }
 0x79d   : > { %v9438_v49 = vpop.xlane.xlu0 %5130 }
 0x7a0   : > { %v9440_v7 = vpop.xlane.xlu1 %5133 }
 0x7a1   : > { %10265 = vst [vmem:[#allocation33_spill] sm:$0xff] %v9440_v7  ;;  %v9442_v47 = vpop.xlane.xlu0 %5136 }
 0x7a4   : > { %v9444_v4 = vpop.xlane.xlu1 %5139 }
 0x7a5   : > { %10266 = vst [vmem:[#allocation56_spill] sm:$0xff] %v9444_v4  ;;  %v4521_v6 = vpop.permute.xlu0 %4520  ;;  %5142 = vadd.xlane.f32.xlu0 %v5141_v50 }
 0x7a6   : > { %v4567_v56 = vadd.f32 %v4521_v6, %v9275_v54 }
 0x7a8   : > { %v4519_v19 = vpop.permute.xlu1 %4518 }
 0x7a9   : > { %v4585_v37 = vpop.permute.xlu0 %4584  ;;  %v4566_v59 = vadd.f32 %v4519_v19, %v9279_v23 }
 0x7aa   : > { %v4631_v50 = vadd.f32 %v4585_v37, %v4567_v56 }
 0x7ab   : > { %5078 = vadd.xlane.f32.xlu1 %v5077_v18 }
 0x7ac   : > { %v4583_v29 = vpop.permute.xlu1 %4582 }
 0x7ad   : > { %v4649_v42 = vpop.permute.xlu0 %4648  ;;  %v4630_v58 = vadd.f32 %v4583_v29, %v4566_v59 }
 0x7ae   : > { %v4695_v18 = vadd.f32 %v4649_v42, %v4631_v50 }
 0x7b0   : > { %v4647_v16 = vpop.permute.xlu1 %4646 }
 0x7b1   : > { %v4525_v33 = vpop.permute.xlu0 %4524  ;;  %v4694_v1 = vadd.f32 %v4647_v16, %v4630_v58 }
 0x7b2   : > { %v4569_v57 = vadd.f32 %v4525_v33, %v9289_v55 }
 0x7b4   : > { %v4523_v25 = vpop.permute.xlu1 %4522 }
 0x7b5   : > { %v4589_v60 = vpop.permute.xlu0 %4588  ;;  %v4568_v43 = vadd.f32 %v4523_v25, %v9293_v15 }
 0x7b6   : > { %v4633_v4 = vadd.f32 %v4589_v60, %v4569_v57 }
 0x7b8   : > { %v4587_v38 = vpop.permute.xlu1 %4586 }
 0x7b9   : > { %v4653_v10 = vpop.permute.xlu0 %4652  ;;  %v4632_v32 = vadd.f32 %v4587_v38, %v4568_v43 }
 0x7ba   : > { %v4697_v23 = vadd.f32 %v4653_v10, %v4633_v4 }
 0x7bb   : > { %5208 = vrot.lane.b32.xlu0 %v4694_v1, %s6526_s3 }
 0x7bc   : > { %v4651_v7 = vpop.permute.xlu1 %4650  ;;  %5210 = vrot.lane.b32.xlu1 %v4695_v18, %s6526_s3 }
 0x7bd   : > { %v4696_v54 = vadd.f32 %v4651_v7, %v4632_v32  ;;  %v4529_v6 = vpop.permute.xlu0 %4528 }
 0x7be   : > { %v4571_v15 = vadd.f32 %v4529_v6, %v9303_v26 }
 0x7bf   : > { %5214 = vrot.lane.b32.xlu0 %v4697_v23, %s6526_s3 }
 0x7c0   : > { %v4527_v19 = vpop.permute.xlu1 %4526  ;;  %5212 = vrot.lane.b32.xlu1 %v4696_v54, %s6526_s3 }
 0x7c1   : > { %v4593_v55 = vpop.permute.xlu0 %4592  ;;  %v4570_v38 = vadd.f32 %v4527_v19, %v9307_v24 }
 0x7c2   : > { %v4635_v37 = vadd.f32 %v4593_v55, %v4571_v15 }
 0x7c4   : > { %v4591_v29 = vpop.permute.xlu1 %4590 }
 0x7c5   : > { %v4657_v42 = vpop.permute.xlu0 %4656  ;;  %v4634_v33 = vadd.f32 %v4591_v29, %v4570_v38 }
 0x7c6   : > { %v4699_v16 = vadd.f32 %v4657_v42, %v4635_v37 }
 0x7c8   : > { %5218 = vrot.lane.b32.xlu0 %v4699_v16, %s6526_s3  ;;  %v4655_v4 = vpop.permute.xlu1 %4654 }
 0x7c9   : > { %v4698_v32 = vadd.f32 %v4655_v4, %v4634_v33  ;;  %v4533_v7 = vpop.permute.xlu0 %4532 }
 0x7ca   : > { %v4573_v60 = vadd.f32 %v4533_v7, %v9317_v22 }
 0x7cb   : > { %5216 = vrot.lane.b32.xlu1 %v4698_v32, %s6526_s3 }
 0x7cc   : > { %v4531_v25 = vpop.permute.xlu1 %4530 }
 0x7cd   : > { %v4597_v59 = vpop.permute.xlu0 %4596  ;;  %v4572_v58 = vadd.f32 %v4531_v25, %v9321_v2 }
 0x7ce   : > { %v4637_v56 = vadd.f32 %v4597_v59, %v4573_v60 }
 0x7d0   : > { %v4595_v26 = vpop.permute.xlu1 %4594 }
 0x7d1   : > { %v4661_v50 = vpop.permute.xlu0 %4660  ;;  %v4636_v1 = vadd.f32 %v4595_v26, %v4572_v58 }
 0x7d2   : > { %v4701_v24 = vadd.f32 %v4661_v50, %v4637_v56 }
 0x7d4   : > { %5222 = vrot.lane.b32.xlu0 %v4701_v24, %s6526_s3  ;;  %v4659_v57 = vpop.permute.xlu1 %4658 }
 0x7d5   : > { %v4700_v43 = vadd.f32 %v4659_v57, %v4636_v1  ;;  %v4537_v10 = vpop.permute.xlu0 %4536 }
 0x7d6   : > { %v4575_v54 = vadd.f32 %v4537_v10, %v9331_v36 }
 0x7d7   : > { %5220 = vrot.lane.b32.xlu1 %v4700_v43, %s6526_s3 }
 0x7d8   : > { %v4535_v18 = vpop.permute.xlu1 %4534 }
 0x7d9   : > { %v4601_v23 = vpop.permute.xlu0 %4600  ;;  %v4574_v19 = vadd.f32 %v4535_v18, %v9335_v53 }
 0x7da   : > { %v4639_v6 = vadd.f32 %v4601_v23, %v4575_v54 }
 0x7dc   : > { %v4599_v22 = vpop.permute.xlu1 %4598 }
 0x7dd   : > { %v4665_v55 = vpop.permute.xlu0 %4664  ;;  %v4638_v15 = vadd.f32 %v4599_v22, %v4574_v19 }
 0x7de   : > { %v4703_v2 = vadd.f32 %v4665_v55, %v4639_v6 }
 0x7e0   : > { %5226 = vrot.lane.b32.xlu0 %v4703_v2, %s6526_s3  ;;  %v4663_v37 = vpop.permute.xlu1 %4662 }
 0x7e1   : > { %v4702_v29 = vadd.f32 %v4663_v37, %v4638_v15  ;;  %v4541_v38 = vpop.permute.xlu0 %4540 }
 0x7e2   : > { %v4577_v33 = vadd.f32 %v4541_v38, %v9345_v14 }
 0x7e3   : > { %5224 = vrot.lane.b32.xlu1 %v4702_v29, %s6526_s3 }
 0x7e4   : > { %v4539_v42 = vpop.permute.xlu1 %4538 }
 0x7e5   : > { %v4605_v16 = vpop.permute.xlu0 %4604  ;;  %v4576_v32 = vadd.f32 %v4539_v42, %v9349_v8 }
 0x7e6   : > { %v4641_v4 = vadd.f32 %v4605_v16, %v4577_v33  ;;  %v5147_v33 = vsub.f32 0.0, %v9405_v13 }
 0x7e8   : > { %v4603_v36 = vpop.permute.xlu1 %4602 }
 0x7e9   : > { %v4669_v7 = vpop.permute.xlu0 %4668  ;;  %v4640_v25 = vadd.f32 %v4603_v36, %v4576_v32 }
 0x7ea   : > { %v4705_v53 = vadd.f32 %v4669_v7, %v4641_v4  ;;  %v5149_v4 = vsub.f32 0.0, %v9417_v11  ;;  %v5148_v11 = vsub.f32 0.0, %v9420_v48  ;;  %v5150_v48 = vsub.f32 0.0, %v9428_v27  ;;  %v10269_v7 = vld [vmem:[#allocation56_spill] sm:$0xff] }
 0x7eb   : > { %v5152_v27 = vsub.f32 0.0, %v9432_v61 }
 0x7ec   : > { %5230 = vrot.lane.b32.xlu0 %v4705_v53, %s6526_s3  ;;  %v4667_v59 = vpop.permute.xlu1 %4666  ;;  %v5158_v53 = vsub.f32 0.0, %v10269_v7 }
 0x7ed   : > { %v4704_v60 = vadd.f32 %v4667_v59, %v4640_v25  ;;  %v4545_v56 = vpop.permute.xlu0 %4544  ;;  %v10270_v25 = vld [vmem:[#allocation45_spill] sm:$0xff] }
 0x7ee   : > { %v4579_v50 = vadd.f32 %v4545_v56, %v9369_v30 }
 0x7ef   : > { %5228 = vrot.lane.b32.xlu1 %v4704_v60, %s6526_s3 }
 0x7f0   : > { %v4543_v26 = vpop.permute.xlu1 %4542 }
 0x7f1   : > { %v4609_v58 = vpop.permute.xlu0 %4608  ;;  %v4578_v1 = vadd.f32 %v4543_v26, %v9373_v0 }
 0x7f2   : > { %v4643_v24 = vadd.f32 %v4609_v58, %v4579_v50 }
 0x7f4   : > { %v4607_v14 = vpop.permute.xlu1 %4606 }
 0x7f5   : > { %v4673_v57 = vpop.permute.xlu0 %4672  ;;  %v4642_v43 = vadd.f32 %v4607_v14, %v4578_v1 }
 0x7f6   : > { %v4707_v8 = vadd.f32 %v4673_v57, %v4643_v24 }
 0x7f8   : > { %5234 = vrot.lane.b32.xlu0 %v4707_v8, %s6526_s3  ;;  %v4671_v10 = vpop.permute.xlu1 %4670 }
 0x7f9   : > { %v4706_v18 = vadd.f32 %v4671_v10, %v4642_v43  ;;  %v4549_v23 = vpop.permute.xlu0 %4548 }
 0x7fa   : > { %v4581_v22 = vadd.f32 %v4549_v23, %v9396_v45 }
 0x7fb   : > { %5232 = vrot.lane.b32.xlu1 %v4706_v18, %s6526_s3 }
 0x7fc   : > { %v4547_v54 = vpop.permute.xlu1 %4546 }
 0x7fd   : > { %v4613_v6 = vpop.permute.xlu0 %4612  ;;  %v4580_v0 = vadd.f32 %v4547_v54, %v9400_v21  ;;  %v5144_v21 = vsub.f32 0.0, %v9390_v44 }
 0x7fe   : > { %v4645_v19 = vadd.f32 %v4613_v6, %v4581_v22 }
 0x800   : > { %v4611_v30 = vpop.permute.xlu1 %4610 }
 0x801   : > { %v4677_v55 = vpop.permute.xlu0 %4676  ;;  %v4644_v15 = vadd.f32 %v4611_v30, %v4580_v0 }
 0x802   : > { %v4709_v2 = vadd.f32 %v4677_v55, %v4645_v19 }
 0x804   : > { %5238 = vrot.lane.b32.xlu0 %v4709_v2, %s6526_s3  ;;  %v4675_v37 = vpop.permute.xlu1 %4674 }
 0x805   : > { %v4708_v29 = vadd.f32 %v4675_v37, %v4644_v15 }
 0x807   : > { %5236 = vrot.lane.b32.xlu1 %v4708_v29, %s6526_s3  ;;  %s6454_s3 = scalar_lea.vmem %s6453_s25, 4096 }
 0x808   : > { %p6456_p1 = scmp.lt.s32.totalorder %s6454_s3, %s6448_s26 }
 0x80a   : > { %p6457_p2 = por %p6456_p1, %p6455_p0 }
 0x80c   : > { %p6458_p3 = pnand %p6457_p2, %p6451_p13 }
 0x832   : > { %v9483_v38 = vpop.xlane.xlu0 %5142 }
 0x836   : > { %v5209_v45 = vpop.permute.xlu0 %5208 }
 0x837   : > { %5257 = vst.msk [vmem:[%s8327_s4] sm:$0xff] %vm5256_vm2, %v5209_v45 }
 0x838   : > { %5274 = vst.msk [vmem:[%s8327_s4] sm:$0xff] %vm5273_vm5, %v9356_v28  ;;  %v9491_v42 = vpop.xlane.xlu1 %5078  ;;  %v5145_v28 = vsub.f32 0.0, %v9384_v5  ;;  %v5146_v5 = vsub.f32 0.0, %v9409_v39  ;;  %v5151_v39 = vsub.f32 0.0, %v9426_v40  ;;  %v5153_v40 = vsub.f32 0.0, %v9434_v3 }
 0x839   : > { %5291 = vst.msk [vmem:[%s8327_s4] sm:$0xff] %vm5290_vm6, %v5144_v21  ;;  %v5155_v3 = vsub.f32 0.0, %v9438_v49  ;;  %v10267_v49 = vld [vmem:[#allocation33_spill] sm:$0xff] }
 0x83a   : > { %v5215_v16 = vpop.permute.xlu0 %5214  ;;  %v5156_v36 = vsub.f32 0.0, %v10267_v49 }
 0x83b   : > { %5260 = vst.msk [vmem:[%s8327_s4 + $0x18] sm:$0xff] %vm5256_vm2, %v5215_v16 }
 0x83c   : > { %5277 = vst.msk [vmem:[%s8327_s4 + $0x18] sm:$0xff] %vm5273_vm5, %v9363_v46  ;;  %v5211_v44 = vpop.permute.xlu1 %5210 }
 0x83d   : > { %5294 = vst.msk [vmem:[%s8327_s4 + $0x18] sm:$0xff] %vm5290_vm6, %v5147_v33 }
 0x83e   : > { %5258 = vst.msk [vmem:[%s8327_s4 + $0x8] sm:$0xff] %vm5256_vm2, %v5211_v44  ;;  %v5219_v13 = vpop.permute.xlu0 %5218 }
 0x83f   : > { %5275 = vst.msk [vmem:[%s8327_s4 + $0x8] sm:$0xff] %vm5273_vm5, %v9352_v52 }
 0x840   : > { %5292 = vst.msk [vmem:[%s8327_s4 + $0x8] sm:$0xff] %vm5290_vm6, %v5145_v28  ;;  %v5213_v46 = vpop.permute.xlu1 %5212 }
 0x841   : > { %5262 = vst.msk [vmem:[%s8327_s4 + $0x28] sm:$0xff] %vm5256_vm2, %v5219_v13  ;;  %5259 = vst.msk [vmem:[%s8327_s4 + $0x10] sm:$0xff] %vm5256_vm2, %v5213_v46 }
 0x842   : > { %5279 = vst.msk [vmem:[%s8327_s4 + $0x28] sm:$0xff] %vm5273_vm5, %v9376_v51  ;;  %5276 = vst.msk [vmem:[%s8327_s4 + $0x10] sm:$0xff] %vm5273_vm5, %v9358_v17 }
 0x843   : > { %5296 = vst.msk [vmem:[%s8327_s4 + $0x28] sm:$0xff] %vm5290_vm6, %v5149_v4  ;;  %5293 = vst.msk [vmem:[%s8327_s4 + $0x10] sm:$0xff] %vm5290_vm6, %v5146_v5 }
 0x844   : > { %v5217_v52 = vpop.permute.xlu1 %5216 }
 0x845   : > { %5261 = vst.msk [vmem:[%s8327_s4 + $0x20] sm:$0xff] %vm5256_vm2, %v5217_v52 }
 0x846   : > { %5278 = vst.msk [vmem:[%s8327_s4 + $0x20] sm:$0xff] %vm5273_vm5, %v9366_v9  ;;  %v5223_v51 = vpop.permute.xlu0 %5222 }
 0x847   : > { %5295 = vst.msk [vmem:[%s8327_s4 + $0x20] sm:$0xff] %vm5290_vm6, %v5148_v11 }
 0x848   : > { %5264 = vst.msk [vmem:[%s8327_s4 + $0x38] sm:$0xff] %vm5256_vm2, %v5223_v51 }
 0x849   : > { %5281 = vst.msk [vmem:[%s8327_s4 + $0x38] sm:$0xff] %vm5273_vm5, %v9382_v62  ;;  %v5221_v17 = vpop.permute.xlu1 %5220 }
 0x84a   : > { %5298 = vst.msk [vmem:[%s8327_s4 + $0x38] sm:$0xff] %vm5290_vm6, %v5151_v39 }
 0x84b   : > { %5263 = vst.msk [vmem:[%s8327_s4 + $0x30] sm:$0xff] %vm5256_vm2, %v5221_v17 }
 0x84c   : > { %5280 = vst.msk [vmem:[%s8327_s4 + $0x30] sm:$0xff] %vm5273_vm5, %v9378_v35 }
 0x84d   : > { %5297 = vst.msk [vmem:[%s8327_s4 + $0x30] sm:$0xff] %vm5290_vm6, %v5150_v48 }
 0x852   : > { %v5227_v9 = vpop.permute.xlu0 %5226 }
 0x853   : > { %5266 = vst.msk [vmem:[%s8327_s4 + $0x48] sm:$0xff] %vm5256_vm2, %v5227_v9 }
 0x854   : > { %5283 = vst.msk [vmem:[%s8327_s4 + $0x48] sm:$0xff] %vm5273_vm5, %v9403_v41 }
 0x855   : > { %5300 = vst.msk [vmem:[%s8327_s4 + $0x48] sm:$0xff] %vm5290_vm6, %v5153_v40  ;;  %v5225_v62 = vpop.permute.xlu1 %5224 }
 0x856   : > { %5265 = vst.msk [vmem:[%s8327_s4 + $0x40] sm:$0xff] %vm5256_vm2, %v5225_v62 }
 0x857   : > { %5282 = vst.msk [vmem:[%s8327_s4 + $0x40] sm:$0xff] %vm5273_vm5, %v9393_v63  ;;  %v5154_v63 = vsub.f32 0.0, %v9436_v20 }
 0x858   : > { %5299 = vst.msk [vmem:[%s8327_s4 + $0x40] sm:$0xff] %vm5290_vm6, %v5152_v27 }
 0x85e   : > { %v5231_v35 = vpop.permute.xlu0 %5230 }
 0x85f   : > { %5268 = vst.msk [vmem:[%s8327_s4 + $0x58] sm:$0xff] %vm5256_vm2, %v5231_v35 }
 0x860   : > { %5285 = vst.msk [vmem:[%s8327_s4 + $0x58] sm:$0xff] %vm5273_vm5, %v9415_v34  ;;  %v5157_v34 = vsub.f32 0.0, %v9442_v47 }
 0x861   : > { %5302 = vst.msk [vmem:[%s8327_s4 + $0x58] sm:$0xff] %vm5290_vm6, %v5155_v3  ;;  %v5229_v41 = vpop.permute.xlu1 %5228 }
 0x862   : > { %5267 = vst.msk [vmem:[%s8327_s4 + $0x50] sm:$0xff] %vm5256_vm2, %v5229_v41 }
 0x863   : > { %5284 = vst.msk [vmem:[%s8327_s4 + $0x50] sm:$0xff] %vm5273_vm5, %v9411_v12  ;;  %v10268_v12 = vld [vmem:[#allocation31_spill] sm:$0xff] }
 0x864   : > { %5301 = vst.msk [vmem:[%s8327_s4 + $0x50] sm:$0xff] %vm5290_vm6, %v5154_v63 }
 0x86a   : > { %v5235_v61 = vpop.permute.xlu0 %5234 }
 0x86b   : > { %5270 = vst.msk [vmem:[%s8327_s4 + $0x68] sm:$0xff] %vm5256_vm2, %v5235_v61 }
 0x86c   : > { %5287 = vst.msk [vmem:[%s8327_s4 + $0x68] sm:$0xff] %vm5273_vm5, %v9424_v31  ;;  %v5159_v31 = vsub.f32 0.0, %v9483_v38 }
 0x86d   : > { %5304 = vst.msk [vmem:[%s8327_s4 + $0x68] sm:$0xff] %vm5290_vm6, %v5157_v34  ;;  %v5233_v20 = vpop.permute.xlu1 %5232 }
 0x86e   : > { %5269 = vst.msk [vmem:[%s8327_s4 + $0x60] sm:$0xff] %vm5256_vm2, %v5233_v20 }
 0x86f   : > { %5286 = vst.msk [vmem:[%s8327_s4 + $0x60] sm:$0xff] %vm5273_vm5, %v10268_v12 }
 0x870   : > { %5303 = vst.msk [vmem:[%s8327_s4 + $0x60] sm:$0xff] %vm5290_vm6, %v5156_v36 }
 0x876   : > { %v5239_v47 = vpop.permute.xlu0 %5238 }
 0x877   : > { %5272 = vst.msk [vmem:[%s8327_s4 + $0x78] sm:$0xff] %vm5256_vm2, %v5239_v47 }
 0x878   : > { %5289 = vst.msk [vmem:[%s8327_s4 + $0x78] sm:$0xff] %vm5273_vm5, %v9491_v42 }
 0x879   : > { %5306 = vst.msk [vmem:[%s8327_s4 + $0x78] sm:$0xff] %vm5290_vm6, %v5159_v31  ;;  %v5237_v32 = vpop.permute.xlu1 %5236 }
 0x87a   : > { %5271 = vst.msk [vmem:[%s8327_s4 + $0x70] sm:$0xff] %vm5256_vm2, %v5237_v32 }
 0x87b   : > { %5288 = vst.msk [vmem:[%s8327_s4 + $0x70] sm:$0xff] %vm5273_vm5, %v10270_v25 }
 0x87c   : > { %5305 = vst.msk [vmem:[%s8327_s4 + $0x70] sm:$0xff] %vm5290_vm6, %v5158_v53 }
 0x87d   : > { %6461 = shalt.err (!%p6458_p3)
}
 0x87e   : > { %s6462_s4 = scalar_lea.hbm %s9612_s0, 2048  ;;  %s6466_s23 = scalar_lea.hbm %s9682_s15, 4096 }
 0x87f   : > { %p6463_p4 = scmp.ne.s32.totalorder %s9612_s0, %s6462_s4  ;;  %p6467_p9 = scmp.lt.u32.totalorder %s9612_s0, %s9682_s15 }
 0x880   : > { %p6468_p10 = scmp.lt.u32.totalorder %s6466_s23, %s6462_s4  ;;  %p6470_p12 = scmp.lt.u32.totalorder %s6462_s4, %s9612_s0 }
 0x881   : > { %p6464_p7 = pnand %p6463_p4, %p6648_p5 }
 0x882   : > { %p6469_p11 = por %p6468_p10, %p6467_p9 }
 0x883   : > { %p6465_p8 = pneg %p6464_p7 }
 0x884   : > { %p6471_p13 = por %p6470_p12, %p6469_p11 }
 0x886   : > { %p6472_p0 = pnand %p6471_p13, %p6465_p8 }
 0x888   : > { %6475 = shalt.err (!%p6472_p0)
}
 0x889   : > { %s6528_s26 = smov 128   ;;  %s6529_s25 = smov 8  }
 0x88a   : > { %6206 = dma.vmem_to_hbm [thread:$0]  (%p6648_p5), %s9614_s5, 2048, %s9612_s0, %s9626_s17, %s6528_s26, %s6528_s26, %s6529_s25  }
 0x88b PF: > { %p6212_p1 = scmp.ge.s32.totalorder %s6510_s21, 2  ;;  %s5336_s3 = sand.u32 1, %s6498_s18  }
 0x88c   : > { %s5337_s4 = scalar_lea.sflag [#allocation3], %s5336_s3 }
 0x88d   : > { %p6209_p2 = pnand %p6212_p1, %p6652_p6 }
 0x88f   : > { %6493 = dma.done.wait (!%p6209_p2), %s5337_s4, 2048  }
 0x890   : > { %6495 = vsyncadd (!%p6209_p2), %s5337_s4, 4294965248  ;;  %p25_p3 = scmp.ge.s32.totalorder %s6635_s24, 4   ;;  %s10272_s18 = smov %s6502_s19 }
 0x891   : > { %s10273_s19 = smov %s6506_s20  ;;  %s10274_s20 = smov %s6646_s27 }
 0x892   : > { %s10275_s21 = smov %s6635_s24  ;;  %27 = sbr.rel (!%p25_p3) target bundleno = 9 (0x9), region = 121 }
 0x899   :  { %5342 = vsyncpa [#allocation3], 1 }
 0x89a   :  { %5344 = vsyncpa [#allocation3 + $0x1], 1 }

</bundles_post_ra>
